<compile_context>
chip_gen: v6e
topology: v6e:2x2x1
jax: 0.10.0
libtpu: 0.0.40
codegen_flags: <defaults>
</compile_context>

<pallas_src>
import functools

import jax
import jax.numpy as jnp
from jax.experimental import pallas as pl
from jax.experimental.pallas import tpu as pltpu

# ----------------------------- config ---------------------------------------
VOCAB = 50
HIDDEN = 32          # roberta hidden_size (small synthetic config)
LAYERS = 2
HEADS = 2
HEAD_DIM = HIDDEN // HEADS
INTERMEDIATE = 64
MAX_POS = 40
PAD_ID = 1           # RoBERTa padding_idx
NUM_META = 6         # num_metadata_features
META_PROJ = 128      # metadata_projection output dim (as in the module)
LN_EPS = 1e-5

# ------------------- packed weight-slab row layout (static) ------------------
VEC_PER_LAYER = 3 * HEADS + 7          # bq/bk/bv per head + bo + ln1 g/b + bff1 + bff2 + ln2 g/b
R_META_W = 0                                       # metadata projection weight (NUM_META rows)
R_CLF_CLS = ((NUM_META + 7) // 8) * 8              # classifier rows for CLS part (HIDDEN rows)
R_CLF_META = R_CLF_CLS + HIDDEN                    # classifier rows for metadata part (META_PROJ rows)
R_FF1 = R_CLF_META + META_PROJ                     # per-layer wff1 (HIDDEN rows each)
R_FF2 = R_FF1 + LAYERS * HIDDEN                    # per-layer wff2 (INTERMEDIATE rows each)
R_EMB_LN_G = R_FF2 + LAYERS * INTERMEDIATE
R_EMB_LN_B = R_EMB_LN_G + 1
R_LVEC = R_EMB_LN_B + 1                            # per-layer vector block (VEC_PER_LAYER rows each)
R_META_B = R_LVEC + LAYERS * VEC_PER_LAYER
R_CLF_B = R_META_B + 1
WG_ROWS = R_CLF_B + 1

# offsets inside each per-layer vector block
V_BQ = 0                 # + head
V_BK = HEADS             # + head
V_BV = 2 * HEADS         # + head
V_BO = 3 * HEADS
V_LN1G = V_BO + 1
V_LN1B = V_BO + 2
V_BFF1 = V_BO + 3
V_BFF2 = V_BO + 4
V_LN2G = V_BO + 5
V_LN2B = V_BO + 6

# ----------------------------- fused kernel ---------------------------------


def _fused_forward_kernel(act_ref, wattn_ref, wg_ref, o_ref, ctx_ref,
                          *, batch, seq):
    """Entire MetadataRoBERTa forward for one (small) batch, VMEM-resident."""
    f32 = jnp.float32
    B, S, D, I = batch, seq, HIDDEN, INTERMEDIATE

    def row(r, n):
        # (1, n) slice of the packed vector slab; lane offset 0 -> cheap load.
        return wg_ref[r:r + 1, 0:n]

    def attn_blk(l, hh, j):
        # (32, 32) per-(layer, head) attention weight block (zero-padded).
        return wattn_ref[(l * HEADS + hh) * 4 + j]

    def layer_norm(x, r_g, r_b):
        g = row(r_g, D)
        b = row(r_b, D)
        mean = jnp.mean(x, axis=-1, keepdims=True)
        xc = x - mean
        var = jnp.mean(xc * xc, axis=-1, keepdims=True)
        return xc * jax.lax.rsqrt(var + LN_EPS) * g + b

    def gelu(x):
        # exact (erf-based) GELU, as in HF RoBERTa intermediate
        return 0.5 * x * (1.0 + jax.lax.erf(x * 0.7071067811865476))

    # ---- hoisted per-batch attention-mask bias (broadcast once, reused L*H x)
    bias = [jnp.broadcast_to(act_ref[B * S + b:B * S + b + 1, 0:S], (S, S))
            for b in range(B)]

    # ---- embedding LayerNorm -------------------------------------------------
    h = layer_norm(act_ref[0:B * S, 0:D], R_EMB_LN_G, R_EMB_LN_B)

    for l in range(LAYERS):                      # static unroll (L=2)
        x = h                                    # (B*S, D)
        vb = R_LVEC + l * VEC_PER_LAYER

        # -------- self-attention: per (batch, head), no lane slicing/concats --
        for b in range(B):                       # static (B=2)
            xb = x[b * S:(b + 1) * S, :]         # (S, D), vreg-aligned sublane slice
            acc = None
            for hh in range(HEADS):              # static (H=2)
                # Wq (pre-scaled) / Wk / Wv padded to (D, D): q/k/v come out
                # with zero upper lanes, so no per-head value slicing is needed.
                q = jnp.dot(xb, attn_blk(l, hh, 0),
                            preferred_element_type=f32) + row(vb + V_BQ + hh, D)
                k = jnp.dot(xb, attn_blk(l, hh, 1),
                            preferred_element_type=f32) + row(vb + V_BK + hh, D)
                v = jnp.dot(xb, attn_blk(l, hh, 2),
                            preferred_element_type=f32) + row(vb + V_BV + hh, D)
                s = jnp.dot(q, k.T, preferred_element_type=f32) + bias[b]
                s = s - jnp.max(s, axis=-1, keepdims=True)
                p = jnp.exp(s)
                p = p * pl.reciprocal(jnp.sum(p, axis=-1, keepdims=True),
                                      approx=True)
                ho = jnp.dot(p, v, preferred_element_type=f32)   # (S, D)
                # per-head partial output projection (Wo rows for this head,
                # zero rows elsewhere) accumulated instead of a lane concat.
                contrib = jnp.dot(ho, attn_blk(l, hh, 3),
                                  preferred_element_type=f32)
                acc = contrib if hh == 0 else acc + contrib
            ctx_ref[b * S:(b + 1) * S, :] = acc      # aligned scratch store

        attn = ctx_ref[...] + row(vb + V_BO, D)
        h = layer_norm(attn + x, vb + V_LN1G, vb + V_LN1B)

        # -------- feed-forward -------------------------------------------------
        w1 = wg_ref[R_FF1 + l * D:R_FF1 + (l + 1) * D, 0:I]        # (D, I)
        w2 = wg_ref[R_FF2 + l * I:R_FF2 + (l + 1) * I, 0:D]        # (I, D)
        inter = gelu(jnp.dot(h, w1, preferred_element_type=f32)
                     + row(vb + V_BFF1, I))
        ffn = jnp.dot(inter, w2, preferred_element_type=f32) + row(vb + V_BFF2, D)
        h = layer_norm(ffn + h, vb + V_LN2G, vb + V_LN2B)

    # ---- CLS extraction via one-hot selection matmul (MXU, no row concat) ----
    col = jax.lax.broadcasted_iota(jnp.int32, (B, B * S), 1)
    rw = jax.lax.broadcasted_iota(jnp.int32, (B, B * S), 0)
    sel = jnp.where(col == rw * S, 1.0, 0.0).astype(f32)           # (B, B*S)
    cls = jnp.dot(sel, h, preferred_element_type=f32)              # (B, D)

    # ---- metadata projection --------------------------------------------------
    meta = act_ref[B * S + B:B * S + 2 * B, 0:NUM_META]            # (B, NUM_META)
    meta_emb = jnp.dot(meta, wg_ref[R_META_W:R_META_W + NUM_META, :],
                       preferred_element_type=f32) + row(R_META_B, 128)

    # ---- split classifier (no 160-lane concat); lane-dense (B,128) output ----
    # Dropout on the combined embedding is identity in eval mode.
    # TODO(synk): training-mode stochastic dropout via pltpu.prng_random_bits.
    logits = (jnp.dot(cls, wg_ref[R_CLF_CLS:R_CLF_CLS + D, :],
                      preferred_element_type=f32)
              + jnp.dot(meta_emb, wg_ref[R_CLF_META:R_CLF_META + META_PROJ, :],
                        preferred_element_type=f32)
              + row(R_CLF_B, 128))
    o_ref[...] = logits.astype(o_ref.dtype)                        # (B, 128)


# ----------------------------- parameters -----------------------------------


def init_params(key):
    """PyTorch-shaped synthetic RoBERTa + metadata-head parameters."""
    ks = iter(jax.random.split(key, 16))

    def w(shape):
        return jax.random.normal(next(ks), shape, jnp.float32) * 0.02

    L, D, I = LAYERS, HIDDEN, INTERMEDIATE
    return {
        "word_emb": w((VOCAB, D)),
        "pos_emb": w((MAX_POS, D)),
        "type_emb": w((1, D)),
        "emb_ln_g": jnp.ones((D,), jnp.float32),
        "emb_ln_b": jnp.zeros((D,), jnp.float32),
        "wq": w((L, D, D)), "wk": w((L, D, D)),
        "wv": w((L, D, D)), "wo": w((L, D, D)),
        "bq": jnp.zeros((L, D), jnp.float32),
        "bk": jnp.zeros((L, D), jnp.float32),
        "bv": jnp.zeros((L, D), jnp.float32),
        "bo": jnp.zeros((L, D), jnp.float32),
        "ln1_g": jnp.ones((L, D), jnp.float32),
        "ln1_b": jnp.zeros((L, D), jnp.float32),
        "wff1": w((L, D, I)), "bff1": jnp.zeros((L, I), jnp.float32),
        "wff2": w((L, I, D)), "bff2": jnp.zeros((L, D), jnp.float32),
        "ln2_g": jnp.ones((L, D), jnp.float32),
        "ln2_b": jnp.zeros((L, D), jnp.float32),
        "meta_w": w((NUM_META, META_PROJ)),
        "meta_b": jnp.zeros((META_PROJ,), jnp.float32),
        "clf_w": w((D + META_PROJ, 1)),
        "clf_b": jnp.zeros((1,), jnp.float32),
    }


def pack_params(params):
    """One-time packing into the kernel's lane-dense slabs."""
    L, H, D, Dh, I = LAYERS, HEADS, HIDDEN, HEAD_DIM, INTERMEDIATE
    scale = 1.0 / (Dh ** 0.5)
    f32 = jnp.float32

    # Per-(layer, head) attention blocks, zero-padded to (D, D):
    #   [0] Wq * scale (lanes 0:Dh), [1] Wk, [2] Wv, [3] Wo_head (rows 0:Dh).
    w_attn = jnp.zeros((L, H, 4, D, D), f32)
    for l in range(L):
        for h in range(H):
            cs = slice(h * Dh, (h + 1) * Dh)
            w_attn = w_attn.at[l, h, 0, :, 0:Dh].set(params["wq"][l][:, cs] * scale)
            w_attn = w_attn.at[l, h, 1, :, 0:Dh].set(params["wk"][l][:, cs])
            w_attn = w_attn.at[l, h, 2, :, 0:Dh].set(params["wv"][l][:, cs])
            w_attn = w_attn.at[l, h, 3, 0:Dh, :].set(params["wo"][l][cs, :])
    w_attn = w_attn.reshape(L * H * 4, D, D)

    wg = jnp.zeros((WG_ROWS, 128), f32)
    wg = wg.at[R_META_W:R_META_W + NUM_META, :].set(params["meta_w"])
    wg = wg.at[R_CLF_CLS:R_CLF_CLS + D, 0:1].set(params["clf_w"][:D])
    wg = wg.at[R_CLF_META:R_CLF_META + META_PROJ, 0:1].set(params["clf_w"][D:])
    wg = wg.at[R_EMB_LN_G, 0:D].set(params["emb_ln_g"])
    wg = wg.at[R_EMB_LN_B, 0:D].set(params["emb_ln_b"])
    for l in range(L):
        wg = wg.at[R_FF1 + l * D:R_FF1 + (l + 1) * D, 0:I].set(params["wff1"][l])
        wg = wg.at[R_FF2 + l * I:R_FF2 + (l + 1) * I, 0:D].set(params["wff2"][l])
        vb = R_LVEC + l * VEC_PER_LAYER
        for h in range(H):
            cs = slice(h * Dh, (h + 1) * Dh)
            # 1/sqrt(Dh) folded into the Q bias slice as well (matches weights).
            wg = wg.at[vb + V_BQ + h, 0:Dh].set(params["bq"][l][cs] * scale)
            wg = wg.at[vb + V_BK + h, 0:Dh].set(params["bk"][l][cs])
            wg = wg.at[vb + V_BV + h, 0:Dh].set(params["bv"][l][cs])
        wg = wg.at[vb + V_BO, 0:D].set(params["bo"][l])
        wg = wg.at[vb + V_LN1G, 0:D].set(params["ln1_g"][l])
        wg = wg.at[vb + V_LN1B, 0:D].set(params["ln1_b"][l])
        wg = wg.at[vb + V_BFF1, 0:I].set(params["bff1"][l])
        wg = wg.at[vb + V_BFF2, 0:D].set(params["bff2"][l])
        wg = wg.at[vb + V_LN2G, 0:D].set(params["ln2_g"][l])
        wg = wg.at[vb + V_LN2B, 0:D].set(params["ln2_b"][l])
    wg = wg.at[R_META_B, :].set(params["meta_b"])
    wg = wg.at[R_CLF_B, :].set(jnp.full((128,), params["clf_b"][0], f32))

    return {"word_emb": params["word_emb"], "pos_emb": params["pos_emb"],
            "type_emb": params["type_emb"], "w_attn": w_attn, "wg": wg}


# ----------------------------- forward --------------------------------------


@jax.jit
def forward(packed, input_ids, attention_mask, metadata):
    B, S = input_ids.shape

    # RoBERTa position ids (padding_idx-aware) -- scalar glue in plain JAX.
    pad_mask = (input_ids != PAD_ID).astype(jnp.int32)
    position_ids = jnp.cumsum(pad_mask, axis=1) * pad_mask + PAD_ID

    # Data-dependent embedding gathers stay in XLA; everything else is fused.
    emb = (packed["word_emb"][input_ids]
           + packed["pos_emb"][position_ids]
           + packed["type_emb"][0][None, None, :])
    emb = emb.reshape(B * S, HIDDEN).astype(jnp.float32)

    # Additive bias over key positions: 0 keep, -1e9 pad (finite -> no NaN).
    mask_bias = (1.0 - attention_mask.astype(jnp.float32)) * (-1e9)   # (B, S)

    # Activation slab: embeddings, mask bias and metadata in one lane-dense DMA.
    rows = B * S + 2 * B
    act = jnp.zeros((rows, 128), jnp.float32)
    act = act.at[0:B * S, 0:HIDDEN].set(emb)
    act = act.at[B * S:B * S + B, 0:S].set(mask_bias)
    act = act.at[B * S + B:rows, 0:NUM_META].set(metadata.astype(jnp.float32))

    out = pl.pallas_call(
        functools.partial(_fused_forward_kernel, batch=B, seq=S),
        out_shape=jax.ShapeDtypeStruct((B, 128), jnp.float32),
        in_specs=[pl.BlockSpec(memory_space=pltpu.MemorySpace.VMEM)] * 3,
        out_specs=pl.BlockSpec(memory_space=pltpu.MemorySpace.VMEM),
        scratch_shapes=[pltpu.VMEM((B * S, HIDDEN), jnp.float32)],
    )(act, packed["w_attn"], packed["wg"])

    # Column 0 of the lane-dense output holds the logit.
    return out[:, 0]                                  # squeeze(-1) -> (B,)


# ----------------------------- main ------------------------------------------

if __name__ == "__main__":
    key = jax.random.PRNGKey(0)
    pkey, ikey, mkey = jax.random.split(key, 3)

    params = init_params(pkey)
    packed = pack_params(params)          # one-time weight packing

    B, S = 2, 8
    input_ids = jax.random.randint(ikey, (B, S), 2, VOCAB)
    attention_mask = jnp.ones((B, S), dtype=jnp.int32)
    attention_mask = attention_mask.at[1, 6:].set(0)   # pad tail of sample 1
    input_ids = jnp.where(attention_mask == 1, input_ids, PAD_ID)
    metadata = jax.random.normal(mkey, (B, NUM_META), dtype=jnp.float32)

    logits = forward(packed, input_ids, attention_mask, metadata)
    jax.block_until_ready(logits)
    assert logits.shape == (B,), logits.shape
    assert bool(jnp.all(jnp.isfinite(logits)))
    print("KERNEL_OK")
</pallas_src>

<mosaic_0001>
module attributes {stable_mosaic.version = 11 : i64} {
  func.func @_fused_forward_kernel(%arg0: memref<20x128xf32, #tpu.memory_space<vmem>>, %arg1: memref<16x32x32xf32, #tpu.memory_space<vmem>>, %arg2: memref<390x128xf32, #tpu.memory_space<vmem>>, %arg3: memref<2x128xf32, #tpu.memory_space<vmem>>, %arg4: memref<16x32xf32, #tpu.memory_space<vmem>>) attributes {dimension_semantics = [], scalar_prefetch = 0 : i64, scratch_operands = 1 : i64, tpu.core_type = #tpu.core_type<tc>} {
    %c16 = arith.constant 16 : index
    %c0 = arith.constant 0 : index
    %0 = vector.load %arg0[%c16, %c0] : memref<20x128xf32, #tpu.memory_space<vmem>>, vector<1x8xf32>
    %1 = vector.shape_cast %0 : vector<1x8xf32> to vector<1x8xf32>
    %2 = vector.broadcast %1 : vector<1x8xf32> to vector<8x8xf32>
    %c17 = arith.constant 17 : index
    %c0_0 = arith.constant 0 : index
    %3 = vector.load %arg0[%c17, %c0_0] : memref<20x128xf32, #tpu.memory_space<vmem>>, vector<1x8xf32>
    %4 = vector.shape_cast %3 : vector<1x8xf32> to vector<1x8xf32>
    %5 = vector.broadcast %4 : vector<1x8xf32> to vector<8x8xf32>
    %c0_1 = arith.constant 0 : index
    %c0_2 = arith.constant 0 : index
    %6 = vector.load %arg0[%c0_1, %c0_2] : memref<20x128xf32, #tpu.memory_space<vmem>>, vector<16x32xf32>
    %c360 = arith.constant 360 : index
    %c0_3 = arith.constant 0 : index
    %7 = vector.load %arg2[%c360, %c0_3] : memref<390x128xf32, #tpu.memory_space<vmem>>, vector<1x32xf32>
    %c361 = arith.constant 361 : index
    %c0_4 = arith.constant 0 : index
    %8 = vector.load %arg2[%c361, %c0_4] : memref<390x128xf32, #tpu.memory_space<vmem>>, vector<1x32xf32>
    %cst = arith.constant dense<0.000000e+00> : vector<16xf32>
    %9 = vector.multi_reduction <add>, %6, %cst [1] : vector<16x32xf32> to vector<16xf32>
    %10 = vector.shape_cast %9 : vector<16xf32> to vector<16x1xf32>
    %cst_5 = arith.constant 3.200000e+01 : f32
    %11 = vector.broadcast %cst_5 : f32 to vector<16x1xf32>
    %12 = arith.divf %10, %11 : vector<16x1xf32>
    %13 = vector.broadcast %12 : vector<16x1xf32> to vector<16x32xf32>
    %14 = arith.subf %6, %13 : vector<16x32xf32>
    %15 = arith.mulf %14, %14 : vector<16x32xf32>
    %cst_6 = arith.constant dense<0.000000e+00> : vector<16xf32>
    %16 = vector.multi_reduction <add>, %15, %cst_6 [1] : vector<16x32xf32> to vector<16xf32>
    %17 = vector.shape_cast %16 : vector<16xf32> to vector<16x1xf32>
    %cst_7 = arith.constant 3.200000e+01 : f32
    %18 = vector.broadcast %cst_7 : f32 to vector<16x1xf32>
    %19 = arith.divf %17, %18 : vector<16x1xf32>
    %cst_8 = arith.constant 9.99999974E-6 : f32
    %20 = vector.broadcast %cst_8 : f32 to vector<16x1xf32>
    %21 = arith.addf %19, %20 : vector<16x1xf32>
    %22 = math.rsqrt %21 : vector<16x1xf32>
    %23 = vector.broadcast %22 : vector<16x1xf32> to vector<16x32xf32>
    %24 = arith.mulf %14, %23 : vector<16x32xf32>
    %25 = vector.broadcast %7 : vector<1x32xf32> to vector<16x32xf32>
    %26 = arith.mulf %24, %25 : vector<16x32xf32>
    %27 = vector.broadcast %8 : vector<1x32xf32> to vector<16x32xf32>
    %28 = arith.addf %26, %27 : vector<16x32xf32>
    %29 = vector.extract_strided_slice %28 {offsets = [0, 0], sizes = [8, 32], strides = [1, 1]} : vector<16x32xf32> to vector<8x32xf32>
    %c0_9 = arith.constant 0 : index
    %c0_10 = arith.constant 0 : index
    %c0_11 = arith.constant 0 : index
    %30 = vector.load %arg1[%c0_9, %c0_10, %c0_11] : memref<16x32x32xf32, #tpu.memory_space<vmem>>, vector<1x32x32xf32>
    %31 = vector.shape_cast %30 : vector<1x32x32xf32> to vector<32x32xf32>
    %cst_12 = arith.constant dense<0.000000e+00> : vector<8x32xf32>
    %32 = tpu.matmul %29, %31, %cst_12 {dimension_numbers = #tpu.dot_dimension_numbers<[1], [0], [0], [1], [0, 0, 1, 1], [], []>} : vector<8x32xf32>, vector<32x32xf32>, vector<8x32xf32> -> vector<8x32xf32>
    %c362 = arith.constant 362 : index
    %c0_13 = arith.constant 0 : index
    %33 = vector.load %arg2[%c362, %c0_13] : memref<390x128xf32, #tpu.memory_space<vmem>>, vector<1x32xf32>
    %34 = vector.broadcast %33 : vector<1x32xf32> to vector<8x32xf32>
    %35 = arith.addf %32, %34 : vector<8x32xf32>
    %c1 = arith.constant 1 : index
    %c0_14 = arith.constant 0 : index
    %c0_15 = arith.constant 0 : index
    %36 = vector.load %arg1[%c1, %c0_14, %c0_15] : memref<16x32x32xf32, #tpu.memory_space<vmem>>, vector<1x32x32xf32>
    %37 = vector.shape_cast %36 : vector<1x32x32xf32> to vector<32x32xf32>
    %cst_16 = arith.constant dense<0.000000e+00> : vector<8x32xf32>
    %38 = tpu.matmul %29, %37, %cst_16 {dimension_numbers = #tpu.dot_dimension_numbers<[1], [0], [0], [1], [0, 0, 1, 1], [], []>} : vector<8x32xf32>, vector<32x32xf32>, vector<8x32xf32> -> vector<8x32xf32>
    %c364 = arith.constant 364 : index
    %c0_17 = arith.constant 0 : index
    %39 = vector.load %arg2[%c364, %c0_17] : memref<390x128xf32, #tpu.memory_space<vmem>>, vector<1x32xf32>
    %40 = vector.broadcast %39 : vector<1x32xf32> to vector<8x32xf32>
    %41 = arith.addf %38, %40 : vector<8x32xf32>
    %c2 = arith.constant 2 : index
    %c0_18 = arith.constant 0 : index
    %c0_19 = arith.constant 0 : index
    %42 = vector.load %arg1[%c2, %c0_18, %c0_19] : memref<16x32x32xf32, #tpu.memory_space<vmem>>, vector<1x32x32xf32>
    %43 = vector.shape_cast %42 : vector<1x32x32xf32> to vector<32x32xf32>
    %cst_20 = arith.constant dense<0.000000e+00> : vector<8x32xf32>
    %44 = tpu.matmul %29, %43, %cst_20 {dimension_numbers = #tpu.dot_dimension_numbers<[1], [0], [0], [1], [0, 0, 1, 1], [], []>} : vector<8x32xf32>, vector<32x32xf32>, vector<8x32xf32> -> vector<8x32xf32>
    %c366 = arith.constant 366 : index
    %c0_21 = arith.constant 0 : index
    %45 = vector.load %arg2[%c366, %c0_21] : memref<390x128xf32, #tpu.memory_space<vmem>>, vector<1x32xf32>
    %46 = vector.broadcast %45 : vector<1x32xf32> to vector<8x32xf32>
    %47 = arith.addf %44, %46 : vector<8x32xf32>
    %48 = tpu.transpose %41, [1, 0] : vector<8x32xf32> -> vector<32x8xf32>
    %cst_22 = arith.constant dense<0.000000e+00> : vector<8x8xf32>
    %49 = tpu.matmul %35, %48, %cst_22 {dimension_numbers = #tpu.dot_dimension_numbers<[1], [0], [0], [1], [0, 0, 1, 1], [], []>} : vector<8x32xf32>, vector<32x8xf32>, vector<8x8xf32> -> vector<8x8xf32>
    %50 = arith.addf %49, %2 : vector<8x8xf32>
    %cst_23 = arith.constant dense<0xFF800000> : vector<8xf32>
    %51 = vector.multi_reduction <maximumf>, %50, %cst_23 [1] : vector<8x8xf32> to vector<8xf32>
    %52 = vector.shape_cast %51 : vector<8xf32> to vector<8x1xf32>
    %53 = vector.broadcast %52 : vector<8x1xf32> to vector<8x8xf32>
    %54 = arith.subf %50, %53 : vector<8x8xf32>
    %55 = math.exp %54 : vector<8x8xf32>
    %cst_24 = arith.constant dense<0.000000e+00> : vector<8xf32>
    %56 = vector.multi_reduction <add>, %55, %cst_24 [1] : vector<8x8xf32> to vector<8xf32>
    %57 = vector.shape_cast %56 : vector<8xf32> to vector<8x1xf32>
    %58 = tpu.reciprocal %57 {approx = true} : vector<8x1xf32> -> vector<8x1xf32>
    %59 = vector.broadcast %58 : vector<8x1xf32> to vector<8x8xf32>
    %60 = arith.mulf %55, %59 : vector<8x8xf32>
    %cst_25 = arith.constant dense<0.000000e+00> : vector<8x32xf32>
    %61 = tpu.matmul %60, %47, %cst_25 {dimension_numbers = #tpu.dot_dimension_numbers<[1], [0], [0], [1], [0, 0, 1, 1], [], []>} : vector<8x8xf32>, vector<8x32xf32>, vector<8x32xf32> -> vector<8x32xf32>
    %c3 = arith.constant 3 : index
    %c0_26 = arith.constant 0 : index
    %c0_27 = arith.constant 0 : index
    %62 = vector.load %arg1[%c3, %c0_26, %c0_27] : memref<16x32x32xf32, #tpu.memory_space<vmem>>, vector<1x32x32xf32>
    %63 = vector.shape_cast %62 : vector<1x32x32xf32> to vector<32x32xf32>
    %cst_28 = arith.constant dense<0.000000e+00> : vector<8x32xf32>
    %64 = tpu.matmul %61, %63, %cst_28 {dimension_numbers = #tpu.dot_dimension_numbers<[1], [0], [0], [1], [0, 0, 1, 1], [], []>} : vector<8x32xf32>, vector<32x32xf32>, vector<8x32xf32> -> vector<8x32xf32>
    %c4 = arith.constant 4 : index
    %c0_29 = arith.constant 0 : index
    %c0_30 = arith.constant 0 : index
    %65 = vector.load %arg1[%c4, %c0_29, %c0_30] : memref<16x32x32xf32, #tpu.memory_space<vmem>>, vector<1x32x32xf32>
    %66 = vector.shape_cast %65 : vector<1x32x32xf32> to vector<32x32xf32>
    %cst_31 = arith.constant dense<0.000000e+00> : vector<8x32xf32>
    %67 = tpu.matmul %29, %66, %cst_31 {dimension_numbers = #tpu.dot_dimension_numbers<[1], [0], [0], [1], [0, 0, 1, 1], [], []>} : vector<8x32xf32>, vector<32x32xf32>, vector<8x32xf32> -> vector<8x32xf32>
    %c363 = arith.constant 363 : index
    %c0_32 = arith.constant 0 : index
    %68 = vector.load %arg2[%c363, %c0_32] : memref<390x128xf32, #tpu.memory_space<vmem>>, vector<1x32xf32>
    %69 = vector.broadcast %68 : vector<1x32xf32> to vector<8x32xf32>
    %70 = arith.addf %67, %69 : vector<8x32xf32>
    %c5 = arith.constant 5 : index
    %c0_33 = arith.constant 0 : index
    %c0_34 = arith.constant 0 : index
    %71 = vector.load %arg1[%c5, %c0_33, %c0_34] : memref<16x32x32xf32, #tpu.memory_space<vmem>>, vector<1x32x32xf32>
    %72 = vector.shape_cast %71 : vector<1x32x32xf32> to vector<32x32xf32>
    %cst_35 = arith.constant dense<0.000000e+00> : vector<8x32xf32>
    %73 = tpu.matmul %29, %72, %cst_35 {dimension_numbers = #tpu.dot_dimension_numbers<[1], [0], [0], [1], [0, 0, 1, 1], [], []>} : vector<8x32xf32>, vector<32x32xf32>, vector<8x32xf32> -> vector<8x32xf32>
    %c365 = arith.constant 365 : index
    %c0_36 = arith.constant 0 : index
    %74 = vector.load %arg2[%c365, %c0_36] : memref<390x128xf32, #tpu.memory_space<vmem>>, vector<1x32xf32>
    %75 = vector.broadcast %74 : vector<1x32xf32> to vector<8x32xf32>
    %76 = arith.addf %73, %75 : vector<8x32xf32>
    %c6 = arith.constant 6 : index
    %c0_37 = arith.constant 0 : index
    %c0_38 = arith.constant 0 : index
    %77 = vector.load %arg1[%c6, %c0_37, %c0_38] : memref<16x32x32xf32, #tpu.memory_space<vmem>>, vector<1x32x32xf32>
    %78 = vector.shape_cast %77 : vector<1x32x32xf32> to vector<32x32xf32>
    %cst_39 = arith.constant dense<0.000000e+00> : vector<8x32xf32>
    %79 = tpu.matmul %29, %78, %cst_39 {dimension_numbers = #tpu.dot_dimension_numbers<[1], [0], [0], [1], [0, 0, 1, 1], [], []>} : vector<8x32xf32>, vector<32x32xf32>, vector<8x32xf32> -> vector<8x32xf32>
    %c367 = arith.constant 367 : index
    %c0_40 = arith.constant 0 : index
    %80 = vector.load %arg2[%c367, %c0_40] : memref<390x128xf32, #tpu.memory_space<vmem>>, vector<1x32xf32>
    %81 = vector.broadcast %80 : vector<1x32xf32> to vector<8x32xf32>
    %82 = arith.addf %79, %81 : vector<8x32xf32>
    %83 = tpu.transpose %76, [1, 0] : vector<8x32xf32> -> vector<32x8xf32>
    %cst_41 = arith.constant dense<0.000000e+00> : vector<8x8xf32>
    %84 = tpu.matmul %70, %83, %cst_41 {dimension_numbers = #tpu.dot_dimension_numbers<[1], [0], [0], [1], [0, 0, 1, 1], [], []>} : vector<8x32xf32>, vector<32x8xf32>, vector<8x8xf32> -> vector<8x8xf32>
    %85 = arith.addf %84, %2 : vector<8x8xf32>
    %cst_42 = arith.constant dense<0xFF800000> : vector<8xf32>
    %86 = vector.multi_reduction <maximumf>, %85, %cst_42 [1] : vector<8x8xf32> to vector<8xf32>
    %87 = vector.shape_cast %86 : vector<8xf32> to vector<8x1xf32>
    %88 = vector.broadcast %87 : vector<8x1xf32> to vector<8x8xf32>
    %89 = arith.subf %85, %88 : vector<8x8xf32>
    %90 = math.exp %89 : vector<8x8xf32>
    %cst_43 = arith.constant dense<0.000000e+00> : vector<8xf32>
    %91 = vector.multi_reduction <add>, %90, %cst_43 [1] : vector<8x8xf32> to vector<8xf32>
    %92 = vector.shape_cast %91 : vector<8xf32> to vector<8x1xf32>
    %93 = tpu.reciprocal %92 {approx = true} : vector<8x1xf32> -> vector<8x1xf32>
    %94 = vector.broadcast %93 : vector<8x1xf32> to vector<8x8xf32>
    %95 = arith.mulf %90, %94 : vector<8x8xf32>
    %cst_44 = arith.constant dense<0.000000e+00> : vector<8x32xf32>
    %96 = tpu.matmul %95, %82, %cst_44 {dimension_numbers = #tpu.dot_dimension_numbers<[1], [0], [0], [1], [0, 0, 1, 1], [], []>} : vector<8x8xf32>, vector<8x32xf32>, vector<8x32xf32> -> vector<8x32xf32>
    %c7 = arith.constant 7 : index
    %c0_45 = arith.constant 0 : index
    %c0_46 = arith.constant 0 : index
    %97 = vector.load %arg1[%c7, %c0_45, %c0_46] : memref<16x32x32xf32, #tpu.memory_space<vmem>>, vector<1x32x32xf32>
    %98 = vector.shape_cast %97 : vector<1x32x32xf32> to vector<32x32xf32>
    %cst_47 = arith.constant dense<0.000000e+00> : vector<8x32xf32>
    %99 = tpu.matmul %96, %98, %cst_47 {dimension_numbers = #tpu.dot_dimension_numbers<[1], [0], [0], [1], [0, 0, 1, 1], [], []>} : vector<8x32xf32>, vector<32x32xf32>, vector<8x32xf32> -> vector<8x32xf32>
    %100 = arith.addf %64, %99 : vector<8x32xf32>
    %c0_48 = arith.constant 0 : index
    %c0_49 = arith.constant 0 : index
    %101 = vector.load %arg4[%c0_48, %c0_49] : memref<16x32xf32, #tpu.memory_space<vmem>>, vector<8x32xf32>
    tpu.vector_store %arg4[%c0_48, %c0_49], %100 {strides = array<i32>} : memref<16x32xf32, #tpu.memory_space<vmem>>, vector<8x32xf32>,
    %102 = vector.extract_strided_slice %28 {offsets = [8, 0], sizes = [8, 32], strides = [1, 1]} : vector<16x32xf32> to vector<8x32xf32>
    %c0_50 = arith.constant 0 : index
    %c0_51 = arith.constant 0 : index
    %c0_52 = arith.constant 0 : index
    %103 = vector.load %arg1[%c0_50, %c0_51, %c0_52] : memref<16x32x32xf32, #tpu.memory_space<vmem>>, vector<1x32x32xf32>
    %104 = vector.shape_cast %103 : vector<1x32x32xf32> to vector<32x32xf32>
    %cst_53 = arith.constant dense<0.000000e+00> : vector<8x32xf32>
    %105 = tpu.matmul %102, %104, %cst_53 {dimension_numbers = #tpu.dot_dimension_numbers<[1], [0], [0], [1], [0, 0, 1, 1], [], []>} : vector<8x32xf32>, vector<32x32xf32>, vector<8x32xf32> -> vector<8x32xf32>
    %c362_54 = arith.constant 362 : index
    %c0_55 = arith.constant 0 : index
    %106 = vector.load %arg2[%c362_54, %c0_55] : memref<390x128xf32, #tpu.memory_space<vmem>>, vector<1x32xf32>
    %107 = vector.broadcast %106 : vector<1x32xf32> to vector<8x32xf32>
    %108 = arith.addf %105, %107 : vector<8x32xf32>
    %c1_56 = arith.constant 1 : index
    %c0_57 = arith.constant 0 : index
    %c0_58 = arith.constant 0 : index
    %109 = vector.load %arg1[%c1_56, %c0_57, %c0_58] : memref<16x32x32xf32, #tpu.memory_space<vmem>>, vector<1x32x32xf32>
    %110 = vector.shape_cast %109 : vector<1x32x32xf32> to vector<32x32xf32>
    %cst_59 = arith.constant dense<0.000000e+00> : vector<8x32xf32>
    %111 = tpu.matmul %102, %110, %cst_59 {dimension_numbers = #tpu.dot_dimension_numbers<[1], [0], [0], [1], [0, 0, 1, 1], [], []>} : vector<8x32xf32>, vector<32x32xf32>, vector<8x32xf32> -> vector<8x32xf32>
    %c364_60 = arith.constant 364 : index
    %c0_61 = arith.constant 0 : index
    %112 = vector.load %arg2[%c364_60, %c0_61] : memref<390x128xf32, #tpu.memory_space<vmem>>, vector<1x32xf32>
    %113 = vector.broadcast %112 : vector<1x32xf32> to vector<8x32xf32>
    %114 = arith.addf %111, %113 : vector<8x32xf32>
    %c2_62 = arith.constant 2 : index
    %c0_63 = arith.constant 0 : index
    %c0_64 = arith.constant 0 : index
    %115 = vector.load %arg1[%c2_62, %c0_63, %c0_64] : memref<16x32x32xf32, #tpu.memory_space<vmem>>, vector<1x32x32xf32>
    %116 = vector.shape_cast %115 : vector<1x32x32xf32> to vector<32x32xf32>
    %cst_65 = arith.constant dense<0.000000e+00> : vector<8x32xf32>
    %117 = tpu.matmul %102, %116, %cst_65 {dimension_numbers = #tpu.dot_dimension_numbers<[1], [0], [0], [1], [0, 0, 1, 1], [], []>} : vector<8x32xf32>, vector<32x32xf32>, vector<8x32xf32> -> vector<8x32xf32>
    %c366_66 = arith.constant 366 : index
    %c0_67 = arith.constant 0 : index
    %118 = vector.load %arg2[%c366_66, %c0_67] : memref<390x128xf32, #tpu.memory_space<vmem>>, vector<1x32xf32>
    %119 = vector.broadcast %118 : vector<1x32xf32> to vector<8x32xf32>
    %120 = arith.addf %117, %119 : vector<8x32xf32>
    %121 = tpu.transpose %114, [1, 0] : vector<8x32xf32> -> vector<32x8xf32>
    %cst_68 = arith.constant dense<0.000000e+00> : vector<8x8xf32>
    %122 = tpu.matmul %108, %121, %cst_68 {dimension_numbers = #tpu.dot_dimension_numbers<[1], [0], [0], [1], [0, 0, 1, 1], [], []>} : vector<8x32xf32>, vector<32x8xf32>, vector<8x8xf32> -> vector<8x8xf32>
    %123 = arith.addf %122, %5 : vector<8x8xf32>
    %cst_69 = arith.constant dense<0xFF800000> : vector<8xf32>
    %124 = vector.multi_reduction <maximumf>, %123, %cst_69 [1] : vector<8x8xf32> to vector<8xf32>
    %125 = vector.shape_cast %124 : vector<8xf32> to vector<8x1xf32>
    %126 = vector.broadcast %125 : vector<8x1xf32> to vector<8x8xf32>
    %127 = arith.subf %123, %126 : vector<8x8xf32>
    %128 = math.exp %127 : vector<8x8xf32>
    %cst_70 = arith.constant dense<0.000000e+00> : vector<8xf32>
    %129 = vector.multi_reduction <add>, %128, %cst_70 [1] : vector<8x8xf32> to vector<8xf32>
    %130 = vector.shape_cast %129 : vector<8xf32> to vector<8x1xf32>
    %131 = tpu.reciprocal %130 {approx = true} : vector<8x1xf32> -> vector<8x1xf32>
    %132 = vector.broadcast %131 : vector<8x1xf32> to vector<8x8xf32>
    %133 = arith.mulf %128, %132 : vector<8x8xf32>
    %cst_71 = arith.constant dense<0.000000e+00> : vector<8x32xf32>
    %134 = tpu.matmul %133, %120, %cst_71 {dimension_numbers = #tpu.dot_dimension_numbers<[1], [0], [0], [1], [0, 0, 1, 1], [], []>} : vector<8x8xf32>, vector<8x32xf32>, vector<8x32xf32> -> vector<8x32xf32>
    %c3_72 = arith.constant 3 : index
    %c0_73 = arith.constant 0 : index
    %c0_74 = arith.constant 0 : index
    %135 = vector.load %arg1[%c3_72, %c0_73, %c0_74] : memref<16x32x32xf32, #tpu.memory_space<vmem>>, vector<1x32x32xf32>
    %136 = vector.shape_cast %135 : vector<1x32x32xf32> to vector<32x32xf32>
    %cst_75 = arith.constant dense<0.000000e+00> : vector<8x32xf32>
    %137 = tpu.matmul %134, %136, %cst_75 {dimension_numbers = #tpu.dot_dimension_numbers<[1], [0], [0], [1], [0, 0, 1, 1], [], []>} : vector<8x32xf32>, vector<32x32xf32>, vector<8x32xf32> -> vector<8x32xf32>
    %c4_76 = arith.constant 4 : index
    %c0_77 = arith.constant 0 : index
    %c0_78 = arith.constant 0 : index
    %138 = vector.load %arg1[%c4_76, %c0_77, %c0_78] : memref<16x32x32xf32, #tpu.memory_space<vmem>>, vector<1x32x32xf32>
    %139 = vector.shape_cast %138 : vector<1x32x32xf32> to vector<32x32xf32>
    %cst_79 = arith.constant dense<0.000000e+00> : vector<8x32xf32>
    %140 = tpu.matmul %102, %139, %cst_79 {dimension_numbers = #tpu.dot_dimension_numbers<[1], [0], [0], [1], [0, 0, 1, 1], [], []>} : vector<8x32xf32>, vector<32x32xf32>, vector<8x32xf32> -> vector<8x32xf32>
    %c363_80 = arith.constant 363 : index
    %c0_81 = arith.constant 0 : index
    %141 = vector.load %arg2[%c363_80, %c0_81] : memref<390x128xf32, #tpu.memory_space<vmem>>, vector<1x32xf32>
    %142 = vector.broadcast %141 : vector<1x32xf32> to vector<8x32xf32>
    %143 = arith.addf %140, %142 : vector<8x32xf32>
    %c5_82 = arith.constant 5 : index
    %c0_83 = arith.constant 0 : index
    %c0_84 = arith.constant 0 : index
    %144 = vector.load %arg1[%c5_82, %c0_83, %c0_84] : memref<16x32x32xf32, #tpu.memory_space<vmem>>, vector<1x32x32xf32>
    %145 = vector.shape_cast %144 : vector<1x32x32xf32> to vector<32x32xf32>
    %cst_85 = arith.constant dense<0.000000e+00> : vector<8x32xf32>
    %146 = tpu.matmul %102, %145, %cst_85 {dimension_numbers = #tpu.dot_dimension_numbers<[1], [0], [0], [1], [0, 0, 1, 1], [], []>} : vector<8x32xf32>, vector<32x32xf32>, vector<8x32xf32> -> vector<8x32xf32>
    %c365_86 = arith.constant 365 : index
    %c0_87 = arith.constant 0 : index
    %147 = vector.load %arg2[%c365_86, %c0_87] : memref<390x128xf32, #tpu.memory_space<vmem>>, vector<1x32xf32>
    %148 = vector.broadcast %147 : vector<1x32xf32> to vector<8x32xf32>
    %149 = arith.addf %146, %148 : vector<8x32xf32>
    %c6_88 = arith.constant 6 : index
    %c0_89 = arith.constant 0 : index
    %c0_90 = arith.constant 0 : index
    %150 = vector.load %arg1[%c6_88, %c0_89, %c0_90] : memref<16x32x32xf32, #tpu.memory_space<vmem>>, vector<1x32x32xf32>
    %151 = vector.shape_cast %150 : vector<1x32x32xf32> to vector<32x32xf32>
    %cst_91 = arith.constant dense<0.000000e+00> : vector<8x32xf32>
    %152 = tpu.matmul %102, %151, %cst_91 {dimension_numbers = #tpu.dot_dimension_numbers<[1], [0], [0], [1], [0, 0, 1, 1], [], []>} : vector<8x32xf32>, vector<32x32xf32>, vector<8x32xf32> -> vector<8x32xf32>
    %c367_92 = arith.constant 367 : index
    %c0_93 = arith.constant 0 : index
    %153 = vector.load %arg2[%c367_92, %c0_93] : memref<390x128xf32, #tpu.memory_space<vmem>>, vector<1x32xf32>
    %154 = vector.broadcast %153 : vector<1x32xf32> to vector<8x32xf32>
    %155 = arith.addf %152, %154 : vector<8x32xf32>
    %156 = tpu.transpose %149, [1, 0] : vector<8x32xf32> -> vector<32x8xf32>
    %cst_94 = arith.constant dense<0.000000e+00> : vector<8x8xf32>
    %157 = tpu.matmul %143, %156, %cst_94 {dimension_numbers = #tpu.dot_dimension_numbers<[1], [0], [0], [1], [0, 0, 1, 1], [], []>} : vector<8x32xf32>, vector<32x8xf32>, vector<8x8xf32> -> vector<8x8xf32>
    %158 = arith.addf %157, %5 : vector<8x8xf32>
    %cst_95 = arith.constant dense<0xFF800000> : vector<8xf32>
    %159 = vector.multi_reduction <maximumf>, %158, %cst_95 [1] : vector<8x8xf32> to vector<8xf32>
    %160 = vector.shape_cast %159 : vector<8xf32> to vector<8x1xf32>
    %161 = vector.broadcast %160 : vector<8x1xf32> to vector<8x8xf32>
    %162 = arith.subf %158, %161 : vector<8x8xf32>
    %163 = math.exp %162 : vector<8x8xf32>
    %cst_96 = arith.constant dense<0.000000e+00> : vector<8xf32>
    %164 = vector.multi_reduction <add>, %163, %cst_96 [1] : vector<8x8xf32> to vector<8xf32>
    %165 = vector.shape_cast %164 : vector<8xf32> to vector<8x1xf32>
    %166 = tpu.reciprocal %165 {approx = true} : vector<8x1xf32> -> vector<8x1xf32>
    %167 = vector.broadcast %166 : vector<8x1xf32> to vector<8x8xf32>
    %168 = arith.mulf %163, %167 : vector<8x8xf32>
    %cst_97 = arith.constant dense<0.000000e+00> : vector<8x32xf32>
    %169 = tpu.matmul %168, %155, %cst_97 {dimension_numbers = #tpu.dot_dimension_numbers<[1], [0], [0], [1], [0, 0, 1, 1], [], []>} : vector<8x8xf32>, vector<8x32xf32>, vector<8x32xf32> -> vector<8x32xf32>
    %c7_98 = arith.constant 7 : index
    %c0_99 = arith.constant 0 : index
    %c0_100 = arith.constant 0 : index
    %170 = vector.load %arg1[%c7_98, %c0_99, %c0_100] : memref<16x32x32xf32, #tpu.memory_space<vmem>>, vector<1x32x32xf32>
    %171 = vector.shape_cast %170 : vector<1x32x32xf32> to vector<32x32xf32>
    %cst_101 = arith.constant dense<0.000000e+00> : vector<8x32xf32>
    %172 = tpu.matmul %169, %171, %cst_101 {dimension_numbers = #tpu.dot_dimension_numbers<[1], [0], [0], [1], [0, 0, 1, 1], [], []>} : vector<8x32xf32>, vector<32x32xf32>, vector<8x32xf32> -> vector<8x32xf32>
    %173 = arith.addf %137, %172 : vector<8x32xf32>
    %c8 = arith.constant 8 : index
    %c0_102 = arith.constant 0 : index
    %174 = vector.load %arg4[%c8, %c0_102] : memref<16x32xf32, #tpu.memory_space<vmem>>, vector<8x32xf32>
    tpu.vector_store %arg4[%c8, %c0_102], %173 {strides = array<i32>} : memref<16x32xf32, #tpu.memory_space<vmem>>, vector<8x32xf32>,
    %c0_103 = arith.constant 0 : index
    %c0_104 = arith.constant 0 : index
    %175 = vector.load %arg4[%c0_103, %c0_104] : memref<16x32xf32, #tpu.memory_space<vmem>>, vector<16x32xf32>
    %c368 = arith.constant 368 : index
    %c0_105 = arith.constant 0 : index
    %176 = vector.load %arg2[%c368, %c0_105] : memref<390x128xf32, #tpu.memory_space<vmem>>, vector<1x32xf32>
    %177 = vector.broadcast %176 : vector<1x32xf32> to vector<16x32xf32>
    %178 = arith.addf %175, %177 : vector<16x32xf32>
    %179 = arith.addf %178, %28 : vector<16x32xf32>
    %c369 = arith.constant 369 : index
    %c0_106 = arith.constant 0 : index
    %180 = vector.load %arg2[%c369, %c0_106] : memref<390x128xf32, #tpu.memory_space<vmem>>, vector<1x32xf32>
    %c370 = arith.constant 370 : index
    %c0_107 = arith.constant 0 : index
    %181 = vector.load %arg2[%c370, %c0_107] : memref<390x128xf32, #tpu.memory_space<vmem>>, vector<1x32xf32>
    %cst_108 = arith.constant dense<0.000000e+00> : vector<16xf32>
    %182 = vector.multi_reduction <add>, %179, %cst_108 [1] : vector<16x32xf32> to vector<16xf32>
    %183 = vector.shape_cast %182 : vector<16xf32> to vector<16x1xf32>
    %cst_109 = arith.constant 3.200000e+01 : f32
    %184 = vector.broadcast %cst_109 : f32 to vector<16x1xf32>
    %185 = arith.divf %183, %184 : vector<16x1xf32>
    %186 = vector.broadcast %185 : vector<16x1xf32> to vector<16x32xf32>
    %187 = arith.subf %179, %186 : vector<16x32xf32>
    %188 = arith.mulf %187, %187 : vector<16x32xf32>
    %cst_110 = arith.constant dense<0.000000e+00> : vector<16xf32>
    %189 = vector.multi_reduction <add>, %188, %cst_110 [1] : vector<16x32xf32> to vector<16xf32>
    %190 = vector.shape_cast %189 : vector<16xf32> to vector<16x1xf32>
    %cst_111 = arith.constant 3.200000e+01 : f32
    %191 = vector.broadcast %cst_111 : f32 to vector<16x1xf32>
    %192 = arith.divf %190, %191 : vector<16x1xf32>
    %cst_112 = arith.constant 9.99999974E-6 : f32
    %193 = vector.broadcast %cst_112 : f32 to vector<16x1xf32>
    %194 = arith.addf %192, %193 : vector<16x1xf32>
    %195 = math.rsqrt %194 : vector<16x1xf32>
    %196 = vector.broadcast %195 : vector<16x1xf32> to vector<16x32xf32>
    %197 = arith.mulf %187, %196 : vector<16x32xf32>
    %198 = vector.broadcast %180 : vector<1x32xf32> to vector<16x32xf32>
    %199 = arith.mulf %197, %198 : vector<16x32xf32>
    %200 = vector.broadcast %181 : vector<1x32xf32> to vector<16x32xf32>
    %201 = arith.addf %199, %200 : vector<16x32xf32>
    %c168 = arith.constant 168 : index
    %c0_113 = arith.constant 0 : index
    %202 = vector.load %arg2[%c168, %c0_113] : memref<390x128xf32, #tpu.memory_space<vmem>>, vector<32x64xf32>
    %c232 = arith.constant 232 : index
    %c0_114 = arith.constant 0 : index
    %203 = vector.load %arg2[%c232, %c0_114] : memref<390x128xf32, #tpu.memory_space<vmem>>, vector<64x32xf32>
    %cst_115 = arith.constant dense<0.000000e+00> : vector<16x64xf32>
    %204 = tpu.matmul %201, %202, %cst_115 {dimension_numbers = #tpu.dot_dimension_numbers<[1], [0], [0], [1], [0, 0, 1, 1], [], []>} : vector<16x32xf32>, vector<32x64xf32>, vector<16x64xf32> -> vector<16x64xf32>
    %c371 = arith.constant 371 : index
    %c0_116 = arith.constant 0 : index
    %205 = vector.load %arg2[%c371, %c0_116] : memref<390x128xf32, #tpu.memory_space<vmem>>, vector<1x64xf32>
    %206 = vector.broadcast %205 : vector<1x64xf32> to vector<16x64xf32>
    %207 = arith.addf %204, %206 : vector<16x64xf32>
    %cst_117 = arith.constant 5.000000e-01 : f32
    %208 = vector.broadcast %cst_117 : f32 to vector<16x64xf32>
    %209 = arith.mulf %208, %207 : vector<16x64xf32>
    %cst_118 = arith.constant 0.707106769 : f32
    %210 = vector.broadcast %cst_118 : f32 to vector<16x64xf32>
    %211 = arith.mulf %207, %210 : vector<16x64xf32>
    %212 = math.erf %211 : vector<16x64xf32>
    %cst_119 = arith.constant 1.000000e+00 : f32
    %213 = vector.broadcast %cst_119 : f32 to vector<16x64xf32>
    %214 = arith.addf %213, %212 : vector<16x64xf32>
    %215 = arith.mulf %209, %214 : vector<16x64xf32>
    %cst_120 = arith.constant dense<0.000000e+00> : vector<16x32xf32>
    %216 = tpu.matmul %215, %203, %cst_120 {dimension_numbers = #tpu.dot_dimension_numbers<[1], [0], [0], [1], [0, 0, 1, 1], [], []>} : vector<16x64xf32>, vector<64x32xf32>, vector<16x32xf32> -> vector<16x32xf32>
    %c372 = arith.constant 372 : index
    %c0_121 = arith.constant 0 : index
    %217 = vector.load %arg2[%c372, %c0_121] : memref<390x128xf32, #tpu.memory_space<vmem>>, vector<1x32xf32>
    %218 = vector.broadcast %217 : vector<1x32xf32> to vector<16x32xf32>
    %219 = arith.addf %216, %218 : vector<16x32xf32>
    %220 = arith.addf %219, %201 : vector<16x32xf32>
    %c373 = arith.constant 373 : index
    %c0_122 = arith.constant 0 : index
    %221 = vector.load %arg2[%c373, %c0_122] : memref<390x128xf32, #tpu.memory_space<vmem>>, vector<1x32xf32>
    %c374 = arith.constant 374 : index
    %c0_123 = arith.constant 0 : index
    %222 = vector.load %arg2[%c374, %c0_123] : memref<390x128xf32, #tpu.memory_space<vmem>>, vector<1x32xf32>
    %cst_124 = arith.constant dense<0.000000e+00> : vector<16xf32>
    %223 = vector.multi_reduction <add>, %220, %cst_124 [1] : vector<16x32xf32> to vector<16xf32>
    %224 = vector.shape_cast %223 : vector<16xf32> to vector<16x1xf32>
    %cst_125 = arith.constant 3.200000e+01 : f32
    %225 = vector.broadcast %cst_125 : f32 to vector<16x1xf32>
    %226 = arith.divf %224, %225 : vector<16x1xf32>
    %227 = vector.broadcast %226 : vector<16x1xf32> to vector<16x32xf32>
    %228 = arith.subf %220, %227 : vector<16x32xf32>
    %229 = arith.mulf %228, %228 : vector<16x32xf32>
    %cst_126 = arith.constant dense<0.000000e+00> : vector<16xf32>
    %230 = vector.multi_reduction <add>, %229, %cst_126 [1] : vector<16x32xf32> to vector<16xf32>
    %231 = vector.shape_cast %230 : vector<16xf32> to vector<16x1xf32>
    %cst_127 = arith.constant 3.200000e+01 : f32
    %232 = vector.broadcast %cst_127 : f32 to vector<16x1xf32>
    %233 = arith.divf %231, %232 : vector<16x1xf32>
    %cst_128 = arith.constant 9.99999974E-6 : f32
    %234 = vector.broadcast %cst_128 : f32 to vector<16x1xf32>
    %235 = arith.addf %233, %234 : vector<16x1xf32>
    %236 = math.rsqrt %235 : vector<16x1xf32>
    %237 = vector.broadcast %236 : vector<16x1xf32> to vector<16x32xf32>
    %238 = arith.mulf %228, %237 : vector<16x32xf32>
    %239 = vector.broadcast %221 : vector<1x32xf32> to vector<16x32xf32>
    %240 = arith.mulf %238, %239 : vector<16x32xf32>
    %241 = vector.broadcast %222 : vector<1x32xf32> to vector<16x32xf32>
    %242 = arith.addf %240, %241 : vector<16x32xf32>
    %243 = vector.extract_strided_slice %242 {offsets = [0, 0], sizes = [8, 32], strides = [1, 1]} : vector<16x32xf32> to vector<8x32xf32>
    %c8_129 = arith.constant 8 : index
    %c0_130 = arith.constant 0 : index
    %c0_131 = arith.constant 0 : index
    %244 = vector.load %arg1[%c8_129, %c0_130, %c0_131] : memref<16x32x32xf32, #tpu.memory_space<vmem>>, vector<1x32x32xf32>
    %245 = vector.shape_cast %244 : vector<1x32x32xf32> to vector<32x32xf32>
    %cst_132 = arith.constant dense<0.000000e+00> : vector<8x32xf32>
    %246 = tpu.matmul %243, %245, %cst_132 {dimension_numbers = #tpu.dot_dimension_numbers<[1], [0], [0], [1], [0, 0, 1, 1], [], []>} : vector<8x32xf32>, vector<32x32xf32>, vector<8x32xf32> -> vector<8x32xf32>
    %c375 = arith.constant 375 : index
    %c0_133 = arith.constant 0 : index
    %247 = vector.load %arg2[%c375, %c0_133] : memref<390x128xf32, #tpu.memory_space<vmem>>, vector<1x32xf32>
    %248 = vector.broadcast %247 : vector<1x32xf32> to vector<8x32xf32>
    %249 = arith.addf %246, %248 : vector<8x32xf32>
    %c9 = arith.constant 9 : index
    %c0_134 = arith.constant 0 : index
    %c0_135 = arith.constant 0 : index
    %250 = vector.load %arg1[%c9, %c0_134, %c0_135] : memref<16x32x32xf32, #tpu.memory_space<vmem>>, vector<1x32x32xf32>
    %251 = vector.shape_cast %250 : vector<1x32x32xf32> to vector<32x32xf32>
    %cst_136 = arith.constant dense<0.000000e+00> : vector<8x32xf32>
    %252 = tpu.matmul %243, %251, %cst_136 {dimension_numbers = #tpu.dot_dimension_numbers<[1], [0], [0], [1], [0, 0, 1, 1], [], []>} : vector<8x32xf32>, vector<32x32xf32>, vector<8x32xf32> -> vector<8x32xf32>
    %c377 = arith.constant 377 : index
    %c0_137 = arith.constant 0 : index
    %253 = vector.load %arg2[%c377, %c0_137] : memref<390x128xf32, #tpu.memory_space<vmem>>, vector<1x32xf32>
    %254 = vector.broadcast %253 : vector<1x32xf32> to vector<8x32xf32>
    %255 = arith.addf %252, %254 : vector<8x32xf32>
    %c10 = arith.constant 10 : index
    %c0_138 = arith.constant 0 : index
    %c0_139 = arith.constant 0 : index
    %256 = vector.load %arg1[%c10, %c0_138, %c0_139] : memref<16x32x32xf32, #tpu.memory_space<vmem>>, vector<1x32x32xf32>
    %257 = vector.shape_cast %256 : vector<1x32x32xf32> to vector<32x32xf32>
    %cst_140 = arith.constant dense<0.000000e+00> : vector<8x32xf32>
    %258 = tpu.matmul %243, %257, %cst_140 {dimension_numbers = #tpu.dot_dimension_numbers<[1], [0], [0], [1], [0, 0, 1, 1], [], []>} : vector<8x32xf32>, vector<32x32xf32>, vector<8x32xf32> -> vector<8x32xf32>
    %c379 = arith.constant 379 : index
    %c0_141 = arith.constant 0 : index
    %259 = vector.load %arg2[%c379, %c0_141] : memref<390x128xf32, #tpu.memory_space<vmem>>, vector<1x32xf32>
    %260 = vector.broadcast %259 : vector<1x32xf32> to vector<8x32xf32>
    %261 = arith.addf %258, %260 : vector<8x32xf32>
    %262 = tpu.transpose %255, [1, 0] : vector<8x32xf32> -> vector<32x8xf32>
    %cst_142 = arith.constant dense<0.000000e+00> : vector<8x8xf32>
    %263 = tpu.matmul %249, %262, %cst_142 {dimension_numbers = #tpu.dot_dimension_numbers<[1], [0], [0], [1], [0, 0, 1, 1], [], []>} : vector<8x32xf32>, vector<32x8xf32>, vector<8x8xf32> -> vector<8x8xf32>
    %264 = arith.addf %263, %2 : vector<8x8xf32>
    %cst_143 = arith.constant dense<0xFF800000> : vector<8xf32>
    %265 = vector.multi_reduction <maximumf>, %264, %cst_143 [1] : vector<8x8xf32> to vector<8xf32>
    %266 = vector.shape_cast %265 : vector<8xf32> to vector<8x1xf32>
    %267 = vector.broadcast %266 : vector<8x1xf32> to vector<8x8xf32>
    %268 = arith.subf %264, %267 : vector<8x8xf32>
    %269 = math.exp %268 : vector<8x8xf32>
    %cst_144 = arith.constant dense<0.000000e+00> : vector<8xf32>
    %270 = vector.multi_reduction <add>, %269, %cst_144 [1] : vector<8x8xf32> to vector<8xf32>
    %271 = vector.shape_cast %270 : vector<8xf32> to vector<8x1xf32>
    %272 = tpu.reciprocal %271 {approx = true} : vector<8x1xf32> -> vector<8x1xf32>
    %273 = vector.broadcast %272 : vector<8x1xf32> to vector<8x8xf32>
    %274 = arith.mulf %269, %273 : vector<8x8xf32>
    %cst_145 = arith.constant dense<0.000000e+00> : vector<8x32xf32>
    %275 = tpu.matmul %274, %261, %cst_145 {dimension_numbers = #tpu.dot_dimension_numbers<[1], [0], [0], [1], [0, 0, 1, 1], [], []>} : vector<8x8xf32>, vector<8x32xf32>, vector<8x32xf32> -> vector<8x32xf32>
    %c11 = arith.constant 11 : index
    %c0_146 = arith.constant 0 : index
    %c0_147 = arith.constant 0 : index
    %276 = vector.load %arg1[%c11, %c0_146, %c0_147] : memref<16x32x32xf32, #tpu.memory_space<vmem>>, vector<1x32x32xf32>
    %277 = vector.shape_cast %276 : vector<1x32x32xf32> to vector<32x32xf32>
    %cst_148 = arith.constant dense<0.000000e+00> : vector<8x32xf32>
    %278 = tpu.matmul %275, %277, %cst_148 {dimension_numbers = #tpu.dot_dimension_numbers<[1], [0], [0], [1], [0, 0, 1, 1], [], []>} : vector<8x32xf32>, vector<32x32xf32>, vector<8x32xf32> -> vector<8x32xf32>
    %c12 = arith.constant 12 : index
    %c0_149 = arith.constant 0 : index
    %c0_150 = arith.constant 0 : index
    %279 = vector.load %arg1[%c12, %c0_149, %c0_150] : memref<16x32x32xf32, #tpu.memory_space<vmem>>, vector<1x32x32xf32>
    %280 = vector.shape_cast %279 : vector<1x32x32xf32> to vector<32x32xf32>
    %cst_151 = arith.constant dense<0.000000e+00> : vector<8x32xf32>
    %281 = tpu.matmul %243, %280, %cst_151 {dimension_numbers = #tpu.dot_dimension_numbers<[1], [0], [0], [1], [0, 0, 1, 1], [], []>} : vector<8x32xf32>, vector<32x32xf32>, vector<8x32xf32> -> vector<8x32xf32>
    %c376 = arith.constant 376 : index
    %c0_152 = arith.constant 0 : index
    %282 = vector.load %arg2[%c376, %c0_152] : memref<390x128xf32, #tpu.memory_space<vmem>>, vector<1x32xf32>
    %283 = vector.broadcast %282 : vector<1x32xf32> to vector<8x32xf32>
    %284 = arith.addf %281, %283 : vector<8x32xf32>
    %c13 = arith.constant 13 : index
    %c0_153 = arith.constant 0 : index
    %c0_154 = arith.constant 0 : index
    %285 = vector.load %arg1[%c13, %c0_153, %c0_154] : memref<16x32x32xf32, #tpu.memory_space<vmem>>, vector<1x32x32xf32>
    %286 = vector.shape_cast %285 : vector<1x32x32xf32> to vector<32x32xf32>
    %cst_155 = arith.constant dense<0.000000e+00> : vector<8x32xf32>
    %287 = tpu.matmul %243, %286, %cst_155 {dimension_numbers = #tpu.dot_dimension_numbers<[1], [0], [0], [1], [0, 0, 1, 1], [], []>} : vector<8x32xf32>, vector<32x32xf32>, vector<8x32xf32> -> vector<8x32xf32>
    %c378 = arith.constant 378 : index
    %c0_156 = arith.constant 0 : index
    %288 = vector.load %arg2[%c378, %c0_156] : memref<390x128xf32, #tpu.memory_space<vmem>>, vector<1x32xf32>
    %289 = vector.broadcast %288 : vector<1x32xf32> to vector<8x32xf32>
    %290 = arith.addf %287, %289 : vector<8x32xf32>
    %c14 = arith.constant 14 : index
    %c0_157 = arith.constant 0 : index
    %c0_158 = arith.constant 0 : index
    %291 = vector.load %arg1[%c14, %c0_157, %c0_158] : memref<16x32x32xf32, #tpu.memory_space<vmem>>, vector<1x32x32xf32>
    %292 = vector.shape_cast %291 : vector<1x32x32xf32> to vector<32x32xf32>
    %cst_159 = arith.constant dense<0.000000e+00> : vector<8x32xf32>
    %293 = tpu.matmul %243, %292, %cst_159 {dimension_numbers = #tpu.dot_dimension_numbers<[1], [0], [0], [1], [0, 0, 1, 1], [], []>} : vector<8x32xf32>, vector<32x32xf32>, vector<8x32xf32> -> vector<8x32xf32>
    %c380 = arith.constant 380 : index
    %c0_160 = arith.constant 0 : index
    %294 = vector.load %arg2[%c380, %c0_160] : memref<390x128xf32, #tpu.memory_space<vmem>>, vector<1x32xf32>
    %295 = vector.broadcast %294 : vector<1x32xf32> to vector<8x32xf32>
    %296 = arith.addf %293, %295 : vector<8x32xf32>
    %297 = tpu.transpose %290, [1, 0] : vector<8x32xf32> -> vector<32x8xf32>
    %cst_161 = arith.constant dense<0.000000e+00> : vector<8x8xf32>
    %298 = tpu.matmul %284, %297, %cst_161 {dimension_numbers = #tpu.dot_dimension_numbers<[1], [0], [0], [1], [0, 0, 1, 1], [], []>} : vector<8x32xf32>, vector<32x8xf32>, vector<8x8xf32> -> vector<8x8xf32>
    %299 = arith.addf %298, %2 : vector<8x8xf32>
    %cst_162 = arith.constant dense<0xFF800000> : vector<8xf32>
    %300 = vector.multi_reduction <maximumf>, %299, %cst_162 [1] : vector<8x8xf32> to vector<8xf32>
    %301 = vector.shape_cast %300 : vector<8xf32> to vector<8x1xf32>
    %302 = vector.broadcast %301 : vector<8x1xf32> to vector<8x8xf32>
    %303 = arith.subf %299, %302 : vector<8x8xf32>
    %304 = math.exp %303 : vector<8x8xf32>
    %cst_163 = arith.constant dense<0.000000e+00> : vector<8xf32>
    %305 = vector.multi_reduction <add>, %304, %cst_163 [1] : vector<8x8xf32> to vector<8xf32>
    %306 = vector.shape_cast %305 : vector<8xf32> to vector<8x1xf32>
    %307 = tpu.reciprocal %306 {approx = true} : vector<8x1xf32> -> vector<8x1xf32>
    %308 = vector.broadcast %307 : vector<8x1xf32> to vector<8x8xf32>
    %309 = arith.mulf %304, %308 : vector<8x8xf32>
    %cst_164 = arith.constant dense<0.000000e+00> : vector<8x32xf32>
    %310 = tpu.matmul %309, %296, %cst_164 {dimension_numbers = #tpu.dot_dimension_numbers<[1], [0], [0], [1], [0, 0, 1, 1], [], []>} : vector<8x8xf32>, vector<8x32xf32>, vector<8x32xf32> -> vector<8x32xf32>
    %c15 = arith.constant 15 : index
    %c0_165 = arith.constant 0 : index
    %c0_166 = arith.constant 0 : index
    %311 = vector.load %arg1[%c15, %c0_165, %c0_166] : memref<16x32x32xf32, #tpu.memory_space<vmem>>, vector<1x32x32xf32>
    %312 = vector.shape_cast %311 : vector<1x32x32xf32> to vector<32x32xf32>
    %cst_167 = arith.constant dense<0.000000e+00> : vector<8x32xf32>
    %313 = tpu.matmul %310, %312, %cst_167 {dimension_numbers = #tpu.dot_dimension_numbers<[1], [0], [0], [1], [0, 0, 1, 1], [], []>} : vector<8x32xf32>, vector<32x32xf32>, vector<8x32xf32> -> vector<8x32xf32>
    %314 = arith.addf %278, %313 : vector<8x32xf32>
    %c0_168 = arith.constant 0 : index
    %c0_169 = arith.constant 0 : index
    %315 = vector.load %arg4[%c0_168, %c0_169] : memref<16x32xf32, #tpu.memory_space<vmem>>, vector<8x32xf32>
    tpu.vector_store %arg4[%c0_168, %c0_169], %314 {strides = array<i32>} : memref<16x32xf32, #tpu.memory_space<vmem>>, vector<8x32xf32>,
    %316 = vector.extract_strided_slice %242 {offsets = [8, 0], sizes = [8, 32], strides = [1, 1]} : vector<16x32xf32> to vector<8x32xf32>
    %c8_170 = arith.constant 8 : index
    %c0_171 = arith.constant 0 : index
    %c0_172 = arith.constant 0 : index
    %317 = vector.load %arg1[%c8_170, %c0_171, %c0_172] : memref<16x32x32xf32, #tpu.memory_space<vmem>>, vector<1x32x32xf32>
    %318 = vector.shape_cast %317 : vector<1x32x32xf32> to vector<32x32xf32>
    %cst_173 = arith.constant dense<0.000000e+00> : vector<8x32xf32>
    %319 = tpu.matmul %316, %318, %cst_173 {dimension_numbers = #tpu.dot_dimension_numbers<[1], [0], [0], [1], [0, 0, 1, 1], [], []>} : vector<8x32xf32>, vector<32x32xf32>, vector<8x32xf32> -> vector<8x32xf32>
    %c375_174 = arith.constant 375 : index
    %c0_175 = arith.constant 0 : index
    %320 = vector.load %arg2[%c375_174, %c0_175] : memref<390x128xf32, #tpu.memory_space<vmem>>, vector<1x32xf32>
    %321 = vector.broadcast %320 : vector<1x32xf32> to vector<8x32xf32>
    %322 = arith.addf %319, %321 : vector<8x32xf32>
    %c9_176 = arith.constant 9 : index
    %c0_177 = arith.constant 0 : index
    %c0_178 = arith.constant 0 : index
    %323 = vector.load %arg1[%c9_176, %c0_177, %c0_178] : memref<16x32x32xf32, #tpu.memory_space<vmem>>, vector<1x32x32xf32>
    %324 = vector.shape_cast %323 : vector<1x32x32xf32> to vector<32x32xf32>
    %cst_179 = arith.constant dense<0.000000e+00> : vector<8x32xf32>
    %325 = tpu.matmul %316, %324, %cst_179 {dimension_numbers = #tpu.dot_dimension_numbers<[1], [0], [0], [1], [0, 0, 1, 1], [], []>} : vector<8x32xf32>, vector<32x32xf32>, vector<8x32xf32> -> vector<8x32xf32>
    %c377_180 = arith.constant 377 : index
    %c0_181 = arith.constant 0 : index
    %326 = vector.load %arg2[%c377_180, %c0_181] : memref<390x128xf32, #tpu.memory_space<vmem>>, vector<1x32xf32>
    %327 = vector.broadcast %326 : vector<1x32xf32> to vector<8x32xf32>
    %328 = arith.addf %325, %327 : vector<8x32xf32>
    %c10_182 = arith.constant 10 : index
    %c0_183 = arith.constant 0 : index
    %c0_184 = arith.constant 0 : index
    %329 = vector.load %arg1[%c10_182, %c0_183, %c0_184] : memref<16x32x32xf32, #tpu.memory_space<vmem>>, vector<1x32x32xf32>
    %330 = vector.shape_cast %329 : vector<1x32x32xf32> to vector<32x32xf32>
    %cst_185 = arith.constant dense<0.000000e+00> : vector<8x32xf32>
    %331 = tpu.matmul %316, %330, %cst_185 {dimension_numbers = #tpu.dot_dimension_numbers<[1], [0], [0], [1], [0, 0, 1, 1], [], []>} : vector<8x32xf32>, vector<32x32xf32>, vector<8x32xf32> -> vector<8x32xf32>
    %c379_186 = arith.constant 379 : index
    %c0_187 = arith.constant 0 : index
    %332 = vector.load %arg2[%c379_186, %c0_187] : memref<390x128xf32, #tpu.memory_space<vmem>>, vector<1x32xf32>
    %333 = vector.broadcast %332 : vector<1x32xf32> to vector<8x32xf32>
    %334 = arith.addf %331, %333 : vector<8x32xf32>
    %335 = tpu.transpose %328, [1, 0] : vector<8x32xf32> -> vector<32x8xf32>
    %cst_188 = arith.constant dense<0.000000e+00> : vector<8x8xf32>
    %336 = tpu.matmul %322, %335, %cst_188 {dimension_numbers = #tpu.dot_dimension_numbers<[1], [0], [0], [1], [0, 0, 1, 1], [], []>} : vector<8x32xf32>, vector<32x8xf32>, vector<8x8xf32> -> vector<8x8xf32>
    %337 = arith.addf %336, %5 : vector<8x8xf32>
    %cst_189 = arith.constant dense<0xFF800000> : vector<8xf32>
    %338 = vector.multi_reduction <maximumf>, %337, %cst_189 [1] : vector<8x8xf32> to vector<8xf32>
    %339 = vector.shape_cast %338 : vector<8xf32> to vector<8x1xf32>
    %340 = vector.broadcast %339 : vector<8x1xf32> to vector<8x8xf32>
    %341 = arith.subf %337, %340 : vector<8x8xf32>
    %342 = math.exp %341 : vector<8x8xf32>
    %cst_190 = arith.constant dense<0.000000e+00> : vector<8xf32>
    %343 = vector.multi_reduction <add>, %342, %cst_190 [1] : vector<8x8xf32> to vector<8xf32>
    %344 = vector.shape_cast %343 : vector<8xf32> to vector<8x1xf32>
    %345 = tpu.reciprocal %344 {approx = true} : vector<8x1xf32> -> vector<8x1xf32>
    %346 = vector.broadcast %345 : vector<8x1xf32> to vector<8x8xf32>
    %347 = arith.mulf %342, %346 : vector<8x8xf32>
    %cst_191 = arith.constant dense<0.000000e+00> : vector<8x32xf32>
    %348 = tpu.matmul %347, %334, %cst_191 {dimension_numbers = #tpu.dot_dimension_numbers<[1], [0], [0], [1], [0, 0, 1, 1], [], []>} : vector<8x8xf32>, vector<8x32xf32>, vector<8x32xf32> -> vector<8x32xf32>
    %c11_192 = arith.constant 11 : index
    %c0_193 = arith.constant 0 : index
    %c0_194 = arith.constant 0 : index
    %349 = vector.load %arg1[%c11_192, %c0_193, %c0_194] : memref<16x32x32xf32, #tpu.memory_space<vmem>>, vector<1x32x32xf32>
    %350 = vector.shape_cast %349 : vector<1x32x32xf32> to vector<32x32xf32>
    %cst_195 = arith.constant dense<0.000000e+00> : vector<8x32xf32>
    %351 = tpu.matmul %348, %350, %cst_195 {dimension_numbers = #tpu.dot_dimension_numbers<[1], [0], [0], [1], [0, 0, 1, 1], [], []>} : vector<8x32xf32>, vector<32x32xf32>, vector<8x32xf32> -> vector<8x32xf32>
    %c12_196 = arith.constant 12 : index
    %c0_197 = arith.constant 0 : index
    %c0_198 = arith.constant 0 : index
    %352 = vector.load %arg1[%c12_196, %c0_197, %c0_198] : memref<16x32x32xf32, #tpu.memory_space<vmem>>, vector<1x32x32xf32>
    %353 = vector.shape_cast %352 : vector<1x32x32xf32> to vector<32x32xf32>
    %cst_199 = arith.constant dense<0.000000e+00> : vector<8x32xf32>
    %354 = tpu.matmul %316, %353, %cst_199 {dimension_numbers = #tpu.dot_dimension_numbers<[1], [0], [0], [1], [0, 0, 1, 1], [], []>} : vector<8x32xf32>, vector<32x32xf32>, vector<8x32xf32> -> vector<8x32xf32>
    %c376_200 = arith.constant 376 : index
    %c0_201 = arith.constant 0 : index
    %355 = vector.load %arg2[%c376_200, %c0_201] : memref<390x128xf32, #tpu.memory_space<vmem>>, vector<1x32xf32>
    %356 = vector.broadcast %355 : vector<1x32xf32> to vector<8x32xf32>
    %357 = arith.addf %354, %356 : vector<8x32xf32>
    %c13_202 = arith.constant 13 : index
    %c0_203 = arith.constant 0 : index
    %c0_204 = arith.constant 0 : index
    %358 = vector.load %arg1[%c13_202, %c0_203, %c0_204] : memref<16x32x32xf32, #tpu.memory_space<vmem>>, vector<1x32x32xf32>
    %359 = vector.shape_cast %358 : vector<1x32x32xf32> to vector<32x32xf32>
    %cst_205 = arith.constant dense<0.000000e+00> : vector<8x32xf32>
    %360 = tpu.matmul %316, %359, %cst_205 {dimension_numbers = #tpu.dot_dimension_numbers<[1], [0], [0], [1], [0, 0, 1, 1], [], []>} : vector<8x32xf32>, vector<32x32xf32>, vector<8x32xf32> -> vector<8x32xf32>
    %c378_206 = arith.constant 378 : index
    %c0_207 = arith.constant 0 : index
    %361 = vector.load %arg2[%c378_206, %c0_207] : memref<390x128xf32, #tpu.memory_space<vmem>>, vector<1x32xf32>
    %362 = vector.broadcast %361 : vector<1x32xf32> to vector<8x32xf32>
    %363 = arith.addf %360, %362 : vector<8x32xf32>
    %c14_208 = arith.constant 14 : index
    %c0_209 = arith.constant 0 : index
    %c0_210 = arith.constant 0 : index
    %364 = vector.load %arg1[%c14_208, %c0_209, %c0_210] : memref<16x32x32xf32, #tpu.memory_space<vmem>>, vector<1x32x32xf32>
    %365 = vector.shape_cast %364 : vector<1x32x32xf32> to vector<32x32xf32>
    %cst_211 = arith.constant dense<0.000000e+00> : vector<8x32xf32>
    %366 = tpu.matmul %316, %365, %cst_211 {dimension_numbers = #tpu.dot_dimension_numbers<[1], [0], [0], [1], [0, 0, 1, 1], [], []>} : vector<8x32xf32>, vector<32x32xf32>, vector<8x32xf32> -> vector<8x32xf32>
    %c380_212 = arith.constant 380 : index
    %c0_213 = arith.constant 0 : index
    %367 = vector.load %arg2[%c380_212, %c0_213] : memref<390x128xf32, #tpu.memory_space<vmem>>, vector<1x32xf32>
    %368 = vector.broadcast %367 : vector<1x32xf32> to vector<8x32xf32>
    %369 = arith.addf %366, %368 : vector<8x32xf32>
    %370 = tpu.transpose %363, [1, 0] : vector<8x32xf32> -> vector<32x8xf32>
    %cst_214 = arith.constant dense<0.000000e+00> : vector<8x8xf32>
    %371 = tpu.matmul %357, %370, %cst_214 {dimension_numbers = #tpu.dot_dimension_numbers<[1], [0], [0], [1], [0, 0, 1, 1], [], []>} : vector<8x32xf32>, vector<32x8xf32>, vector<8x8xf32> -> vector<8x8xf32>
    %372 = arith.addf %371, %5 : vector<8x8xf32>
    %cst_215 = arith.constant dense<0xFF800000> : vector<8xf32>
    %373 = vector.multi_reduction <maximumf>, %372, %cst_215 [1] : vector<8x8xf32> to vector<8xf32>
    %374 = vector.shape_cast %373 : vector<8xf32> to vector<8x1xf32>
    %375 = vector.broadcast %374 : vector<8x1xf32> to vector<8x8xf32>
    %376 = arith.subf %372, %375 : vector<8x8xf32>
    %377 = math.exp %376 : vector<8x8xf32>
    %cst_216 = arith.constant dense<0.000000e+00> : vector<8xf32>
    %378 = vector.multi_reduction <add>, %377, %cst_216 [1] : vector<8x8xf32> to vector<8xf32>
    %379 = vector.shape_cast %378 : vector<8xf32> to vector<8x1xf32>
    %380 = tpu.reciprocal %379 {approx = true} : vector<8x1xf32> -> vector<8x1xf32>
    %381 = vector.broadcast %380 : vector<8x1xf32> to vector<8x8xf32>
    %382 = arith.mulf %377, %381 : vector<8x8xf32>
    %cst_217 = arith.constant dense<0.000000e+00> : vector<8x32xf32>
    %383 = tpu.matmul %382, %369, %cst_217 {dimension_numbers = #tpu.dot_dimension_numbers<[1], [0], [0], [1], [0, 0, 1, 1], [], []>} : vector<8x8xf32>, vector<8x32xf32>, vector<8x32xf32> -> vector<8x32xf32>
    %c15_218 = arith.constant 15 : index
    %c0_219 = arith.constant 0 : index
    %c0_220 = arith.constant 0 : index
    %384 = vector.load %arg1[%c15_218, %c0_219, %c0_220] : memref<16x32x32xf32, #tpu.memory_space<vmem>>, vector<1x32x32xf32>
    %385 = vector.shape_cast %384 : vector<1x32x32xf32> to vector<32x32xf32>
    %cst_221 = arith.constant dense<0.000000e+00> : vector<8x32xf32>
    %386 = tpu.matmul %383, %385, %cst_221 {dimension_numbers = #tpu.dot_dimension_numbers<[1], [0], [0], [1], [0, 0, 1, 1], [], []>} : vector<8x32xf32>, vector<32x32xf32>, vector<8x32xf32> -> vector<8x32xf32>
    %387 = arith.addf %351, %386 : vector<8x32xf32>
    %c8_222 = arith.constant 8 : index
    %c0_223 = arith.constant 0 : index
    %388 = vector.load %arg4[%c8_222, %c0_223] : memref<16x32xf32, #tpu.memory_space<vmem>>, vector<8x32xf32>
    tpu.vector_store %arg4[%c8_222, %c0_223], %387 {strides = array<i32>} : memref<16x32xf32, #tpu.memory_space<vmem>>, vector<8x32xf32>,
    %c0_224 = arith.constant 0 : index
    %c0_225 = arith.constant 0 : index
    %389 = vector.load %arg4[%c0_224, %c0_225] : memref<16x32xf32, #tpu.memory_space<vmem>>, vector<16x32xf32>
    %c381 = arith.constant 381 : index
    %c0_226 = arith.constant 0 : index
    %390 = vector.load %arg2[%c381, %c0_226] : memref<390x128xf32, #tpu.memory_space<vmem>>, vector<1x32xf32>
    %391 = vector.broadcast %390 : vector<1x32xf32> to vector<16x32xf32>
    %392 = arith.addf %389, %391 : vector<16x32xf32>
    %393 = arith.addf %392, %242 : vector<16x32xf32>
    %c382 = arith.constant 382 : index
    %c0_227 = arith.constant 0 : index
    %394 = vector.load %arg2[%c382, %c0_227] : memref<390x128xf32, #tpu.memory_space<vmem>>, vector<1x32xf32>
    %c383 = arith.constant 383 : index
    %c0_228 = arith.constant 0 : index
    %395 = vector.load %arg2[%c383, %c0_228] : memref<390x128xf32, #tpu.memory_space<vmem>>, vector<1x32xf32>
    %cst_229 = arith.constant dense<0.000000e+00> : vector<16xf32>
    %396 = vector.multi_reduction <add>, %393, %cst_229 [1] : vector<16x32xf32> to vector<16xf32>
    %397 = vector.shape_cast %396 : vector<16xf32> to vector<16x1xf32>
    %cst_230 = arith.constant 3.200000e+01 : f32
    %398 = vector.broadcast %cst_230 : f32 to vector<16x1xf32>
    %399 = arith.divf %397, %398 : vector<16x1xf32>
    %400 = vector.broadcast %399 : vector<16x1xf32> to vector<16x32xf32>
    %401 = arith.subf %393, %400 : vector<16x32xf32>
    %402 = arith.mulf %401, %401 : vector<16x32xf32>
    %cst_231 = arith.constant dense<0.000000e+00> : vector<16xf32>
    %403 = vector.multi_reduction <add>, %402, %cst_231 [1] : vector<16x32xf32> to vector<16xf32>
    %404 = vector.shape_cast %403 : vector<16xf32> to vector<16x1xf32>
    %cst_232 = arith.constant 3.200000e+01 : f32
    %405 = vector.broadcast %cst_232 : f32 to vector<16x1xf32>
    %406 = arith.divf %404, %405 : vector<16x1xf32>
    %cst_233 = arith.constant 9.99999974E-6 : f32
    %407 = vector.broadcast %cst_233 : f32 to vector<16x1xf32>
    %408 = arith.addf %406, %407 : vector<16x1xf32>
    %409 = math.rsqrt %408 : vector<16x1xf32>
    %410 = vector.broadcast %409 : vector<16x1xf32> to vector<16x32xf32>
    %411 = arith.mulf %401, %410 : vector<16x32xf32>
    %412 = vector.broadcast %394 : vector<1x32xf32> to vector<16x32xf32>
    %413 = arith.mulf %411, %412 : vector<16x32xf32>
    %414 = vector.broadcast %395 : vector<1x32xf32> to vector<16x32xf32>
    %415 = arith.addf %413, %414 : vector<16x32xf32>
    %c200 = arith.constant 200 : index
    %c0_234 = arith.constant 0 : index
    %416 = vector.load %arg2[%c200, %c0_234] : memref<390x128xf32, #tpu.memory_space<vmem>>, vector<32x64xf32>
    %c296 = arith.constant 296 : index
    %c0_235 = arith.constant 0 : index
    %417 = vector.load %arg2[%c296, %c0_235] : memref<390x128xf32, #tpu.memory_space<vmem>>, vector<64x32xf32>
    %cst_236 = arith.constant dense<0.000000e+00> : vector<16x64xf32>
    %418 = tpu.matmul %415, %416, %cst_236 {dimension_numbers = #tpu.dot_dimension_numbers<[1], [0], [0], [1], [0, 0, 1, 1], [], []>} : vector<16x32xf32>, vector<32x64xf32>, vector<16x64xf32> -> vector<16x64xf32>
    %c384 = arith.constant 384 : index
    %c0_237 = arith.constant 0 : index
    %419 = vector.load %arg2[%c384, %c0_237] : memref<390x128xf32, #tpu.memory_space<vmem>>, vector<1x64xf32>
    %420 = vector.broadcast %419 : vector<1x64xf32> to vector<16x64xf32>
    %421 = arith.addf %418, %420 : vector<16x64xf32>
    %cst_238 = arith.constant 5.000000e-01 : f32
    %422 = vector.broadcast %cst_238 : f32 to vector<16x64xf32>
    %423 = arith.mulf %422, %421 : vector<16x64xf32>
    %cst_239 = arith.constant 0.707106769 : f32
    %424 = vector.broadcast %cst_239 : f32 to vector<16x64xf32>
    %425 = arith.mulf %421, %424 : vector<16x64xf32>
    %426 = math.erf %425 : vector<16x64xf32>
    %cst_240 = arith.constant 1.000000e+00 : f32
    %427 = vector.broadcast %cst_240 : f32 to vector<16x64xf32>
    %428 = arith.addf %427, %426 : vector<16x64xf32>
    %429 = arith.mulf %423, %428 : vector<16x64xf32>
    %cst_241 = arith.constant dense<0.000000e+00> : vector<16x32xf32>
    %430 = tpu.matmul %429, %417, %cst_241 {dimension_numbers = #tpu.dot_dimension_numbers<[1], [0], [0], [1], [0, 0, 1, 1], [], []>} : vector<16x64xf32>, vector<64x32xf32>, vector<16x32xf32> -> vector<16x32xf32>
    %c385 = arith.constant 385 : index
    %c0_242 = arith.constant 0 : index
    %431 = vector.load %arg2[%c385, %c0_242] : memref<390x128xf32, #tpu.memory_space<vmem>>, vector<1x32xf32>
    %432 = vector.broadcast %431 : vector<1x32xf32> to vector<16x32xf32>
    %433 = arith.addf %430, %432 : vector<16x32xf32>
    %434 = arith.addf %433, %415 : vector<16x32xf32>
    %c386 = arith.constant 386 : index
    %c0_243 = arith.constant 0 : index
    %435 = vector.load %arg2[%c386, %c0_243] : memref<390x128xf32, #tpu.memory_space<vmem>>, vector<1x32xf32>
    %c387 = arith.constant 387 : index
    %c0_244 = arith.constant 0 : index
    %436 = vector.load %arg2[%c387, %c0_244] : memref<390x128xf32, #tpu.memory_space<vmem>>, vector<1x32xf32>
    %cst_245 = arith.constant dense<0.000000e+00> : vector<16xf32>
    %437 = vector.multi_reduction <add>, %434, %cst_245 [1] : vector<16x32xf32> to vector<16xf32>
    %438 = vector.shape_cast %437 : vector<16xf32> to vector<16x1xf32>
    %cst_246 = arith.constant 3.200000e+01 : f32
    %439 = vector.broadcast %cst_246 : f32 to vector<16x1xf32>
    %440 = arith.divf %438, %439 : vector<16x1xf32>
    %441 = vector.broadcast %440 : vector<16x1xf32> to vector<16x32xf32>
    %442 = arith.subf %434, %441 : vector<16x32xf32>
    %443 = arith.mulf %442, %442 : vector<16x32xf32>
    %cst_247 = arith.constant dense<0.000000e+00> : vector<16xf32>
    %444 = vector.multi_reduction <add>, %443, %cst_247 [1] : vector<16x32xf32> to vector<16xf32>
    %445 = vector.shape_cast %444 : vector<16xf32> to vector<16x1xf32>
    %cst_248 = arith.constant 3.200000e+01 : f32
    %446 = vector.broadcast %cst_248 : f32 to vector<16x1xf32>
    %447 = arith.divf %445, %446 : vector<16x1xf32>
    %cst_249 = arith.constant 9.99999974E-6 : f32
    %448 = vector.broadcast %cst_249 : f32 to vector<16x1xf32>
    %449 = arith.addf %447, %448 : vector<16x1xf32>
    %450 = math.rsqrt %449 : vector<16x1xf32>
    %451 = vector.broadcast %450 : vector<16x1xf32> to vector<16x32xf32>
    %452 = arith.mulf %442, %451 : vector<16x32xf32>
    %453 = vector.broadcast %435 : vector<1x32xf32> to vector<16x32xf32>
    %454 = arith.mulf %452, %453 : vector<16x32xf32>
    %455 = vector.broadcast %436 : vector<1x32xf32> to vector<16x32xf32>
    %456 = arith.addf %454, %455 : vector<16x32xf32>
    %457 = tpu.iota {dimensions = array<i32: 1>} : vector<2x16xi32>
    %458 = tpu.iota {dimensions = array<i32: 0>} : vector<2x16xi32>
    %c8_i32 = arith.constant 8 : i32
    %459 = vector.broadcast %c8_i32 : i32 to vector<2x16xi32>
    %460 = arith.muli %458, %459 : vector<2x16xi32>
    %461 = arith.cmpi eq, %457, %460 : vector<2x16xi32>
    %cst_250 = arith.constant 1.000000e+00 : f32
    %cst_251 = arith.constant 0.000000e+00 : f32
    %462 = vector.broadcast %cst_250 : f32 to vector<2x16xf32>
    %463 = vector.broadcast %cst_251 : f32 to vector<2x16xf32>
    %464 = arith.select %461, %462, %463 : vector<2x16xi1>, vector<2x16xf32>
    %cst_252 = arith.constant dense<0.000000e+00> : vector<2x32xf32>
    %465 = tpu.matmul %464, %456, %cst_252 {dimension_numbers = #tpu.dot_dimension_numbers<[1], [0], [0], [1], [0, 0, 1, 1], [], []>} : vector<2x16xf32>, vector<16x32xf32>, vector<2x32xf32> -> vector<2x32xf32>
    %c18 = arith.constant 18 : index
    %c0_253 = arith.constant 0 : index
    %466 = vector.load %arg0[%c18, %c0_253] : memref<20x128xf32, #tpu.memory_space<vmem>>, vector<2x6xf32>
    %c0_254 = arith.constant 0 : index
    %c0_255 = arith.constant 0 : index
    %467 = vector.load %arg2[%c0_254, %c0_255] : memref<390x128xf32, #tpu.memory_space<vmem>>, vector<6x128xf32>
    %cst_256 = arith.constant dense<0.000000e+00> : vector<2x128xf32>
    %468 = tpu.matmul %466, %467, %cst_256 {dimension_numbers = #tpu.dot_dimension_numbers<[1], [0], [0], [1], [0, 0, 1, 1], [], []>} : vector<2x6xf32>, vector<6x128xf32>, vector<2x128xf32> -> vector<2x128xf32>
    %c388 = arith.constant 388 : index
    %c0_257 = arith.constant 0 : index
    %469 = vector.load %arg2[%c388, %c0_257] : memref<390x128xf32, #tpu.memory_space<vmem>>, vector<1x128xf32>
    %470 = vector.broadcast %469 : vector<1x128xf32> to vector<2x128xf32>
    %471 = arith.addf %468, %470 : vector<2x128xf32>
    %c8_258 = arith.constant 8 : index
    %c0_259 = arith.constant 0 : index
    %472 = vector.load %arg2[%c8_258, %c0_259] : memref<390x128xf32, #tpu.memory_space<vmem>>, vector<32x128xf32>
    %cst_260 = arith.constant dense<0.000000e+00> : vector<2x128xf32>
    %473 = tpu.matmul %465, %472, %cst_260 {dimension_numbers = #tpu.dot_dimension_numbers<[1], [0], [0], [1], [0, 0, 1, 1], [], []>} : vector<2x32xf32>, vector<32x128xf32>, vector<2x128xf32> -> vector<2x128xf32>
    %c40 = arith.constant 40 : index
    %c0_261 = arith.constant 0 : index
    %474 = vector.load %arg2[%c40, %c0_261] : memref<390x128xf32, #tpu.memory_space<vmem>>, vector<128x128xf32>
    %cst_262 = arith.constant dense<0.000000e+00> : vector<2x128xf32>
    %475 = tpu.matmul %471, %474, %cst_262 {dimension_numbers = #tpu.dot_dimension_numbers<[1], [0], [0], [1], [0, 0, 1, 1], [], []>} : vector<2x128xf32>, vector<128x128xf32>, vector<2x128xf32> -> vector<2x128xf32>
    %476 = arith.addf %473, %475 : vector<2x128xf32>
    %c389 = arith.constant 389 : index
    %c0_263 = arith.constant 0 : index
    %477 = vector.load %arg2[%c389, %c0_263] : memref<390x128xf32, #tpu.memory_space<vmem>>, vector<1x128xf32>
    %478 = vector.broadcast %477 : vector<1x128xf32> to vector<2x128xf32>
    %479 = arith.addf %476, %478 : vector<2x128xf32>
    %c0_264 = arith.constant 0 : index
    %c0_265 = arith.constant 0 : index
    %480 = vector.load %arg3[%c0_264, %c0_265] : memref<2x128xf32, #tpu.memory_space<vmem>>, vector<2x128xf32>
    tpu.vector_store %arg3[%c0_264, %c0_265], %479 {strides = array<i32>} : memref<2x128xf32, #tpu.memory_space<vmem>>, vector<2x128xf32>,
    return
  }
}

</mosaic_0001>

<bundles_post_ra>
// kernel: forward.1
= control target key start
LH: loop header
LB: loop body
LE: loop exit
PB: predicated region body
PF: predicated region fallthrough
CT: control target
= control target key end

     0   :  { %8 = vsyncpa [#allocation4], 0  ;;  %s5944_s12 = smov [#allocation3]   ;;  %s6952_s0 = inlined_call_operand.vmem [shape: f32[20,128], index: 0, kind: input, shape index: {}]   ;;  %s6953_s1 = inlined_call_operand.vmem [shape: f32[16,32,32], index: 1, kind: input, shape index: {}]   ;;  %s6954_s2 = inlined_call_operand.hbm [shape: f32[390,128], index: 2, kind: input, shape index: {}]   ;;  %s6955_s3 = inlined_call_operand.vmem [shape: f32[2,128], index: 3, kind: output, shape index: {}]  }
   0x1   :  { %s18_s13 = sshll.u32 %s5944_s12, 4  ;;  %s19_s13 = int_to_ptr.vmem [resolvable:$true] %s18_s13 }
   0x2   :  { %s5930_s14 = scalar_lea.vmem %s19_s13, 6272  ;;  %p5935_p1 = scmp.lt.s32.totalorder %s19_s13, %s19_s13 }
   0x3   :  { %p5931_p0 = scmp.ne.s32.totalorder %s19_s13, %s5930_s14  ;;  %p5936_p2 = scmp.lt.s32.totalorder %s5930_s14, %s5930_s14 }
   0x5   :  { %p5937_p3 = por %p5936_p2, %p5935_p1 }
   0x7   :  { %p5938_p4 = pnand %p5937_p3, %p5931_p0 }
   0x9   :  { %5941 = shalt.err (!%p5938_p4)
}
   0xa   :  { %s5945_s15 = smov 128   ;;  %s5946_s16 = smov 8  }
   0xb   :  { %24 = dma.hbm_to_vmem [thread:$0]  %s6954_s2, 6272, %s19_s13, [#allocation4], %s5945_s15, %s5945_s15, %s5946_s16  }
   0xc   :  { %5942 = dma.done.wait [#allocation4], 6272  }
   0xd   :  { %5943 = vsyncadd [#allocation4], 4294961024  ;;  %vm42_vm0 = vcmask 261120   ;;  %v38_v0 = vld [vmem:[%s6952_s0] sm:$0xff]  ;;  %v5947_v7 = vmov 0.0   ;;  %v5982_v8 = vld [vmem:[%s6953_s1 + $0x18] sm:$0xff] }
   0xe   :  { %v43_v1 = vsel %vm42_vm0, %v38_v0, 0.0  ;;  %5305 = vmatprep.subr.mxu1 %v5947_v7  ;;  %5327 = vmatprep.subr.mxu0 %v5947_v7  ;;  %v5987_v9 = vld [vmem:[%s6953_s1 + $0x58] sm:$0xff]  ;;  %v5996_v10 = vld [vmem:[%s6953_s1 + $0x10] sm:$0xff]  ;;  %v6010_v12 = vld [vmem:[%s6953_s1 + $0x8] sm:$0xff]  ;;  %vm5948_vm1 = vmmov 0   ;;  %vm400_vm2 = vcmask 64512  }
   0xf   :  { %44 = vadd.xlane.f32.xlu0 %v43_v1  ;;  %5306 = vmatpush3.msra.mxu1 %v5982_v8  ;;  %v6001_v11 = vld [vmem:[%s6953_s1 + $0x50] sm:$0xff]  ;;  %v6015_v13 = vld [vmem:[%s6953_s1 + $0x48] sm:$0xff]  ;;  %v6024_v14 = vld [vmem:[%s6953_s1] sm:$0xff]  ;;  %vm2158_vm3 = vcmask 523264   ;;  %vm4488_vm5 = vcmask 130048   ;;  %vm4573_vm6 = vcmask 1045504  }
  0x10   :  { %5328 = vmatpush3.msra.mxu0 %v5987_v9  ;;  %5307 = vmatprep.subr.mxu1 %v5947_v7  ;;  %v6029_v15 = vld [vmem:[%s6953_s1 + $0x40] sm:$0xff]  ;;  %v6039_v20 = vld [vmem:[#allocation3 + $0x168] ss:$0 sm:$0xff]  ;;  %v6041_v22 = vld [vmem:[#allocation3 + $0x169] ss:$0 sm:$0xff]  ;;  %vm4569_vm7 = vcmask 48128  }
  0x11   :  { %5329 = vmatprep.subr.mxu0 %v5947_v7  ;;  %5308 = vmatpush3.msra.mxu1 %v5996_v10  ;;  %v6050_v25 = vld [vmem:[%s6953_s1 + $0x38] sm:$0xff]  ;;  %v6064_v27 = vld [vmem:[%s6953_s1 + $0x30] sm:$0xff]  ;;  %v6078_v29 = vld [vmem:[%s6953_s1 + $0x28] sm:$0xff] }
  0x12   :  { %5330 = vmatpush3.msra.mxu0 %v6001_v11  ;;  %5309 = vmatprep.subr.mxu1 %v5947_v7  ;;  %v6055_v26 = vld [vmem:[%s6953_s1 + $0x98] sm:$0xff]  ;;  %v6069_v28 = vld [vmem:[%s6953_s1 + $0x90] sm:$0xff]  ;;  %v6083_v30 = vld [vmem:[%s6953_s1 + $0x88] sm:$0xff] }
  0x13   :  { %5331 = vmatprep.subr.mxu0 %v5947_v7  ;;  %5310 = vmatpush3.msra.mxu1 %v6010_v12  ;;  %v6092_v31 = vld [vmem:[%s6953_s1 + $0x20] sm:$0xff]  ;;  %v6112_v33 = vld [vmem:[%s6953_s1 + $0xd8] sm:$0xff]  ;;  %v6122_v34 = vld [vmem:[%s6953_s1 + $0xd0] sm:$0xff] }
  0x14   :  { %5332 = vmatpush3.msra.mxu0 %v6015_v13  ;;  %5311 = vmatprep.subr.mxu1 %v5947_v7  ;;  %v6099_v32 = vld [vmem:[%s6953_s1 + $0x80] sm:$0xff]  ;;  %v6132_v35 = vld [vmem:[%s6953_s1 + $0xc8] sm:$0xff]  ;;  %v6151_v41 = vld [vmem:[#allocation3 + $0x16c] ss:$0 sm:$0xff] }
  0x15   :  { %5333 = vmatprep.subr.mxu0 %v5947_v7  ;;  %5312 = vmatpush3.msra.mxu1 %v6024_v14  ;;  %v6141_v36 = vld [vmem:[%s6953_s1 + $0xc0] sm:$0xff]  ;;  %v6153_v44 = vld [vmem:[#allocation3 + $0x16a] ss:$0 sm:$0xff]  ;;  %v6156_v46 = vld [vmem:[#allocation3 + $0x16e] ss:$0 sm:$0xff] }
  0x16   :  { %5334 = vmatpush3.msra.mxu0 %v6029_v15  ;;  %5313 = vmatprep.mubr.msk.f32.mxu1 %vm5948_vm1, %v5947_v7  ;;  %v6169_v53 = vld [vmem:[%s6952_s0 + $0x10] ss:$0 sm:$0xff] }
  0x17   :  { %5316 = vmatprep.subr.mxu1 %v5947_v7  ;;  %5335 = vmatprep.mubr.msk.f32.mxu0 %vm5948_vm1, %v5947_v7 }
  0x18   :  { %5348 = vmatprep.subr.mxu0 %v5947_v7 }
  0x98   :  { %v45_v2 = vpop.xlane.xlu0 %44 }
  0x99   :  { %v50_v3 = vmul.f32 0.03125, %v45_v2  ;;  %v6177_v2 = vld [vmem:[%s6953_s1 + $0xb8] sm:$0xff] }
  0x9b   :  { %v52_v4 = vsub.f32 %v38_v0, %v50_v3  ;;  %v6183_v3 = vld [vmem:[%s6953_s1 + $0xb0] sm:$0xff] }
  0x9d   :  { %v54_v5 = vmul.f32 %v52_v4, %v52_v4 }
  0x9f   :  { %v56_v6 = vsel %vm42_vm0, %v54_v5, 0.0  ;;  %v6199_v5 = vld [vmem:[%s6953_s1 + $0xa0] sm:$0xff] }
  0xa0   :  { %57 = vadd.xlane.f32.xlu0 %v56_v6 }
 0x129   :  { %v58_v16 = vpop.xlane.xlu0 %57 }
 0x12a   :  { %v62_v17 = vmul.f32 0.03125, %v58_v16 }
 0x12c   :  { %v64_v18 = vadd.f32 1e-05, %v62_v17  ;;  %v6211_v17 = vld [vmem:[#allocation3 + $0x16d] ss:$0 sm:$0xff] }
 0x12e   :  { %5860 = vrsqrt.f32 %v64_v18 }
 0x13b   :  { %v5861_v19 = vpop.eup %5860 }
 0x13c   :  { %v68_v21 = vmul.f32 %v5861_v19, %v52_v4  ;;  %v6192_v4 = vld [vmem:[%s6953_s1 + $0xa8] sm:$0xff]  ;;  %v6213_v19 = vld [vmem:[#allocation3 + $0x16b] ss:$0 sm:$0xff] }
 0x13e   :  { %v74_v23 = vmul.f32 %v6039_v20, %v68_v21 }
 0x140   :  { %v6045_v24 = vadd.f32 %v6041_v22, %v74_v23  ;;  %v6216_v23 = vld [vmem:[#allocation3 + $0x16f] ss:$0 sm:$0xff] }
 0x142   :  { %5314 = vmatmul.mubr.msk.f32.vlgmr.msra.gmra.mxu1 %vm42_vm0, %v6045_v24  ;;  %5336 = vmatmul.mubr.msk.f32.vlgmr.msra.gmra.mxu0 %vm42_vm0, %v6045_v24 }
 0x143   :  { %5317 = vmatpush3.msra.mxu1 %v6050_v25  ;;  %5349 = vmatpush3.msra.mxu0 %v6055_v26 }
 0x144   :  { %5318 = vmatprep.subr.mxu1 %v5947_v7  ;;  %5350 = vmatprep.subr.mxu0 %v5947_v7 }
 0x145   :  { %5319 = vmatpush3.msra.mxu1 %v6064_v27  ;;  %5351 = vmatpush3.msra.mxu0 %v6069_v28 }
 0x146   :  { %5320 = vmatprep.subr.mxu1 %v5947_v7  ;;  %5352 = vmatprep.subr.mxu0 %v5947_v7 }
 0x147   :  { %5321 = vmatpush3.msra.mxu1 %v6078_v29  ;;  %5353 = vmatpush3.msra.mxu0 %v6083_v30 }
 0x148   :  { %5322 = vmatprep.subr.mxu1 %v5947_v7  ;;  %5354 = vmatprep.subr.mxu0 %v5947_v7 }
 0x149   :  { %5323 = vmatpush3.msra.mxu1 %v6092_v31  ;;  %5324 = vmatprep.mubr.msk.f32.mxu1 %vm5948_vm1, %v5947_v7 }
 0x14a   :  { %5355 = vmatpush3.msra.mxu0 %v6099_v32  ;;  %5356 = vmatprep.mubr.msk.f32.mxu0 %vm5948_vm1, %v5947_v7 }
 0x14b   :  { %5325 = vmatmul.mubr.msk.f32.vlgmr.msra.gmra.mxu1 %vm42_vm0, %v6045_v24  ;;  %5357 = vmatmul.mubr.msk.f32.vlgmr.msra.gmra.mxu0 %vm42_vm0, %v6045_v24 }
 0x14c   :  { %5370 = vmatprep.subr.mxu0 %v5947_v7  ;;  %5378 = vmatprep.mubr.msk.f32.mxu0 %vm5948_vm1, %v5947_v7 }
 0x14d   :  { %5371 = vmatpush3.msra.mxu0 %v6112_v33  ;;  %5338 = vmatprep.subr.mxu1 %v5947_v7 }
 0x14e   :  { %5372 = vmatprep.subr.mxu0 %v5947_v7  ;;  %5340 = vmatprep.mubr.msk.f32.mxu1 %vm5948_vm1, %v5947_v7 }
 0x14f   :  { %5373 = vmatpush3.msra.mxu0 %v6122_v34 }
 0x150   :  { %5374 = vmatprep.subr.mxu0 %v5947_v7 }
 0x151   :  { %5375 = vmatpush3.msra.mxu0 %v6132_v35 }
 0x152   :  { %5376 = vmatprep.subr.mxu0 %v5947_v7 }
 0x153   :  { %5377 = vmatpush3.msra.mxu0 %v6141_v36 }
 0x154   :  { %5379 = vmatmul.mubr.msk.f32.vlgmr.msra.gmra.mxu0 %vm42_vm0, %v6045_v24  ;;  %5391 = vmatprep.subr.mxu0 %v5947_v7 }
 0x155   :  { %5399 = vmatprep.mubr.msk.f32.mxu0 %vm5948_vm1, %v5947_v7 }
 0x202   :  { %v160_v37 = vpop.f32.mrf.mxu1  ;;  %v320_v38 = vpop.f32.mrf.mxu0 }
 0x203   :  { %v161_v49 = vadd.f32 %v6153_v44, %v160_v37  ;;  %v321_v50 = vadd.f32 %v6156_v46, %v320_v38 }
 0x204   :  { %v5315_v39 = vpop.f32.mrf.mxu1  ;;  %v5337_v40 = vpop.f32.mrf.mxu0 }
 0x20b   :  { %v240_v42 = vpop.f32.mrf.mxu1  ;;  %v566_v43 = vpop.f32.mrf.mxu0 }
 0x20c   :  { %v241_v45 = vadd.f32 %v6151_v41, %v240_v42  ;;  %v567_v38 = vadd.f32 %v6213_v19, %v566_v43  ;;  %v39_v43 = vld [vmem:[%s6952_s0 + $0x8] sm:$0xff] }
 0x20d   :  { %v5326_v47 = vpop.f32.mrf.mxu1  ;;  %v5358_v48 = vpop.f32.mrf.mxu0 }
 0x20e   :  { %5339 = vmatpush3.xpose.msk.msra.mxu1 %vm42_vm0, %v241_v45  ;;  %v46_v48 = vsel %vm42_vm0, %v39_v43, 0.0 }
 0x20f   :  { %5343 = vmatprep.subr.mxu1 %v5947_v7 }
 0x211   :  { %5341 = vmatmul.mubr.msk.f32.vlgmr.msra.gmra.mxu1 %vm42_vm0, %v161_v49 }
 0x212   :  { %5344 = vmatpush3.msra.mxu1 %v321_v50  ;;  %5345 = vmatprep.mubr.msk.f32.mxu1 %vm5948_vm1, %v5947_v7 }
 0x213   :  { %5359 = vmatprep.subr.mxu1 %v5947_v7 }
 0x214   :  { %v726_v51 = vpop.f32.mrf.mxu0 }
 0x215   :  { %v727_v39 = vadd.f32 %v6216_v23, %v726_v51 }
 0x216   :  { %v5380_v52 = vpop.f32.mrf.mxu0 }
 0x2d1   :  { %v396_v54 = vpop.f32.mrf.mxu1 }
 0x2d2   :  { %v397_v55 = vadd.f32 %v6169_v53, %v396_v54 }
 0x2d3   :  { %v5342_v56 = vpop.f32.mrf.mxu1 }
 0x2d4   :  { %v401_v57 = vsel %vm400_vm2, %v397_v55, -inf }
 0x2d5   :  { %402 = vmax.xlane.f32.xlu1 %v401_v57 }
 0x35e   :  { %v403_v58 = vpop.xlane.xlu1 %402 }
 0x35f   :  { %v404_v59 = vsub.f32 %v397_v55, %v403_v58 }
 0x361   :  { %v405_v60 = vmul.f32 1.442695, %v404_v59 }
 0x363   :  { %5862 = vpow2.f32 %v405_v60  ;;  %v6237_v60 = vld [vmem:[%s6953_s1 + $0xf8] sm:$0xff] }
 0x364   :  { %5392 = vmatpush3.msra.mxu0 %v6237_v60 }
 0x365   :  { %5393 = vmatprep.subr.mxu0 %v5947_v7 }
 0x370   :  { %v5863_v61 = vpop.eup %5862 }
 0x371   :  { %v407_v62 = vsel %vm400_vm2, %v5863_v61, 0.0 }
 0x372   :  { %408 = vadd.xlane.f32.xlu1 %v407_v62  ;;  %v6249_v62 = vld [vmem:[%s6953_s1 + $0xe8] sm:$0xff] }
 0x3fb   :  { %v409_v63 = vpop.xlane.xlu1 %408 }
 0x3fc   :  { %5864 = vrcp.f32 %v409_v63  ;;  %v6256_v63 = vld [vmem:[%s6953_s1 + $0xe0] sm:$0xff] }
 0x409   :  { %v5865_v0 = vpop.eup %5864 }
 0x40a   :  { %v411_v1 = vmul.f32 %v5865_v0, %v5863_v61  ;;  %v6242_v61 = vld [vmem:[%s6953_s1 + $0xf0] sm:$0xff] }
 0x40b   :  { %5394 = vmatpush3.msra.mxu0 %v6242_v61 }
 0x40c   :  { %5346 = vmatmul.mubr.msk.f32.vlgmr.msra.gmra.mxu1 %vm400_vm2, %v411_v1  ;;  %5395 = vmatprep.subr.mxu0 %v5947_v7 }
 0x40d   :  { %5360 = vmatpush3.msra.mxu1 %v6177_v2  ;;  %5367 = vmatprep.mubr.msk.f32.mxu1 %vm5948_vm1, %v5947_v7 }
 0x40e   :  { %5361 = vmatprep.subr.mxu1 %v5947_v7  ;;  %5396 = vmatpush3.msra.mxu0 %v6249_v62 }
 0x40f   :  { %5362 = vmatpush3.msra.mxu1 %v6183_v3  ;;  %5397 = vmatprep.subr.mxu0 %v5947_v7 }
 0x410   :  { %5363 = vmatprep.subr.mxu1 %v5947_v7  ;;  %5398 = vmatpush3.msra.mxu0 %v6256_v63 }
 0x411   :  { %5364 = vmatpush3.msra.mxu1 %v6192_v4  ;;  %5413 = vmatprep.subr.mxu0 %v5947_v7 }
 0x412   :  { %5365 = vmatprep.subr.mxu1 %v5947_v7 }
 0x413   :  { %5366 = vmatpush3.msra.mxu1 %v6199_v5 }
 0x414   :  { %5368 = vmatmul.mubr.msk.f32.vlgmr.msra.gmra.mxu1 %vm42_vm0, %v6045_v24  ;;  %5381 = vmatprep.subr.mxu1 %v5947_v7 }
 0x415   :  { %5383 = vmatprep.mubr.msk.f32.mxu1 %vm5948_vm1, %v5947_v7 }
 0x4cc   :  { %v6209_v6 = vpop.f32.mrf.mxu1 }
 0x4ce   :  { %v5347_v16 = vpop.f32.mrf.mxu1 }
 0x4d4   :  { %v646_v18 = vpop.f32.mrf.mxu1 }
 0x4d5   :  { %v647_v21 = vadd.f32 %v6211_v17, %v646_v18 }
 0x4d6   :  { %v5369_v37 = vpop.f32.mrf.mxu1 }
 0x4d7   :  { %5382 = vmatpush3.xpose.msk.msra.mxu1 %vm42_vm0, %v647_v21 }
 0x4d8   :  { %5386 = vmatprep.subr.mxu1 %v5947_v7 }
 0x4da   :  { %5384 = vmatmul.mubr.msk.f32.vlgmr.msra.gmra.mxu1 %vm42_vm0, %v567_v38  ;;  %v6265_v38 = vld [vmem:[%s6953_s1 + $0x78] sm:$0xff] }
 0x4db   :  { %5387 = vmatpush3.msra.mxu1 %v727_v39  ;;  %5388 = vmatprep.mubr.msk.f32.mxu1 %vm5948_vm1, %v5947_v7  ;;  %v6271_v39 = vld [vmem:[%s6953_s1 + $0x70] sm:$0xff] }
 0x4dc   :  { %5402 = vmatprep.subr.mxu1 %v5947_v7 }
 0x59a   :  { %v802_v40 = vpop.f32.mrf.mxu1 }
 0x59b   :  { %v803_v42 = vadd.f32 %v6169_v53, %v802_v40  ;;  %v6280_v40 = vld [vmem:[%s6953_s1 + $0x68] sm:$0xff] }
 0x59c   :  { %v5385_v45 = vpop.f32.mrf.mxu1 }
 0x59d   :  { %v806_v47 = vsel %vm400_vm2, %v803_v42, -inf }
 0x59e   :  { %807 = vmax.xlane.f32.xlu0 %v806_v47 }
 0x5a2   :  { %47 = vadd.xlane.f32.xlu0 %v46_v48 }
 0x627   :  { %v808_v49 = vpop.xlane.xlu0 %807 }
 0x628   :  { %v809_v50 = vsub.f32 %v803_v42, %v808_v49  ;;  %v6287_v42 = vld [vmem:[%s6953_s1 + $0x60] sm:$0xff] }
 0x62a   :  { %v810_v51 = vmul.f32 1.442695, %v809_v50 }
 0x62b   :  { %v48_v52 = vpop.xlane.xlu0 %47 }
 0x62c   :  { %5866 = vpow2.f32 %v810_v51  ;;  %v51_v54 = vmul.f32 0.03125, %v48_v52 }
 0x62e   :  { %v53_v55 = vsub.f32 %v39_v43, %v51_v54 }
 0x630   :  { %v55_v56 = vmul.f32 %v53_v55, %v53_v55 }
 0x632   :  { %v59_v59 = vsel %vm42_vm0, %v55_v56, 0.0 }
 0x639   :  { %v5867_v57 = vpop.eup %5866 }
 0x63a   :  { %v812_v58 = vsel %vm400_vm2, %v5867_v57, 0.0 }
 0x63b   :  { %813 = vadd.xlane.f32.xlu1 %v812_v58 }
 0x63f   :  { %60 = vadd.xlane.f32.xlu1 %v59_v59 }
 0x6c4   :  { %v814_v0 = vpop.xlane.xlu1 %813 }
 0x6c5   :  { %5868 = vrcp.f32 %v814_v0 }
 0x6c8   :  { %v61_v1 = vpop.xlane.xlu1 %60 }
 0x6c9   :  { %v63_v16 = vmul.f32 0.03125, %v61_v1 }
 0x6cb   :  { %v65_v18 = vadd.f32 1e-05, %v63_v16 }
 0x6cd   :  { %5870 = vrsqrt.f32 %v65_v18 }
 0x6d2   :  { %v5869_v21 = vpop.eup %5868 }
 0x6d3   :  { %v816_v37 = vmul.f32 %v5869_v21, %v5867_v57 }
 0x6d5   :  { %5389 = vmatmul.mubr.msk.f32.vlgmr.msra.gmra.mxu1 %vm400_vm2, %v816_v37 }
 0x6d6   :  { %5403 = vmatpush3.msra.mxu1 %v6265_v38  ;;  %5410 = vmatprep.mubr.msk.f32.mxu1 %vm5948_vm1, %v5947_v7 }
 0x6d7   :  { %5404 = vmatprep.subr.mxu1 %v5947_v7 }
 0x6d8   :  { %5405 = vmatpush3.msra.mxu1 %v6271_v39 }
 0x6d9   :  { %5406 = vmatprep.subr.mxu1 %v5947_v7 }
 0x6da   :  { %v5871_v45 = vpop.eup %5870  ;;  %5407 = vmatpush3.msra.mxu1 %v6280_v40 }
 0x6db   :  { %5408 = vmatprep.subr.mxu1 %v5947_v7  ;;  %v69_v43 = vmul.f32 %v5871_v45, %v53_v55 }
 0x6dc   :  { %5409 = vmatpush3.msra.mxu1 %v6287_v42 }
 0x6dd   :  { %5411 = vmatmul.mubr.msk.f32.vlgmr.msra.gmra.mxu1 %vm42_vm0, %v6209_v6  ;;  %v75_v47 = vmul.f32 %v6039_v20, %v69_v43  ;;  %5424 = vmatprep.subr.mxu1 %v5947_v7 }
 0x6de   :  { %5425 = vmatpush3.msra.mxu1 %v6050_v25  ;;  %5432 = vmatprep.mubr.msk.f32.mxu1 %vm5948_vm1, %v5947_v7 }
 0x6df   :  { %5426 = vmatprep.subr.mxu1 %v5947_v7  ;;  %v6302_v48 = vadd.f32 %v6041_v22, %v75_v47 }
 0x6e0   :  { %5427 = vmatpush3.msra.mxu1 %v6064_v27 }
 0x6e1   :  { %5428 = vmatprep.subr.mxu1 %v5947_v7 }
 0x6e2   :  { %5429 = vmatpush3.msra.mxu1 %v6078_v29 }
 0x6e3   :  { %5430 = vmatprep.subr.mxu1 %v5947_v7 }
 0x6e4   :  { %5431 = vmatpush3.msra.mxu1 %v6092_v31 }
 0x6e5   :  { %5433 = vmatmul.mubr.msk.f32.vlgmr.msra.gmra.mxu1 %vm42_vm0, %v6302_v48  ;;  %5446 = vmatprep.subr.mxu1 %v5947_v7 }
 0x6e6   :  { %5448 = vmatprep.mubr.msk.f32.mxu1 %vm5948_vm1, %v5947_v7 }
 0x795   :  { %v886_v20 = vpop.f32.mrf.mxu1 }
 0x796   :  { %5400 = vmatmul.mubr.msk.f32.vlgmr.msra.gmra.mxu0 %vm42_vm0, %v886_v20 }
 0x797   :  { %5414 = vmatpush3.msra.mxu0 %v5982_v8  ;;  %v5390_v22 = vpop.f32.mrf.mxu1  ;;  %5421 = vmatprep.mubr.msk.f32.mxu0 %vm5948_vm1, %v5947_v7 }
 0x798   :  { %5415 = vmatprep.subr.mxu0 %v5947_v7 }
 0x799   :  { %5416 = vmatpush3.msra.mxu0 %v5996_v10 }
 0x79a   :  { %5417 = vmatprep.subr.mxu0 %v5947_v7 }
 0x79b   :  { %5418 = vmatpush3.msra.mxu0 %v6010_v12 }
 0x79c   :  { %5419 = vmatprep.subr.mxu0 %v5947_v7 }
 0x79d   :  { %v1037_v25 = vpop.f32.mrf.mxu1  ;;  %5420 = vmatpush3.msra.mxu0 %v6024_v14 }
 0x79e   :  { %5422 = vmatmul.mubr.msk.f32.vlgmr.msra.gmra.mxu0 %vm42_vm0, %v6302_v48  ;;  %5435 = vmatprep.subr.mxu0 %v5947_v7 }
 0x79f   :  { %v5412_v8 = vpop.f32.mrf.mxu1  ;;  %5436 = vmatpush3.msra.mxu0 %v5987_v9  ;;  %5443 = vmatprep.mubr.msk.f32.mxu0 %vm5948_vm1, %v5947_v7 }
 0x7a0   :  { %5437 = vmatprep.subr.mxu0 %v5947_v7 }
 0x7a1   :  { %5438 = vmatpush3.msra.mxu0 %v6001_v11 }
 0x7a2   :  { %5439 = vmatprep.subr.mxu0 %v5947_v7 }
 0x7a3   :  { %5440 = vmatpush3.msra.mxu0 %v6015_v13 }
 0x7a4   :  { %5441 = vmatprep.subr.mxu0 %v5947_v7 }
 0x7a5   :  { %5442 = vmatpush3.msra.mxu0 %v6029_v15  ;;  %v1199_v10 = vpop.f32.mrf.mxu1 }
 0x7a6   :  { %5444 = vmatmul.mubr.msk.f32.vlgmr.msra.gmra.mxu0 %vm42_vm0, %v6302_v48  ;;  %5456 = vmatprep.subr.mxu0 %v5947_v7  ;;  %v1200_v9 = vadd.f32 %v6151_v41, %v1199_v10 }
 0x7a7   :  { %5457 = vmatpush3.msra.mxu0 %v6055_v26  ;;  %5464 = vmatprep.mubr.msk.f32.mxu0 %vm5948_vm1, %v5947_v7  ;;  %v5434_v11 = vpop.f32.mrf.mxu1 }
 0x7a8   :  { %5458 = vmatprep.subr.mxu0 %v5947_v7  ;;  %5447 = vmatpush3.xpose.msk.msra.mxu1 %vm42_vm0, %v1200_v9 }
 0x7a9   :  { %5459 = vmatpush3.msra.mxu0 %v6069_v28  ;;  %5451 = vmatprep.subr.mxu1 %v5947_v7 }
 0x7aa   :  { %5460 = vmatprep.subr.mxu0 %v5947_v7 }
 0x7ab   :  { %5461 = vmatpush3.msra.mxu0 %v6083_v30 }
 0x7ac   :  { %5462 = vmatprep.subr.mxu0 %v5947_v7 }
 0x7ad   :  { %5463 = vmatpush3.msra.mxu0 %v6099_v32 }
 0x7ae   :  { %5465 = vmatmul.mubr.msk.f32.vlgmr.msra.gmra.mxu0 %vm42_vm0, %v6302_v48  ;;  %5478 = vmatprep.subr.mxu0 %v5947_v7 }
 0x7af   :  { %5479 = vmatpush3.msra.mxu0 %v6112_v33  ;;  %5486 = vmatprep.mubr.msk.f32.mxu0 %vm5948_vm1, %v5947_v7 }
 0x7b0   :  { %5480 = vmatprep.subr.mxu0 %v5947_v7 }
 0x7b1   :  { %5481 = vmatpush3.msra.mxu0 %v6122_v34 }
 0x7b2   :  { %5482 = vmatprep.subr.mxu0 %v5947_v7 }
 0x7b3   :  { %5483 = vmatpush3.msra.mxu0 %v6132_v35  ;;  %v6384_v35 = vld [vmem:[%s6952_s0 + $0x11] ss:$0 sm:$0xff] }
 0x7b4   :  { %5484 = vmatprep.subr.mxu0 %v5947_v7 }
 0x7b5   :  { %5485 = vmatpush3.msra.mxu0 %v6141_v36 }
 0x7b6   :  { %5487 = vmatmul.mubr.msk.f32.vlgmr.msra.gmra.mxu0 %vm42_vm0, %v6302_v48  ;;  %5499 = vmatprep.subr.mxu0 %v5947_v7 }
 0x7b7   :  { %5500 = vmatpush3.msra.mxu0 %v6237_v60  ;;  %5507 = vmatprep.mubr.msk.f32.mxu0 %vm5948_vm1, %v5947_v7 }
 0x7b8   :  { %5501 = vmatprep.subr.mxu0 %v5947_v7 }
 0x7b9   :  { %5502 = vmatpush3.msra.mxu0 %v6242_v61  ;;  %v4922_v61 = vld [vmem:[#allocation3 + $0x170] ss:$0 sm:$0xff] }
 0x7ba   :  { %5503 = vmatprep.subr.mxu0 %v5947_v7 }
 0x7bb   :  { %5504 = vmatpush3.msra.mxu0 %v6249_v62 }
 0x7bc   :  { %5505 = vmatprep.subr.mxu0 %v5947_v7 }
 0x7bd   :  { %5506 = vmatpush3.msra.mxu0 %v6256_v63 }
 0x856   :  { %v964_v12 = vpop.f32.mrf.mxu0 }
 0x857   :  { %v1038_v13 = vadd.f32 %v1037_v25, %v964_v12 }
 0x858   :  { %v5401_v14 = vpop.f32.mrf.mxu0 }
 0x859   :  { %1041 = vst.msk [vmem:[#allocation2] sm:$0xff] %vm42_vm0, %v1038_v13  ;;  %v4923_v14 = vld [vmem:[#allocation3 + $0x171] ss:$0 sm:$0xff] }
 0x85e   :  { %v1120_v15 = vpop.f32.mrf.mxu0 }
 0x85f   :  { %v1121_v26 = vadd.f32 %v6153_v44, %v1120_v15 }
 0x860   :  { %v5423_v27 = vpop.f32.mrf.mxu0  ;;  %v1994_v60 = vld [vmem:[#allocation2] sm:$0xff] }
 0x861   :  { %5449 = vmatmul.mubr.msk.f32.vlgmr.msra.gmra.mxu1 %vm42_vm0, %v1121_v26  ;;  %v4924_v26 = vld [vmem:[#allocation3 + $0x172] ss:$0 sm:$0xff] }
 0x862   :  { %5453 = vmatprep.mubr.msk.f32.mxu1 %vm5948_vm1, %v5947_v7 }
 0x866   :  { %v1278_v28 = vpop.f32.mrf.mxu0 }
 0x867   :  { %v1279_v29 = vadd.f32 %v6156_v46, %v1278_v28 }
 0x868   :  { %v5445_v30 = vpop.f32.mrf.mxu0 }
 0x869   :  { %5452 = vmatpush3.msra.mxu1 %v1279_v29 }
 0x86a   :  { %5467 = vmatprep.subr.mxu1 %v5947_v7 }
 0x86e   :  { %v1521_v31 = vpop.f32.mrf.mxu0 }
 0x870   :  { %v5466_v32 = vpop.f32.mrf.mxu0 }
 0x876   :  { %v1679_v33 = vpop.f32.mrf.mxu0 }
 0x878   :  { %v5488_v34 = vpop.f32.mrf.mxu0 }
 0x921   :  { %v1354_v36 = vpop.f32.mrf.mxu1 }
 0x922   :  { %v1355_v41 = vadd.f32 %v6384_v35, %v1354_v36 }
 0x923   :  { %v5450_v44 = vpop.f32.mrf.mxu1 }
 0x924   :  { %v1358_v6 = vsel %vm400_vm2, %v1355_v41, -inf }
 0x925   :  { %1359 = vmax.xlane.f32.xlu0 %v1358_v6 }
 0x9ae   :  { %v1360_v46 = vpop.xlane.xlu0 %1359 }
 0x9af   :  { %v1361_v49 = vsub.f32 %v1355_v41, %v1360_v46 }
 0x9b1   :  { %v1362_v50 = vmul.f32 1.442695, %v1361_v49 }
 0x9b3   :  { %5872 = vpow2.f32 %v1362_v50  ;;  %v2048_v50 = vld [vmem:[#allocation3 + $0xc0] sm:$0xff] }
 0x9b4   :  { %5521 = vmatprep.subr.mxu0 %v2048_v50 }
 0x9c0   :  { %v5873_v51 = vpop.eup %5872 }
 0x9c1   :  { %v1364_v52 = vsel %vm400_vm2, %v5873_v51, 0.0 }
 0x9c2   :  { %1365 = vadd.xlane.f32.xlu1 %v1364_v52  ;;  %v2046_v52 = vld [vmem:[#allocation3 + $0xb0] sm:$0xff] }
 0xa4b   :  { %v1366_v54 = vpop.xlane.xlu1 %1365 }
 0xa4c   :  { %5874 = vrcp.f32 %v1366_v54  ;;  %v2045_v54 = vld [vmem:[#allocation3 + $0xa8] sm:$0xff] }
 0xa59   :  { %v5875_v55 = vpop.eup %5874 }
 0xa5a   :  { %v1368_v56 = vmul.f32 %v5875_v55, %v5873_v51  ;;  %v2047_v51 = vld [vmem:[#allocation3 + $0xb8] sm:$0xff] }
 0xa5c   :  { %5454 = vmatmul.mubr.msk.f32.vlgmr.msra.gmra.mxu1 %vm400_vm2, %v1368_v56 }
 0xa5d   :  { %5468 = vmatpush3.msra.mxu1 %v6177_v2  ;;  %5475 = vmatprep.mubr.msk.f32.mxu1 %vm5948_vm1, %v5947_v7 }
 0xa5e   :  { %5469 = vmatprep.subr.mxu1 %v5947_v7 }
 0xa5f   :  { %5470 = vmatpush3.msra.mxu1 %v6183_v3 }
 0xa60   :  { %5471 = vmatprep.subr.mxu1 %v5947_v7 }
 0xa61   :  { %5472 = vmatpush3.msra.mxu1 %v6192_v4  ;;  %v1522_v4 = vadd.f32 %v6213_v19, %v1521_v31 }
 0xa62   :  { %5473 = vmatprep.subr.mxu1 %v5947_v7 }
 0xa63   :  { %5474 = vmatpush3.msra.mxu1 %v6199_v5  ;;  %v1680_v5 = vadd.f32 %v6216_v23, %v1679_v33 }
 0xa64   :  { %5476 = vmatmul.mubr.msk.f32.vlgmr.msra.gmra.mxu1 %vm42_vm0, %v6302_v48  ;;  %5489 = vmatprep.subr.mxu1 %v5947_v7 }
 0xa65   :  { %5491 = vmatprep.mubr.msk.f32.mxu1 %vm5948_vm1, %v5947_v7 }
 0xb1c   :  { %v1438_v2 = vpop.f32.mrf.mxu1 }
 0xb1e   :  { %v5455_v57 = vpop.f32.mrf.mxu1 }
 0xb24   :  { %v1600_v58 = vpop.f32.mrf.mxu1 }
 0xb25   :  { %v1601_v3 = vadd.f32 %v6211_v17, %v1600_v58  ;;  %v2001_v17 = vadd.f32 %v4922_v61, %v1994_v60  ;;  %v2053_v60 = vld [vmem:[#allocation3 + $0x108] sm:$0xff] }
 0xb26   :  { %v5477_v59 = vpop.f32.mrf.mxu1 }
 0xb27   :  { %5490 = vmatpush3.xpose.msk.msra.mxu1 %vm42_vm0, %v1601_v3  ;;  %v2003_v1 = vadd.f32 %v2001_v17, %v6045_v24  ;;  %v2056_v59 = vld [vmem:[#allocation3 + $0x120] sm:$0xff]  ;;  %v2051_v17 = vld [vmem:[#allocation3 + $0xf8] sm:$0xff] }
 0xb28   :  { %5494 = vmatprep.subr.mxu1 %v5947_v7 }
 0xb29   :  { %v2007_v23 = vsel %vm42_vm0, %v2003_v1, 0.0 }
 0xb2a   :  { %5492 = vmatmul.mubr.msk.f32.vlgmr.msra.gmra.mxu1 %vm42_vm0, %v1522_v4  ;;  %v2055_v4 = vld [vmem:[#allocation3 + $0x118] sm:$0xff] }
 0xb2b   :  { %5495 = vmatpush3.msra.mxu1 %v1680_v5  ;;  %5496 = vmatprep.mubr.msk.f32.mxu1 %vm5948_vm1, %v5947_v7  ;;  %v2054_v5 = vld [vmem:[#allocation3 + $0x110] sm:$0xff] }
 0xb2c   :  { %5510 = vmatprep.subr.mxu1 %v5947_v7 }
 0xbea   :  { %v1755_v62 = vpop.f32.mrf.mxu1 }
 0xbeb   :  { %v1756_v63 = vadd.f32 %v6384_v35, %v1755_v62  ;;  %v2050_v62 = vld [vmem:[#allocation3 + $0xf0] sm:$0xff] }
 0xbec   :  { %v5493_v0 = vpop.f32.mrf.mxu1 }
 0xbed   :  { %v1759_v19 = vsel %vm400_vm2, %v1756_v63, -inf  ;;  %v4925_v0 = vld [vmem:[#allocation3 + $0x173] ss:$0 sm:$0xff] }
 0xbee   :  { %1760 = vmax.xlane.f32.xlu0 %v1759_v19 }
 0xbf2   :  { %2008 = vadd.xlane.f32.xlu0 %v2007_v23 }
 0xc77   :  { %v1761_v16 = vpop.xlane.xlu0 %1760 }
 0xc78   :  { %v1762_v18 = vsub.f32 %v1756_v63, %v1761_v16  ;;  %v2049_v63 = vld [vmem:[#allocation3 + $0xe8] sm:$0xff] }
 0xc7a   :  { %v1763_v21 = vmul.f32 1.442695, %v1762_v18 }
 0xc7b   :  { %v2009_v37 = vpop.xlane.xlu0 %2008 }
 0xc7c   :  { %5876 = vpow2.f32 %v1763_v21  ;;  %v2013_v45 = vmul.f32 0.03125, %v2009_v37 }
 0xc7e   :  { %v2015_v43 = vsub.f32 %v2003_v1, %v2013_v45 }
 0xc80   :  { %v2017_v47 = vmul.f32 %v2015_v43, %v2015_v43 }
 0xc82   :  { %v2019_v20 = vsel %vm42_vm0, %v2017_v47, 0.0 }
 0xc83   :  { %2020 = vadd.xlane.f32.xlu0 %v2019_v20 }
 0xc89   :  { %v5877_v22 = vpop.eup %5876 }
 0xc8a   :  { %v1765_v25 = vsel %vm400_vm2, %v5877_v22, 0.0 }
 0xc8b   :  { %1766 = vadd.xlane.f32.xlu1 %v1765_v25 }
 0xd0c   :  { %v2021_v9 = vpop.xlane.xlu0 %2020 }
 0xd0d   :  { %v2025_v11 = vmul.f32 0.03125, %v2021_v9 }
 0xd14   :  { %v1767_v24 = vpop.xlane.xlu1 %1766 }
 0xd15   :  { %5878 = vrcp.f32 %v1767_v24 }
 0xd22   :  { %v5879_v8 = vpop.eup %5878 }
 0xd23   :  { %v1769_v10 = vmul.f32 %v5879_v8, %v5877_v22  ;;  %v4928_v8 = vld [vmem:[#allocation3 + $0x174] ss:$0 sm:$0xff] }
 0xd25   :  { %5497 = vmatmul.mubr.msk.f32.vlgmr.msra.gmra.mxu1 %vm400_vm2, %v1769_v10 }
 0xd26   :  { %5511 = vmatpush3.msra.mxu1 %v6265_v38  ;;  %5518 = vmatprep.mubr.msk.f32.mxu1 %vm5948_vm1, %v5947_v7  ;;  %v2027_v38 = vadd.f32 1e-05, %v2025_v11 }
 0xd27   :  { %5512 = vmatprep.subr.mxu1 %v5947_v7 }
 0xd28   :  { %5513 = vmatpush3.msra.mxu1 %v6271_v39  ;;  %5880 = vrsqrt.f32 %v2027_v38 }
 0xd29   :  { %5514 = vmatprep.subr.mxu1 %v5947_v7 }
 0xd2a   :  { %5515 = vmatpush3.msra.mxu1 %v6280_v40 }
 0xd2b   :  { %5516 = vmatprep.subr.mxu1 %v5947_v7 }
 0xd2c   :  { %5517 = vmatpush3.msra.mxu1 %v6287_v42 }
 0xd2d   :  { %5519 = vmatmul.mubr.msk.f32.vlgmr.msra.gmra.mxu1 %vm42_vm0, %v1438_v2  ;;  %5532 = vmatprep.subr.mxu1 %v2056_v59 }
 0xd2e   :  { %5533 = vmatpush3.msra.mxu1 %v2056_v59  ;;  %v6589_v59 = vld [vmem:[%s6953_s1 + $0x1d8] sm:$0xff] }
 0xd2f   :  { %5534 = vmatprep.subr.mxu1 %v2055_v4 }
 0xd30   :  { %5535 = vmatpush3.msra.mxu1 %v2055_v4  ;;  %v6598_v4 = vld [vmem:[%s6953_s1 + $0x1d0] sm:$0xff] }
 0xd31   :  { %5536 = vmatprep.subr.mxu1 %v2054_v5 }
 0xd32   :  { %5537 = vmatpush3.msra.mxu1 %v2054_v5  ;;  %v6607_v5 = vld [vmem:[%s6953_s1 + $0x1c8] sm:$0xff] }
 0xd33   :  { %5538 = vmatprep.subr.mxu1 %v2053_v60 }
 0xd34   :  { %5539 = vmatpush3.msra.mxu1 %v2053_v60  ;;  %v6614_v60 = vld [vmem:[%s6953_s1 + $0x1c0] sm:$0xff] }
 0xd35   :  { %v5881_v12 = vpop.eup %5880 }
 0xd36   :  { %v2031_v13 = vmul.f32 %v5881_v12, %v2015_v43 }
 0xd38   :  { %v2037_v15 = vmul.f32 %v4923_v14, %v2031_v13 }
 0xd3a   :  { %v6430_v27 = vadd.f32 %v4924_v26, %v2037_v15 }
 0xde5   :  { %v1839_v39 = vpop.f32.mrf.mxu1 }
 0xde6   :  { %5508 = vmatmul.mubr.msk.f32.vlgmr.msra.gmra.mxu0 %vm42_vm0, %v1839_v39 }
 0xde7   :  { %v5498_v40 = vpop.f32.mrf.mxu1  ;;  %5529 = vmatprep.mubr.msk.f32.mxu0 %vm42_vm0, %v6430_v27  ;;  %5522 = vmatpush3.msra.mxu0 %v2048_v50 }
 0xde8   :  { %5523 = vmatprep.subr.mxu0 %v2047_v51 }
 0xde9   :  { %5524 = vmatpush3.msra.mxu0 %v2047_v51 }
 0xdea   :  { %5525 = vmatprep.subr.mxu0 %v2046_v52 }
 0xdeb   :  { %5526 = vmatpush3.msra.mxu0 %v2046_v52  ;;  %v6523_v52 = vld [vmem:[%s6953_s1 + $0x138] sm:$0xff] }
 0xdec   :  { %5527 = vmatprep.subr.mxu0 %v2045_v54 }
 0xded   :  { %v1989_v42 = vpop.f32.mrf.mxu1  ;;  %5528 = vmatpush3.msra.mxu0 %v2045_v54  ;;  %v6532_v54 = vld [vmem:[%s6953_s1 + $0x130] sm:$0xff] }
 0xdee   :  { %5551 = vmatprep.subr.mxu0 %v5947_v7 }
 0xdef   :  { %v5520_v28 = vpop.f32.mrf.mxu1 }
 0xdf0   :  { %v6472_v28 = vld [vmem:[%s6953_s1 + $0x110] sm:$0xff] }
 0xea6   :  { %v1916_v29 = vpop.f32.mrf.mxu0 }
 0xea7   :  { %v1990_v30 = vadd.f32 %v1989_v42, %v1916_v29  ;;  %v6459_v42 = vld [vmem:[%s6953_s1 + $0x118] sm:$0xff]  ;;  %v6479_v29 = vld [vmem:[%s6953_s1 + $0x150] sm:$0xff] }
 0xea8   :  { %v5509_v31 = vpop.f32.mrf.mxu0 }
 0xea9   :  { %1993 = vst.msk [vmem:[#allocation2 + $0x8] sm:$0xff] %vm42_vm0, %v1990_v30  ;;  %v6486_v30 = vld [vmem:[%s6953_s1 + $0x108] sm:$0xff] }
 0xeaa   :  { %v6493_v31 = vld [vmem:[%s6953_s1 + $0x148] sm:$0xff] }
 0xeb0   :  { %v1995_v32 = vld [vmem:[#allocation2 + $0x8] sm:$0xff] }
 0xeb1   :  { %v2002_v33 = vadd.f32 %v4922_v61, %v1995_v32  ;;  %v2052_v61 = vld [vmem:[#allocation3 + $0x100] sm:$0xff]  ;;  %v6500_v32 = vld [vmem:[%s6953_s1 + $0x100] sm:$0xff] }
 0xeb2   :  { %5540 = vmatprep.subr.mxu1 %v2052_v61 }
 0xeb3   :  { %v2004_v34 = vadd.f32 %v2002_v33, %v6302_v48  ;;  %5541 = vmatpush3.msra.mxu1 %v2052_v61  ;;  %v6505_v33 = vld [vmem:[%s6953_s1 + $0x140] sm:$0xff] }
 0xeb4   :  { %5542 = vmatprep.subr.mxu1 %v2051_v17 }
 0xeb5   :  { %v2010_v36 = vsel %vm42_vm0, %v2004_v34, 0.0  ;;  %5543 = vmatpush3.msra.mxu1 %v2051_v17 }
 0xeb6   :  { %2011 = vadd.xlane.f32.xlu1 %v2010_v36  ;;  %5544 = vmatprep.subr.mxu1 %v2050_v62 }
 0xeb7   :  { %5545 = vmatpush3.msra.mxu1 %v2050_v62 }
 0xeb8   :  { %5546 = vmatprep.subr.mxu1 %v2049_v63 }
 0xeb9   :  { %5547 = vmatpush3.msra.mxu1 %v2049_v63 }
 0xeba   :  { %5573 = vmatprep.subr.mxu1 %v5947_v7 }
 0xf3f   :  { %v2012_v41 = vpop.xlane.xlu1 %2011 }
 0xf40   :  { %v2014_v44 = vmul.f32 0.03125, %v2012_v41 }
 0xf42   :  { %v2016_v6 = vsub.f32 %v2004_v34, %v2014_v44 }
 0xf44   :  { %v2018_v46 = vmul.f32 %v2016_v6, %v2016_v6 }
 0xf46   :  { %v2022_v49 = vsel %vm42_vm0, %v2018_v46, 0.0 }
 0xf47   :  { %2023 = vadd.xlane.f32.xlu1 %v2022_v49  ;;  %v6514_v49 = vld [vmem:[#allocation3 + $0x176] ss:$0 sm:$0xff] }
 0xfd0   :  { %v2024_v48 = vpop.xlane.xlu1 %2023 }
 0xfd1   :  { %v2026_v55 = vmul.f32 0.03125, %v2024_v48  ;;  %v6541_v48 = vld [vmem:[%s6953_s1 + $0x128] sm:$0xff] }
 0xfd3   :  { %v2028_v56 = vadd.f32 1e-05, %v2026_v55  ;;  %v6550_v55 = vld [vmem:[%s6953_s1 + $0x120] sm:$0xff] }
 0xfd5   :  { %5882 = vrsqrt.f32 %v2028_v56  ;;  %v6557_v56 = vld [vmem:[%s6953_s1 + $0x198] sm:$0xff] }
 0xfe2   :  { %v5883_v2 = vpop.eup %5882 }
 0xfe3   :  { %v2032_v57 = vmul.f32 %v5883_v2, %v2016_v6  ;;  %v6512_v6 = vld [vmem:[#allocation3 + $0x175] ss:$0 sm:$0xff]  ;;  %v6566_v2 = vld [vmem:[%s6953_s1 + $0x190] sm:$0xff] }
 0xfe5   :  { %v2038_v58 = vmul.f32 %v4923_v14, %v2032_v57  ;;  %v6575_v57 = vld [vmem:[%s6953_s1 + $0x188] sm:$0xff] }
 0xfe7   :  { %v6440_v3 = vadd.f32 %v4924_v26, %v2038_v58  ;;  %v6582_v58 = vld [vmem:[%s6953_s1 + $0x180] sm:$0xff] }
 0xfe9   :  { %5530 = vmatmul.mubr.msk.f32.vlgmr.msra.gmra.mxu0 %vm42_vm0, %v6440_v3 }
 0xfea   :  { %5559 = vmatprep.mubr.msk.f32.mxu0 %vm5948_vm1, %v5947_v7  ;;  %5552 = vmatpush3.msra.mxu0 %v6459_v42 }
 0xfeb   :  { %5553 = vmatprep.subr.mxu0 %v5947_v7 }
 0xfec   :  { %5554 = vmatpush3.msra.mxu0 %v6472_v28 }
 0xfed   :  { %5555 = vmatprep.subr.mxu0 %v5947_v7 }
 0xfee   :  { %5556 = vmatpush3.msra.mxu0 %v6486_v30 }
 0xfef   :  { %5557 = vmatprep.subr.mxu0 %v5947_v7 }
 0xff0   :  { %5558 = vmatpush3.msra.mxu0 %v6500_v32 }
 0xff1   :  { %5562 = vmatprep.subr.mxu0 %v5947_v7 }
0x10a9   :  { %v5531_v19 = vpop.f32.mrf.mxu0 }
0x10aa   :  { %v2140_v1 = vadd.f32 %v5531_v19, %v4925_v0 }
0x10ab   :  { %v2134_v23 = vpop.f32.mrf.mxu0 }
0x10ac   :  { %v2146_v16 = vmul.f32 0.70710677, %v2140_v1  ;;  %v2135_v18 = vadd.f32 %v4925_v0, %v2134_v23  ;;  %v2144_v22 = vmul.f32 0.5, %v2140_v1  ;;  %v6624_v0 = vld [vmem:[#allocation3 + $0x179] ss:$0 sm:$0xff] }
0x10ad   :  { %v6626_v1 = vld [vmem:[#allocation3 + $0x177] ss:$0 sm:$0xff] }
0x10ae   :  { %5884 = verf.f32 %v2146_v16  ;;  %v2145_v21 = vmul.f32 0.70710677, %v2135_v18  ;;  %v2143_v47 = vmul.f32 0.5, %v2135_v18  ;;  %v6629_v16 = vld [vmem:[#allocation3 + $0x17b] ss:$0 sm:$0xff] }
0x10b0   :  { %5886 = verf.f32 %v2145_v21 }
0x10bb   :  { %v5885_v37 = vpop.eup %5884 }
0x10bc   :  { %v2150_v43 = vadd.f32 1.0, %v5885_v37 }
0x10bd   :  { %v5887_v45 = vpop.eup %5886 }
0x10be   :  { %v2149_v20 = vadd.f32 1.0, %v5887_v45  ;;  %v2152_v24 = vmul.f32 %v2150_v43, %v2144_v22 }
0x10c0   :  { %v2151_v25 = vmul.f32 %v2149_v20, %v2143_v47 }
0x10c2   :  { %5548 = vmatprep.mubr.msk.f32.mxu1 %vm2158_vm3, %v2151_v25 }
0x10c3   :  { %5549 = vmatmul.mubr.msk.f32.vlgmr.msra.gmra.mxu1 %vm2158_vm3, %v2152_v24 }
0x10c4   :  { %5581 = vmatprep.mubr.msk.f32.mxu1 %vm5948_vm1, %v5947_v7 }
0x1183   :  { %v5550_v10 = vpop.f32.mrf.mxu1 }
0x1184   :  { %v6451_v9 = vadd.f32 %v5550_v10, %v4928_v8 }
0x1185   :  { %v2231_v11 = vpop.f32.mrf.mxu1 }
0x1186   :  { %v2232_v38 = vadd.f32 %v4928_v8, %v2231_v11 }
0x1188   :  { %v2240_v12 = vadd.f32 %v2232_v38, %v6430_v27  ;;  %v6465_v27 = vld [vmem:[%s6953_s1 + $0x158] sm:$0xff] }
0x1189   :  { %5574 = vmatpush3.msra.mxu1 %v6465_v27 }
0x118a   :  { %v2244_v13 = vsel %vm42_vm0, %v2240_v12, 0.0  ;;  %5575 = vmatprep.subr.mxu1 %v5947_v7 }
0x118b   :  { %2245 = vadd.xlane.f32.xlu0 %v2244_v13  ;;  %5576 = vmatpush3.msra.mxu1 %v6479_v29 }
0x118c   :  { %5577 = vmatprep.subr.mxu1 %v5947_v7 }
0x118d   :  { %5578 = vmatpush3.msra.mxu1 %v6493_v31 }
0x118e   :  { %5579 = vmatprep.subr.mxu1 %v5947_v7 }
0x118f   :  { %5580 = vmatpush3.msra.mxu1 %v6505_v33 }
0x1190   :  { %5584 = vmatprep.subr.mxu1 %v5947_v7 }
0x1214   :  { %v2246_v14 = vpop.xlane.xlu0 %2245 }
0x1215   :  { %v2250_v15 = vmul.f32 0.03125, %v2246_v14 }
0x1217   :  { %v2252_v26 = vsub.f32 %v2240_v12, %v2250_v15 }
0x1219   :  { %v2254_v39 = vmul.f32 %v2252_v26, %v2252_v26 }
0x121b   :  { %v2256_v40 = vsel %vm42_vm0, %v2254_v39, 0.0  ;;  %v6651_v39 = vld [vmem:[%s6953_s1 + $0x1b0] sm:$0xff] }
0x121c   :  { %2257 = vadd.xlane.f32.xlu1 %v2256_v40  ;;  %v6660_v40 = vld [vmem:[%s6953_s1 + $0x1a8] sm:$0xff] }
0x12a5   :  { %v2258_v34 = vpop.xlane.xlu1 %2257 }
0x12a6   :  { %v2262_v36 = vmul.f32 0.03125, %v2258_v34  ;;  %v6667_v34 = vld [vmem:[%s6953_s1 + $0x1a0] sm:$0xff] }
0x12a8   :  { %v2264_v41 = vadd.f32 1e-05, %v2262_v36 }
0x12aa   :  { %5888 = vrsqrt.f32 %v2264_v41 }
0x12b7   :  { %v5889_v44 = vpop.eup %5888 }
0x12b8   :  { %v2268_v46 = vmul.f32 %v5889_v44, %v2252_v26  ;;  %v6679_v44 = vld [vmem:[#allocation3 + $0x17a] ss:$0 sm:$0xff] }
0x12ba   :  { %v2274_v50 = vmul.f32 %v6512_v6, %v2268_v46 }
0x12bc   :  { %v6518_v51 = vadd.f32 %v6514_v49, %v2274_v50  ;;  %v6681_v50 = vld [vmem:[#allocation3 + $0x178] ss:$0 sm:$0xff] }
0x12be   :  { %5560 = vmatmul.mubr.msk.f32.vlgmr.msra.gmra.mxu0 %vm42_vm0, %v6518_v51  ;;  %5582 = vmatmul.mubr.msk.f32.vlgmr.msra.gmra.mxu1 %vm42_vm0, %v6518_v51 }
0x12bf   :  { %5563 = vmatpush3.msra.mxu0 %v6523_v52  ;;  %5570 = vmatprep.mubr.msk.f32.mxu0 %vm5948_vm1, %v5947_v7 }
0x12c0   :  { %5564 = vmatprep.subr.mxu0 %v5947_v7  ;;  %5586 = vmatprep.mubr.msk.f32.mxu1 %vm5948_vm1, %v5947_v7 }
0x12c1   :  { %5565 = vmatpush3.msra.mxu0 %v6532_v54 }
0x12c2   :  { %5566 = vmatprep.subr.mxu0 %v5947_v7 }
0x12c3   :  { %5567 = vmatpush3.msra.mxu0 %v6541_v48 }
0x12c4   :  { %5568 = vmatprep.subr.mxu0 %v5947_v7 }
0x12c5   :  { %5569 = vmatpush3.msra.mxu0 %v6550_v55 }
0x12c6   :  { %5571 = vmatmul.mubr.msk.f32.vlgmr.msra.gmra.mxu0 %vm42_vm0, %v6518_v51  ;;  %5594 = vmatprep.subr.mxu0 %v5947_v7 }
0x12c7   :  { %5595 = vmatpush3.msra.mxu0 %v6557_v56  ;;  %5602 = vmatprep.mubr.msk.f32.mxu0 %vm5948_vm1, %v5947_v7 }
0x12c8   :  { %5596 = vmatprep.subr.mxu0 %v5947_v7 }
0x12c9   :  { %5597 = vmatpush3.msra.mxu0 %v6566_v2 }
0x12ca   :  { %5598 = vmatprep.subr.mxu0 %v5947_v7 }
0x12cb   :  { %5599 = vmatpush3.msra.mxu0 %v6575_v57 }
0x12cc   :  { %5600 = vmatprep.subr.mxu0 %v5947_v7 }
0x12cd   :  { %5601 = vmatpush3.msra.mxu0 %v6582_v58 }
0x12ce   :  { %5603 = vmatmul.mubr.msk.f32.vlgmr.msra.gmra.mxu0 %vm42_vm0, %v6518_v51  ;;  %5616 = vmatprep.subr.mxu0 %v5947_v7 }
0x12cf   :  { %5617 = vmatpush3.msra.mxu0 %v6589_v59  ;;  %5624 = vmatprep.mubr.msk.f32.mxu0 %vm5948_vm1, %v5947_v7 }
0x12d0   :  { %5618 = vmatprep.subr.mxu0 %v5947_v7 }
0x12d1   :  { %5619 = vmatpush3.msra.mxu0 %v6598_v4 }
0x12d2   :  { %5620 = vmatprep.subr.mxu0 %v5947_v7 }
0x12d3   :  { %5621 = vmatpush3.msra.mxu0 %v6607_v5 }
0x12d4   :  { %5622 = vmatprep.subr.mxu0 %v5947_v7 }
0x12d5   :  { %5623 = vmatpush3.msra.mxu0 %v6614_v60 }
0x12d6   :  { %5625 = vmatmul.mubr.msk.f32.vlgmr.msra.gmra.mxu0 %vm42_vm0, %v6518_v51  ;;  %5637 = vmatprep.subr.mxu0 %v5947_v7 }
0x12d7   :  { %5645 = vmatprep.mubr.msk.f32.mxu0 %vm5948_vm1, %v5947_v7 }
0x137e   :  { %v2361_v61 = vpop.f32.mrf.mxu0  ;;  %v2521_v17 = vpop.f32.mrf.mxu1 }
0x137f   :  { %v2362_v21 = vadd.f32 %v6626_v1, %v2361_v61  ;;  %v2522_v37 = vadd.f32 %v6629_v16, %v2521_v17  ;;  %v6684_v17 = vld [vmem:[#allocation3 + $0x17c] ss:$0 sm:$0xff] }
0x1380   :  { %v5561_v62 = vpop.f32.mrf.mxu0  ;;  %v5583_v63 = vpop.f32.mrf.mxu1 }
0x1386   :  { %v2441_v19 = vpop.f32.mrf.mxu0 }
0x1387   :  { %v2442_v23 = vadd.f32 %v6624_v0, %v2441_v19 }
0x1388   :  { %v5572_v18 = vpop.f32.mrf.mxu0 }
0x1389   :  { %5585 = vmatpush3.xpose.msk.msra.mxu1 %vm42_vm0, %v2442_v23  ;;  %v5920_v18 = vld [vmem:[%s6952_s0 + $0x10] ss:$0 sm:$0xff] }
0x138a   :  { %5589 = vmatprep.subr.mxu1 %v5947_v7 }
0x138c   :  { %5587 = vmatmul.mubr.msk.f32.vlgmr.msra.gmra.mxu1 %vm42_vm0, %v2362_v21 }
0x138d   :  { %5590 = vmatpush3.msra.mxu1 %v2522_v37  ;;  %5591 = vmatprep.mubr.msk.f32.mxu1 %vm5948_vm1, %v5947_v7 }
0x138e   :  { %v2766_v45 = vpop.f32.mrf.mxu0  ;;  %5605 = vmatprep.subr.mxu1 %v5947_v7 }
0x138f   :  { %v2767_v63 = vadd.f32 %v6681_v50, %v2766_v45 }
0x1390   :  { %v5604_v43 = vpop.f32.mrf.mxu0 }
0x1391   :  { %v2241_v43 = vadd.f32 %v6451_v9, %v6440_v3  ;;  %v6706_v3 = vld [vmem:[%s6953_s1 + $0x1f8] sm:$0xff]  ;;  %v6711_v9 = vld [vmem:[%s6953_s1 + $0x1f0] sm:$0xff] }
0x1392   :  { %5638 = vmatpush3.msra.mxu0 %v6706_v3 }
0x1393   :  { %5639 = vmatprep.subr.mxu0 %v5947_v7 }
0x1394   :  { %5640 = vmatpush3.msra.mxu0 %v6711_v9 }
0x1395   :  { %5641 = vmatprep.subr.mxu0 %v5947_v7 }
0x1396   :  { %v2926_v47 = vpop.f32.mrf.mxu0 }
0x1397   :  { %v2927_v19 = vadd.f32 %v6684_v17, %v2926_v47  ;;  %v2247_v47 = vsel %vm42_vm0, %v2241_v43, 0.0 }
0x1398   :  { %v5626_v20 = vpop.f32.mrf.mxu0 }
0x144c   :  { %v2597_v22 = vpop.f32.mrf.mxu1 }
0x144d   :  { %v2598_v25 = vadd.f32 %v6169_v53, %v2597_v22  ;;  %v6645_v53 = vld [vmem:[%s6953_s1 + $0x1b8] sm:$0xff] }
0x144e   :  { %v5588_v24 = vpop.f32.mrf.mxu1 }
0x144f   :  { %v2601_v8 = vsel %vm400_vm2, %v2598_v25, -inf }
0x1450   :  { %2602 = vmax.xlane.f32.xlu0 %v2601_v8 }
0x14d9   :  { %v2603_v10 = vpop.xlane.xlu0 %2602 }
0x14da   :  { %v2604_v11 = vsub.f32 %v2598_v25, %v2603_v10 }
0x14dc   :  { %v2605_v38 = vmul.f32 1.442695, %v2604_v11 }
0x14de   :  { %5890 = vpow2.f32 %v2605_v38 }
0x14eb   :  { %v5891_v12 = vpop.eup %5890 }
0x14ec   :  { %v2607_v13 = vsel %vm400_vm2, %v5891_v12, 0.0 }
0x14ed   :  { %2608 = vadd.xlane.f32.xlu1 %v2607_v13 }
0x1576   :  { %v2609_v14 = vpop.xlane.xlu1 %2608 }
0x1577   :  { %5892 = vrcp.f32 %v2609_v14  ;;  %v6718_v14 = vld [vmem:[%s6953_s1 + $0x1e8] sm:$0xff] }
0x1578   :  { %5642 = vmatpush3.msra.mxu0 %v6718_v14 }
0x1579   :  { %5643 = vmatprep.subr.mxu0 %v5947_v7 }
0x1584   :  { %v5893_v15 = vpop.eup %5892 }
0x1585   :  { %v2611_v26 = vmul.f32 %v5893_v15, %v5891_v12  ;;  %v6725_v15 = vld [vmem:[%s6953_s1 + $0x1e0] sm:$0xff] }
0x1586   :  { %5644 = vmatpush3.msra.mxu0 %v6725_v15 }
0x1587   :  { %5592 = vmatmul.mubr.msk.f32.vlgmr.msra.gmra.mxu1 %vm400_vm2, %v2611_v26  ;;  %5659 = vmatprep.subr.mxu0 %v5947_v7 }
0x1588   :  { %5606 = vmatpush3.msra.mxu1 %v6645_v53  ;;  %5613 = vmatprep.mubr.msk.f32.mxu1 %vm5948_vm1, %v5947_v7 }
0x1589   :  { %5607 = vmatprep.subr.mxu1 %v5947_v7 }
0x158a   :  { %5608 = vmatpush3.msra.mxu1 %v6651_v39 }
0x158b   :  { %5609 = vmatprep.subr.mxu1 %v5947_v7 }
0x158c   :  { %5610 = vmatpush3.msra.mxu1 %v6660_v40 }
0x158d   :  { %5611 = vmatprep.subr.mxu1 %v5947_v7 }
0x158e   :  { %5612 = vmatpush3.msra.mxu1 %v6667_v34 }
0x158f   :  { %5614 = vmatmul.mubr.msk.f32.vlgmr.msra.gmra.mxu1 %vm42_vm0, %v6518_v51  ;;  %5627 = vmatprep.subr.mxu1 %v5947_v7 }
0x1590   :  { %5629 = vmatprep.mubr.msk.f32.mxu1 %vm5948_vm1, %v5947_v7 }
0x1647   :  { %v6677_v36 = vpop.f32.mrf.mxu1 }
0x1649   :  { %v5593_v41 = vpop.f32.mrf.mxu1 }
0x164f   :  { %v2846_v46 = vpop.f32.mrf.mxu1 }
0x1650   :  { %v2847_v61 = vadd.f32 %v6679_v44, %v2846_v46 }
0x1651   :  { %v5615_v62 = vpop.f32.mrf.mxu1 }
0x1652   :  { %5628 = vmatpush3.xpose.msk.msra.mxu1 %vm42_vm0, %v2847_v61 }
0x1653   :  { %5632 = vmatprep.subr.mxu1 %v5947_v7 }
0x1655   :  { %5630 = vmatmul.mubr.msk.f32.vlgmr.msra.gmra.mxu1 %vm42_vm0, %v2767_v63 }
0x1656   :  { %5633 = vmatpush3.msra.mxu1 %v2927_v19  ;;  %5634 = vmatprep.mubr.msk.f32.mxu1 %vm5948_vm1, %v5947_v7  ;;  %v6734_v19 = vld [vmem:[%s6953_s1 + $0x178] sm:$0xff] }
0x1657   :  { %5648 = vmatprep.subr.mxu1 %v5947_v7 }
0x1715   :  { %v3002_v23 = vpop.f32.mrf.mxu1 }
0x1716   :  { %v3003_v21 = vadd.f32 %v5920_v18, %v3002_v23  ;;  %v6740_v23 = vld [vmem:[%s6953_s1 + $0x170] sm:$0xff]  ;;  %v6749_v18 = vld [vmem:[%s6953_s1 + $0x168] sm:$0xff] }
0x1717   :  { %v5631_v37 = vpop.f32.mrf.mxu1 }
0x1718   :  { %v3006_v45 = vsel %vm400_vm2, %v3003_v21, -inf }
0x1719   :  { %3007 = vmax.xlane.f32.xlu0 %v3006_v45 }
0x171d   :  { %2248 = vadd.xlane.f32.xlu0 %v2247_v47 }
0x17a2   :  { %v3008_v20 = vpop.xlane.xlu0 %3007 }
0x17a3   :  { %v3009_v22 = vsub.f32 %v3003_v21, %v3008_v20  ;;  %v6756_v21 = vld [vmem:[%s6953_s1 + $0x160] sm:$0xff] }
0x17a5   :  { %v3010_v25 = vmul.f32 1.442695, %v3009_v22 }
0x17a6   :  { %v2249_v24 = vpop.xlane.xlu0 %2248 }
0x17a7   :  { %5894 = vpow2.f32 %v3010_v25  ;;  %v2251_v8 = vmul.f32 0.03125, %v2249_v24 }
0x17a9   :  { %v2253_v10 = vsub.f32 %v2241_v43, %v2251_v8 }
0x17ab   :  { %v2255_v12 = vmul.f32 %v2253_v10, %v2253_v10 }
0x17ad   :  { %v2259_v13 = vsel %vm42_vm0, %v2255_v12, 0.0 }
0x17b4   :  { %v5895_v11 = vpop.eup %5894 }
0x17b5   :  { %v3012_v38 = vsel %vm400_vm2, %v5895_v11, 0.0 }
0x17b6   :  { %3013 = vadd.xlane.f32.xlu1 %v3012_v38 }
0x17ba   :  { %2260 = vadd.xlane.f32.xlu1 %v2259_v13  ;;  %v5037_v13 = vld [vmem:[#allocation3 + $0x17d] ss:$0 sm:$0xff] }
0x183f   :  { %v3014_v26 = vpop.xlane.xlu1 %3013 }
0x1840   :  { %5896 = vrcp.f32 %v3014_v26 }
0x1843   :  { %v2261_v41 = vpop.xlane.xlu1 %2260 }
0x1844   :  { %v2263_v46 = vmul.f32 0.03125, %v2261_v41 }
0x1846   :  { %v2265_v61 = vadd.f32 1e-05, %v2263_v46 }
0x1848   :  { %5898 = vrsqrt.f32 %v2265_v61 }
0x184d   :  { %v5897_v62 = vpop.eup %5896 }
0x184e   :  { %v3016_v63 = vmul.f32 %v5897_v62, %v5895_v11 }
0x1850   :  { %5635 = vmatmul.mubr.msk.f32.vlgmr.msra.gmra.mxu1 %vm400_vm2, %v3016_v63 }
0x1851   :  { %5649 = vmatpush3.msra.mxu1 %v6734_v19  ;;  %5656 = vmatprep.mubr.msk.f32.mxu1 %vm5948_vm1, %v5947_v7 }
0x1852   :  { %5650 = vmatprep.subr.mxu1 %v5947_v7 }
0x1853   :  { %5651 = vmatpush3.msra.mxu1 %v6740_v23 }
0x1854   :  { %5652 = vmatprep.subr.mxu1 %v5947_v7 }
0x1855   :  { %v5899_v37 = vpop.eup %5898  ;;  %5653 = vmatpush3.msra.mxu1 %v6749_v18 }
0x1856   :  { %v2269_v45 = vmul.f32 %v5899_v37, %v2253_v10  ;;  %5654 = vmatprep.subr.mxu1 %v5947_v7 }
0x1857   :  { %5655 = vmatpush3.msra.mxu1 %v6756_v21 }
0x1858   :  { %5657 = vmatmul.mubr.msk.f32.vlgmr.msra.gmra.mxu1 %vm42_vm0, %v6677_v36  ;;  %5670 = vmatprep.subr.mxu1 %v5947_v7  ;;  %v2275_v43 = vmul.f32 %v6512_v6, %v2269_v45 }
0x1859   :  { %5671 = vmatpush3.msra.mxu1 %v6523_v52  ;;  %5678 = vmatprep.mubr.msk.f32.mxu1 %vm5948_vm1, %v5947_v7 }
0x185a   :  { %5672 = vmatprep.subr.mxu1 %v5947_v7  ;;  %v6773_v47 = vadd.f32 %v6514_v49, %v2275_v43 }
0x185b   :  { %5673 = vmatpush3.msra.mxu1 %v6532_v54 }
0x185c   :  { %5674 = vmatprep.subr.mxu1 %v5947_v7 }
0x185d   :  { %5675 = vmatpush3.msra.mxu1 %v6541_v48 }
0x185e   :  { %5676 = vmatprep.subr.mxu1 %v5947_v7 }
0x185f   :  { %5677 = vmatpush3.msra.mxu1 %v6550_v55 }
0x1860   :  { %5679 = vmatmul.mubr.msk.f32.vlgmr.msra.gmra.mxu1 %vm42_vm0, %v6773_v47  ;;  %5692 = vmatprep.subr.mxu1 %v5947_v7 }
0x1861   :  { %5694 = vmatprep.mubr.msk.f32.mxu1 %vm5948_vm1, %v5947_v7 }
0x1910   :  { %v3086_v6 = vpop.f32.mrf.mxu1 }
0x1911   :  { %5646 = vmatmul.mubr.msk.f32.vlgmr.msra.gmra.mxu0 %vm42_vm0, %v3086_v6 }
0x1912   :  { %5660 = vmatpush3.msra.mxu0 %v6459_v42  ;;  %v5636_v52 = vpop.f32.mrf.mxu1  ;;  %5667 = vmatprep.mubr.msk.f32.mxu0 %vm5948_vm1, %v5947_v7 }
0x1913   :  { %5661 = vmatprep.subr.mxu0 %v5947_v7 }
0x1914   :  { %5662 = vmatpush3.msra.mxu0 %v6472_v28 }
0x1915   :  { %5663 = vmatprep.subr.mxu0 %v5947_v7 }
0x1916   :  { %5664 = vmatpush3.msra.mxu0 %v6486_v30 }
0x1917   :  { %5665 = vmatprep.subr.mxu0 %v5947_v7 }
0x1918   :  { %v3237_v49 = vpop.f32.mrf.mxu1  ;;  %5666 = vmatpush3.msra.mxu0 %v6500_v32 }
0x1919   :  { %5668 = vmatmul.mubr.msk.f32.vlgmr.msra.gmra.mxu0 %vm42_vm0, %v6773_v47  ;;  %5681 = vmatprep.subr.mxu0 %v5947_v7 }
0x191a   :  { %v5658_v42 = vpop.f32.mrf.mxu1  ;;  %5682 = vmatpush3.msra.mxu0 %v6465_v27  ;;  %5689 = vmatprep.mubr.msk.f32.mxu0 %vm5948_vm1, %v5947_v7 }
0x191b   :  { %5683 = vmatprep.subr.mxu0 %v5947_v7 }
0x191c   :  { %5684 = vmatpush3.msra.mxu0 %v6479_v29 }
0x191d   :  { %5685 = vmatprep.subr.mxu0 %v5947_v7 }
0x191e   :  { %5686 = vmatpush3.msra.mxu0 %v6493_v31 }
0x191f   :  { %5687 = vmatprep.subr.mxu0 %v5947_v7 }
0x1920   :  { %v3399_v28 = vpop.f32.mrf.mxu1  ;;  %5688 = vmatpush3.msra.mxu0 %v6505_v33 }
0x1921   :  { %v3400_v30 = vadd.f32 %v6624_v0, %v3399_v28  ;;  %5690 = vmatmul.mubr.msk.f32.vlgmr.msra.gmra.mxu0 %vm42_vm0, %v6773_v47  ;;  %5702 = vmatprep.subr.mxu0 %v5947_v7 }
0x1922   :  { %v5680_v27 = vpop.f32.mrf.mxu1  ;;  %5703 = vmatpush3.msra.mxu0 %v6557_v56  ;;  %5710 = vmatprep.mubr.msk.f32.mxu0 %vm5948_vm1, %v5947_v7 }
0x1923   :  { %5693 = vmatpush3.xpose.msk.msra.mxu1 %vm42_vm0, %v3400_v30  ;;  %5704 = vmatprep.subr.mxu0 %v5947_v7 }
0x1924   :  { %5705 = vmatpush3.msra.mxu0 %v6566_v2  ;;  %5697 = vmatprep.subr.mxu1 %v5947_v7 }
0x1925   :  { %5706 = vmatprep.subr.mxu0 %v5947_v7 }
0x1926   :  { %5707 = vmatpush3.msra.mxu0 %v6575_v57 }
0x1927   :  { %5708 = vmatprep.subr.mxu0 %v5947_v7 }
0x1928   :  { %5709 = vmatpush3.msra.mxu0 %v6582_v58 }
0x1929   :  { %5711 = vmatmul.mubr.msk.f32.vlgmr.msra.gmra.mxu0 %vm42_vm0, %v6773_v47  ;;  %5724 = vmatprep.subr.mxu0 %v5947_v7 }
0x192a   :  { %5725 = vmatpush3.msra.mxu0 %v6589_v59  ;;  %5732 = vmatprep.mubr.msk.f32.mxu0 %vm5948_vm1, %v5947_v7 }
0x192b   :  { %5726 = vmatprep.subr.mxu0 %v5947_v7 }
0x192c   :  { %5727 = vmatpush3.msra.mxu0 %v6598_v4 }
0x192d   :  { %5728 = vmatprep.subr.mxu0 %v5947_v7 }
0x192e   :  { %5729 = vmatpush3.msra.mxu0 %v6607_v5 }
0x192f   :  { %5730 = vmatprep.subr.mxu0 %v5947_v7 }
0x1930   :  { %5731 = vmatpush3.msra.mxu0 %v6614_v60 }
0x1931   :  { %5733 = vmatmul.mubr.msk.f32.vlgmr.msra.gmra.mxu0 %vm42_vm0, %v6773_v47  ;;  %5745 = vmatprep.subr.mxu0 %v5947_v7 }
0x1932   :  { %5746 = vmatpush3.msra.mxu0 %v6706_v3  ;;  %5753 = vmatprep.mubr.msk.f32.mxu0 %vm5948_vm1, %v5947_v7 }
0x1933   :  { %5747 = vmatprep.subr.mxu0 %v5947_v7 }
0x1934   :  { %5748 = vmatpush3.msra.mxu0 %v6711_v9 }
0x1935   :  { %5749 = vmatprep.subr.mxu0 %v5947_v7 }
0x1936   :  { %5750 = vmatpush3.msra.mxu0 %v6718_v14 }
0x1937   :  { %5751 = vmatprep.subr.mxu0 %v5947_v7 }
0x1938   :  { %5752 = vmatpush3.msra.mxu0 %v6725_v15 }
0x19d1   :  { %v3164_v29 = vpop.f32.mrf.mxu0 }
0x19d2   :  { %v3238_v31 = vadd.f32 %v3237_v49, %v3164_v29 }
0x19d3   :  { %v5647_v32 = vpop.f32.mrf.mxu0 }
0x19d4   :  { %3241 = vst.msk [vmem:[#allocation2] sm:$0xff] %vm42_vm0, %v3238_v31  ;;  %v5038_v31 = vld [vmem:[#allocation3 + $0x17e] ss:$0 sm:$0xff] }
0x19d9   :  { %v3320_v33 = vpop.f32.mrf.mxu0 }
0x19da   :  { %v3321_v54 = vadd.f32 %v6626_v1, %v3320_v33  ;;  %v5039_v33 = vld [vmem:[#allocation3 + $0x17f] ss:$0 sm:$0xff] }
0x19db   :  { %v5669_v48 = vpop.f32.mrf.mxu0  ;;  %v4194_v12 = vld [vmem:[#allocation2] sm:$0xff] }
0x19dc   :  { %5695 = vmatmul.mubr.msk.f32.vlgmr.msra.gmra.mxu1 %vm42_vm0, %v3321_v54 }
0x19dd   :  { %5699 = vmatprep.mubr.msk.f32.mxu1 %vm5948_vm1, %v5947_v7 }
0x19e1   :  { %v3478_v55 = vpop.f32.mrf.mxu0 }
0x19e2   :  { %v3479_v56 = vadd.f32 %v6629_v16, %v3478_v55 }
0x19e3   :  { %v5691_v2 = vpop.f32.mrf.mxu0 }
0x19e4   :  { %5698 = vmatpush3.msra.mxu1 %v3479_v56 }
0x19e5   :  { %5713 = vmatprep.subr.mxu1 %v5947_v7 }
0x19e9   :  { %v3721_v57 = vpop.f32.mrf.mxu0 }
0x19eb   :  { %v5712_v58 = vpop.f32.mrf.mxu0 }
0x19f1   :  { %v3879_v59 = vpop.f32.mrf.mxu0 }
0x19f3   :  { %v5734_v4 = vpop.f32.mrf.mxu0 }
0x1a9c   :  { %v3554_v5 = vpop.f32.mrf.mxu1 }
0x1a9d   :  { %v3555_v60 = vadd.f32 %v6384_v35, %v3554_v5 }
0x1a9e   :  { %v5696_v0 = vpop.f32.mrf.mxu1 }
0x1a9f   :  { %v3558_v1 = vsel %vm400_vm2, %v3555_v60, -inf }
0x1aa0   :  { %3559 = vmax.xlane.f32.xlu0 %v3558_v1 }
0x1b29   :  { %v3560_v36 = vpop.xlane.xlu0 %3559 }
0x1b2a   :  { %v3561_v20 = vsub.f32 %v3555_v60, %v3560_v36 }
0x1b2c   :  { %v3562_v22 = vmul.f32 1.442695, %v3561_v20  ;;  %v4248_v20 = vld [vmem:[#allocation3 + $0xe0] sm:$0xff] }
0x1b2d   :  { %5767 = vmatprep.subr.mxu0 %v4248_v20 }
0x1b2e   :  { %5900 = vpow2.f32 %v3562_v22  ;;  %v4247_v22 = vld [vmem:[#allocation3 + $0xd8] sm:$0xff] }
0x1b3b   :  { %v5901_v16 = vpop.eup %5900 }
0x1b3c   :  { %v3564_v25 = vsel %vm400_vm2, %v5901_v16, 0.0 }
0x1b3d   :  { %3565 = vadd.xlane.f32.xlu1 %v3564_v25  ;;  %v4245_v25 = vld [vmem:[#allocation3 + $0xc8] sm:$0xff] }
0x1bc6   :  { %v3566_v24 = vpop.xlane.xlu1 %3565 }
0x1bc7   :  { %5902 = vrcp.f32 %v3566_v24 }
0x1bd4   :  { %v5903_v8 = vpop.eup %5902 }
0x1bd5   :  { %v3568_v10 = vmul.f32 %v5903_v8, %v5901_v16  ;;  %v4246_v16 = vld [vmem:[#allocation3 + $0xd0] sm:$0xff] }
0x1bd7   :  { %5700 = vmatmul.mubr.msk.f32.vlgmr.msra.gmra.mxu1 %vm400_vm2, %v3568_v10 }
0x1bd8   :  { %5714 = vmatpush3.msra.mxu1 %v6645_v53  ;;  %5721 = vmatprep.mubr.msk.f32.mxu1 %vm5948_vm1, %v5947_v7 }
0x1bd9   :  { %5715 = vmatprep.subr.mxu1 %v5947_v7 }
0x1bda   :  { %5716 = vmatpush3.msra.mxu1 %v6651_v39 }
0x1bdb   :  { %5717 = vmatprep.subr.mxu1 %v5947_v7 }
0x1bdc   :  { %5718 = vmatpush3.msra.mxu1 %v6660_v40  ;;  %v3722_v40 = vadd.f32 %v6681_v50, %v3721_v57  ;;  %v5921_v50 = vld [vmem:[%s6952_s0 + $0x11] ss:$0 sm:$0xff] }
0x1bdd   :  { %5719 = vmatprep.subr.mxu1 %v5947_v7 }
0x1bde   :  { %5720 = vmatpush3.msra.mxu1 %v6667_v34  ;;  %v3880_v34 = vadd.f32 %v6684_v17, %v3879_v59 }
0x1bdf   :  { %5722 = vmatmul.mubr.msk.f32.vlgmr.msra.gmra.mxu1 %vm42_vm0, %v6773_v47  ;;  %5735 = vmatprep.subr.mxu1 %v5947_v7 }
0x1be0   :  { %5737 = vmatprep.mubr.msk.f32.mxu1 %vm5948_vm1, %v5947_v7 }
0x1c97   :  { %v3638_v35 = vpop.f32.mrf.mxu1 }
0x1c99   :  { %v5701_v53 = vpop.f32.mrf.mxu1 }
0x1c9f   :  { %v3800_v11 = vpop.f32.mrf.mxu1 }
0x1ca0   :  { %v3801_v39 = vadd.f32 %v6679_v44, %v3800_v11  ;;  %v4201_v44 = vadd.f32 %v5037_v13, %v4194_v12  ;;  %v4252_v12 = vld [vmem:[#allocation3 + $0x140] sm:$0xff] }
0x1ca1   :  { %v5723_v38 = vpop.f32.mrf.mxu1 }
0x1ca2   :  { %5736 = vmatpush3.xpose.msk.msra.mxu1 %vm42_vm0, %v3801_v39  ;;  %v4203_v15 = vadd.f32 %v4201_v44, %v6518_v51  ;;  %v4256_v39 = vld [vmem:[#allocation3 + $0x160] sm:$0xff]  ;;  %v4255_v38 = vld [vmem:[#allocation3 + $0x158] sm:$0xff]  ;;  %v4250_v44 = vld [vmem:[#allocation3 + $0x130] sm:$0xff] }
0x1ca3   :  { %5740 = vmatprep.subr.mxu1 %v5947_v7 }
0x1ca4   :  { %v4207_v26 = vsel %vm42_vm0, %v4203_v15, 0.0 }
0x1ca5   :  { %5738 = vmatmul.mubr.msk.f32.vlgmr.msra.gmra.mxu1 %vm42_vm0, %v3722_v40  ;;  %v4254_v40 = vld [vmem:[#allocation3 + $0x150] sm:$0xff] }
0x1ca6   :  { %5741 = vmatpush3.msra.mxu1 %v3880_v34  ;;  %5742 = vmatprep.mubr.msk.f32.mxu1 %vm5948_vm1, %v5947_v7  ;;  %v4253_v34 = vld [vmem:[#allocation3 + $0x148] sm:$0xff] }
0x1ca7   :  { %5756 = vmatprep.subr.mxu1 %v5947_v7 }
0x1d65   :  { %v3955_v3 = vpop.f32.mrf.mxu1 }
0x1d66   :  { %v3956_v9 = vadd.f32 %v5921_v50, %v3955_v3  ;;  %v4249_v3 = vld [vmem:[#allocation3 + $0x128] sm:$0xff]  ;;  %v5040_v50 = vld [vmem:[#allocation3 + $0x180] ss:$0 sm:$0xff] }
0x1d67   :  { %v5739_v14 = vpop.f32.mrf.mxu1 }
0x1d68   :  { %v3959_v17 = vsel %vm400_vm2, %v3956_v9, -inf }
0x1d69   :  { %3960 = vmax.xlane.f32.xlu0 %v3959_v17 }
0x1d6d   :  { %4208 = vadd.xlane.f32.xlu0 %v4207_v26 }
0x1df2   :  { %v3961_v41 = vpop.xlane.xlu0 %3960 }
0x1df3   :  { %v3962_v46 = vsub.f32 %v3956_v9, %v3961_v41 }
0x1df5   :  { %v3963_v61 = vmul.f32 1.442695, %v3962_v46 }
0x1df6   :  { %v4209_v62 = vpop.xlane.xlu0 %4208 }
0x1df7   :  { %5904 = vpow2.f32 %v3963_v61  ;;  %v4213_v63 = vmul.f32 0.03125, %v4209_v62 }
0x1df9   :  { %v4215_v37 = vsub.f32 %v4203_v15, %v4213_v63 }
0x1dfb   :  { %v4217_v45 = vmul.f32 %v4215_v37, %v4215_v37 }
0x1dfd   :  { %v4219_v43 = vsel %vm42_vm0, %v4217_v45, 0.0 }
0x1dfe   :  { %4220 = vadd.xlane.f32.xlu0 %v4219_v43 }
0x1e04   :  { %v5905_v6 = vpop.eup %5904 }
0x1e05   :  { %v3965_v52 = vsel %vm400_vm2, %v5905_v6, 0.0 }
0x1e06   :  { %3966 = vadd.xlane.f32.xlu1 %v3965_v52  ;;  %v5043_v52 = vld [vmem:[#allocation3 + $0x181] ss:$0 sm:$0xff] }
0x1e87   :  { %v4221_v28 = vpop.xlane.xlu0 %4220 }
0x1e88   :  { %v4225_v30 = vmul.f32 0.03125, %v4221_v28 }
0x1e8f   :  { %v3967_v51 = vpop.xlane.xlu1 %3966 }
0x1e90   :  { %5906 = vrcp.f32 %v3967_v51 }
0x1e9d   :  { %v5907_v49 = vpop.eup %5906 }
0x1e9e   :  { %v3969_v42 = vmul.f32 %v5907_v49, %v5905_v6 }
0x1ea0   :  { %5743 = vmatmul.mubr.msk.f32.vlgmr.msra.gmra.mxu1 %vm400_vm2, %v3969_v42 }
0x1ea1   :  { %5757 = vmatpush3.msra.mxu1 %v6734_v19  ;;  %5764 = vmatprep.mubr.msk.f32.mxu1 %vm5948_vm1, %v5947_v7  ;;  %v4227_v19 = vadd.f32 1e-05, %v4225_v30 }
0x1ea2   :  { %5758 = vmatprep.subr.mxu1 %v5947_v7 }
0x1ea3   :  { %5759 = vmatpush3.msra.mxu1 %v6740_v23  ;;  %5908 = vrsqrt.f32 %v4227_v19 }
0x1ea4   :  { %5760 = vmatprep.subr.mxu1 %v5947_v7 }
0x1ea5   :  { %5761 = vmatpush3.msra.mxu1 %v6749_v18 }
0x1ea6   :  { %5762 = vmatprep.subr.mxu1 %v5947_v7 }
0x1ea7   :  { %5763 = vmatpush3.msra.mxu1 %v6756_v21 }
0x1ea8   :  { %5765 = vmatmul.mubr.msk.f32.vlgmr.msra.gmra.mxu1 %vm42_vm0, %v3638_v35  ;;  %5778 = vmatprep.subr.mxu1 %v4256_v39 }
0x1ea9   :  { %5779 = vmatpush3.msra.mxu1 %v4256_v39 }
0x1eaa   :  { %5780 = vmatprep.subr.mxu1 %v4255_v38 }
0x1eab   :  { %5781 = vmatpush3.msra.mxu1 %v4255_v38 }
0x1eac   :  { %5782 = vmatprep.subr.mxu1 %v4254_v40 }
0x1ead   :  { %5783 = vmatpush3.msra.mxu1 %v4254_v40 }
0x1eae   :  { %5784 = vmatprep.subr.mxu1 %v4253_v34 }
0x1eaf   :  { %5785 = vmatpush3.msra.mxu1 %v4253_v34  ;;  %v4563_v34 = vld [vmem:[#allocation3] sm:$0x3f] }
0x1eb0   :  { %v5909_v27 = vpop.eup %5908  ;;  %5786 = vmatprep.subr.mxu1 %v4252_v12 }
0x1eb1   :  { %v4231_v29 = vmul.f32 %v5909_v27, %v4215_v37  ;;  %5787 = vmatpush3.msra.mxu1 %v4252_v12  ;;  %v4562_v12 = vld [vmem:[%s6952_s0 + $0x12] sm:$0x3] }
0x1eb3   :  { %v4237_v32 = vmul.f32 %v5038_v31, %v4231_v29 }
0x1eb5   :  { %v6896_v54 = vadd.f32 %v5039_v33, %v4237_v32 }
0x1f60   :  { %v4039_v23 = vpop.f32.mrf.mxu1 }
0x1f61   :  { %5754 = vmatmul.mubr.msk.f32.vlgmr.msra.gmra.mxu0 %vm42_vm0, %v4039_v23 }
0x1f62   :  { %v5744_v18 = vpop.f32.mrf.mxu1  ;;  %5775 = vmatprep.mubr.msk.f32.mxu0 %vm42_vm0, %v6896_v54  ;;  %5768 = vmatpush3.msra.mxu0 %v4248_v20 }
0x1f63   :  { %5769 = vmatprep.subr.mxu0 %v4247_v22 }
0x1f64   :  { %5770 = vmatpush3.msra.mxu0 %v4247_v22 }
0x1f65   :  { %5771 = vmatprep.subr.mxu0 %v4246_v16 }
0x1f66   :  { %5772 = vmatpush3.msra.mxu0 %v4246_v16  ;;  %v5046_v16 = vld [vmem:[#allocation3 + $0x182] ss:$0 sm:$0xff] }
0x1f67   :  { %5773 = vmatprep.subr.mxu0 %v4245_v25 }
0x1f68   :  { %v4189_v21 = vpop.f32.mrf.mxu1  ;;  %5774 = vmatpush3.msra.mxu0 %v4245_v25 }
0x1f69   :  { %5797 = vmatprep.subr.mxu0 %v5947_v7 }
0x1f6a   :  { %v5766_v48 = vpop.f32.mrf.mxu1 }
0x2021   :  { %v4116_v55 = vpop.f32.mrf.mxu0 }
0x2022   :  { %v4190_v56 = vadd.f32 %v4189_v21, %v4116_v55 }
0x2023   :  { %v5755_v2 = vpop.f32.mrf.mxu0 }
0x2024   :  { %4193 = vst.msk [vmem:[#allocation2 + $0x8] sm:$0xff] %vm42_vm0, %v4190_v56 }
0x202b   :  { %v4195_v57 = vld [vmem:[#allocation2 + $0x8] sm:$0xff] }
0x202c   :  { %v4202_v58 = vadd.f32 %v5037_v13, %v4195_v57  ;;  %v4251_v13 = vld [vmem:[#allocation3 + $0x138] sm:$0xff]  ;;  %v4650_v57 = vld [vmem:[#allocation3 + $0x20] sm:$0xff] }
0x202d   :  { %5788 = vmatprep.subr.mxu1 %v4251_v13 }
0x202e   :  { %v4204_v59 = vadd.f32 %v4202_v58, %v6773_v47  ;;  %5789 = vmatpush3.msra.mxu1 %v4251_v13  ;;  %v4648_v58 = vld [vmem:[#allocation3 + $0x10] sm:$0xff]  ;;  %v4666_v13 = vld [vmem:[#allocation3 + $0xa0] sm:$0xff] }
0x202f   :  { %5790 = vmatprep.subr.mxu1 %v4250_v44 }
0x2030   :  { %v4210_v4 = vsel %vm42_vm0, %v4204_v59, 0.0  ;;  %5791 = vmatpush3.msra.mxu1 %v4250_v44  ;;  %v4665_v44 = vld [vmem:[#allocation3 + $0x98] sm:$0xff] }
0x2031   :  { %4211 = vadd.xlane.f32.xlu1 %v4210_v4  ;;  %5792 = vmatprep.subr.mxu1 %v4249_v3 }
0x2032   :  { %5793 = vmatpush3.msra.mxu1 %v4249_v3  ;;  %v4664_v3 = vld [vmem:[#allocation3 + $0x90] sm:$0xff] }
0x2033   :  { %5844 = vmatprep.subr.mxu1 %v5947_v7 }
0x20ba   :  { %v4212_v5 = vpop.xlane.xlu1 %4211 }
0x20bb   :  { %v4214_v60 = vmul.f32 0.03125, %v4212_v5 }
0x20bd   :  { %v4216_v0 = vsub.f32 %v4204_v59, %v4214_v60 }
0x20bf   :  { %v4218_v1 = vmul.f32 %v4216_v0, %v4216_v0 }
0x20c1   :  { %v4222_v36 = vsel %vm42_vm0, %v4218_v1, 0.0 }
0x20c2   :  { %4223 = vadd.xlane.f32.xlu1 %v4222_v36  ;;  %v4481_v36 = vlaneseq }
0x20c4   :  { %v4484_v20 = vshrl.u32 %v4481_v36, 7  ;;  %v4482_v25 = vand.u32 127, %v4481_v36 }
0x214b   :  { %v4224_v47 = vpop.xlane.xlu1 %4223 }
0x214c   :  { %v4226_v24 = vmul.f32 0.03125, %v4224_v47  ;;  %v4485_v47 = vmul.u32 8, %v4484_v20 }
0x214e   :  { %v4228_v8 = vadd.f32 1e-05, %v4226_v24  ;;  %vm4486_vm4 = vcmp.eq.s32.totalorder %v4482_v25, %v4485_v47 }
0x214f   :  { %v4487_v40 = vsel %vm4486_vm4, 1.0, %v5947_v7 }
0x2150   :  { %5910 = vrsqrt.f32 %v4228_v8 }
0x215d   :  { %v5911_v10 = vpop.eup %5910 }
0x215e   :  { %v4232_v35 = vmul.f32 %v5911_v10, %v4216_v0  ;;  %v5047_v10 = vld [vmem:[#allocation3 + $0x183] ss:$0 sm:$0xff] }
0x2160   :  { %v4238_v53 = vmul.f32 %v5038_v31, %v4232_v35 }
0x2162   :  { %v4244_v11 = vadd.f32 %v5039_v33, %v4238_v53 }
0x2164   :  { %5776 = vmatmul.mubr.msk.f32.vlgmr.msra.gmra.mxu0 %vm42_vm0, %v4244_v11 }
0x2165   :  { %5801 = vmatprep.mubr.msk.f32.mxu0 %vm5948_vm1, %v5947_v7 }
0x2224   :  { %v5777_v9 = vpop.f32.mrf.mxu0 }
0x2225   :  { %v4340_v14 = vadd.f32 %v5777_v9, %v5040_v50  ;;  %v4662_v9 = vld [vmem:[#allocation3 + $0x80] sm:$0xff] }
0x2226   :  { %v4334_v17 = vpop.f32.mrf.mxu0 }
0x2227   :  { %v4346_v15 = vmul.f32 0.70710677, %v4340_v14  ;;  %v4335_v26 = vadd.f32 %v5040_v50, %v4334_v17  ;;  %v4344_v45 = vmul.f32 0.5, %v4340_v14  ;;  %v4663_v50 = vld [vmem:[#allocation3 + $0x88] sm:$0xff]  ;;  %v4661_v14 = vld [vmem:[#allocation3 + $0x78] sm:$0xff]  ;;  %v4660_v17 = vld [vmem:[#allocation3 + $0x70] sm:$0xff] }
0x2229   :  { %5912 = verf.f32 %v4346_v15  ;;  %v4345_v41 = vmul.f32 0.70710677, %v4335_v26  ;;  %v4343_v63 = vmul.f32 0.5, %v4335_v26  ;;  %v4659_v15 = vld [vmem:[#allocation3 + $0x68] sm:$0xff]  ;;  %v4658_v26 = vld [vmem:[#allocation3 + $0x60] sm:$0xff] }
0x222b   :  { %5914 = verf.f32 %v4345_v41  ;;  %v4657_v41 = vld [vmem:[#allocation3 + $0x58] sm:$0xff] }
0x2236   :  { %v5913_v46 = vpop.eup %5912 }
0x2237   :  { %v4350_v62 = vadd.f32 1.0, %v5913_v46  ;;  %v4656_v46 = vld [vmem:[#allocation3 + $0x50] sm:$0xff] }
0x2238   :  { %v5915_v61 = vpop.eup %5914 }
0x2239   :  { %v4349_v37 = vadd.f32 1.0, %v5915_v61  ;;  %v4352_v6 = vmul.f32 %v4350_v62, %v4344_v45  ;;  %v4655_v61 = vld [vmem:[#allocation3 + $0x48] sm:$0xff]  ;;  %v4654_v62 = vld [vmem:[#allocation3 + $0x40] sm:$0xff]  ;;  %v4652_v45 = vld [vmem:[#allocation3 + $0x30] sm:$0xff] }
0x223b   :  { %v4351_v43 = vmul.f32 %v4349_v37, %v4343_v63  ;;  %v4647_v63 = vld [vmem:[#allocation3 + $0x8] sm:$0xff]  ;;  %v4653_v37 = vld [vmem:[#allocation3 + $0x38] sm:$0xff] }
0x223d   :  { %5794 = vmatprep.mubr.msk.f32.mxu1 %vm2158_vm3, %v4351_v43  ;;  %v4651_v43 = vld [vmem:[#allocation3 + $0x28] sm:$0xff] }
0x223e   :  { %5795 = vmatmul.mubr.msk.f32.vlgmr.msra.gmra.mxu1 %vm2158_vm3, %v4352_v6 }
0x223f   :  { %5852 = vmatprep.mubr.msk.f32.mxu1 %vm5948_vm1, %v5947_v7  ;;  %5845 = vmatpush3.msra.mxu1 %v4650_v57 }
0x2240   :  { %5846 = vmatprep.subr.mxu1 %v5947_v7 }
0x22fe   :  { %v5796_v51 = vpop.f32.mrf.mxu1 }
0x22ff   :  { %v4436_v49 = vadd.f32 %v5796_v51, %v5043_v52  ;;  %v5049_v51 = vld [vmem:[#allocation3 + $0x184] ss:$0 sm:$0xff] }
0x2300   :  { %v4430_v42 = vpop.f32.mrf.mxu1 }
0x2301   :  { %v4431_v28 = vadd.f32 %v5043_v52, %v4430_v42  ;;  %v4440_v30 = vadd.f32 %v4436_v49, %v4244_v11 }
0x2303   :  { %v4446_v19 = vsel %vm42_vm0, %v4440_v30, 0.0  ;;  %v4439_v27 = vadd.f32 %v4431_v28, %v6896_v54  ;;  %v4649_v54 = vld [vmem:[#allocation3 + $0x18] sm:$0xff] }
0x2304   :  { %4447 = vadd.xlane.f32.xlu0 %v4446_v19  ;;  %5847 = vmatpush3.msra.mxu1 %v4649_v54 }
0x2305   :  { %v4443_v29 = vsel %vm42_vm0, %v4439_v27, 0.0  ;;  %5848 = vmatprep.subr.mxu1 %v5947_v7 }
0x2306   :  { %4444 = vadd.xlane.f32.xlu1 %v4443_v29  ;;  %5849 = vmatpush3.msra.mxu1 %v4648_v58  ;;  %v5053_v29 = vld [vmem:[#allocation3 + $0x185] ss:$0 sm:$0xff] }
0x2307   :  { %5850 = vmatprep.subr.mxu1 %v5947_v7 }
0x2308   :  { %5851 = vmatpush3.msra.mxu1 %v4647_v63 }
0x238d   :  { %v4448_v31 = vpop.xlane.xlu0 %4447 }
0x238e   :  { %v4450_v32 = vmul.f32 0.03125, %v4448_v31 }
0x238f   :  { %v4445_v33 = vpop.xlane.xlu1 %4444 }
0x2390   :  { %v4452_v23 = vsub.f32 %v4440_v30, %v4450_v32  ;;  %v4449_v18 = vmul.f32 0.03125, %v4445_v33 }
0x2392   :  { %v4451_v21 = vsub.f32 %v4439_v27, %v4449_v18  ;;  %v4454_v48 = vmul.f32 %v4452_v23, %v4452_v23 }
0x2394   :  { %v4458_v55 = vsel %vm42_vm0, %v4454_v48, 0.0  ;;  %v4453_v56 = vmul.f32 %v4451_v21, %v4451_v21 }
0x2395   :  { %4459 = vadd.xlane.f32.xlu0 %v4458_v55 }
0x2396   :  { %v4455_v2 = vsel %vm42_vm0, %v4453_v56, 0.0 }
0x2397   :  { %4456 = vadd.xlane.f32.xlu1 %v4455_v2 }
0x241e   :  { %v4460_v59 = vpop.xlane.xlu0 %4459 }
0x241f   :  { %v4462_v4 = vmul.f32 0.03125, %v4460_v59 }
0x2420   :  { %v4457_v5 = vpop.xlane.xlu1 %4456 }
0x2421   :  { %v4464_v60 = vadd.f32 1e-05, %v4462_v4  ;;  %v4461_v0 = vmul.f32 0.03125, %v4457_v5 }
0x2423   :  { %5916 = vrsqrt.f32 %v4464_v60  ;;  %v4463_v1 = vadd.f32 1e-05, %v4461_v0 }
0x2425   :  { %5918 = vrsqrt.f32 %v4463_v1 }
0x2430   :  { %v5917_v22 = vpop.eup %5916 }
0x2431   :  { %v4468_v24 = vmul.f32 %v5917_v22, %v4452_v23 }
0x2432   :  { %v5919_v8 = vpop.eup %5918 }
0x2433   :  { %v4474_v35 = vmul.f32 %v5046_v16, %v4468_v24  ;;  %v4467_v53 = vmul.f32 %v5919_v8, %v4451_v21 }
0x2435   :  { %v4480_v11 = vadd.f32 %v5047_v10, %v4474_v35  ;;  %v4473_v39 = vmul.f32 %v5046_v16, %v4467_v53 }
0x2437   :  { %5798 = vmatpush3.msra.mxu0 %v4480_v11  ;;  %v4479_v38 = vadd.f32 %v5047_v10, %v4473_v39 }
0x2438   :  { %5799 = vmatprep.subr.mxu0 %v5947_v7 }
0x2439   :  { %5800 = vmatpush3.msra.mxu0 %v4479_v38 }
0x243a   :  { %5802 = vmatmul.mubr.msk.f32.vlgmr.msra.gmra.mxu0 %vm4488_vm5, %v4487_v40  ;;  %5804 = vmatprep.subr.mxu0 %v5947_v7 }
0x243b   :  { %5805 = vmatpush3.msk.msra.mxu0 %vm4573_vm6, %v4563_v34  ;;  %5806 = vmatprep.mubr.msk.f32.mxu0 %vm5948_vm1, %v5947_v7 }
0x243c   :  { %5809 = vmatprep.subr.mxu0 %v5947_v7 }
0x243e   :  { %5807 = vmatmul.mubr.msk.f32.vlgmr.msra.gmra.mxu0 %vm4569_vm7, %v4562_v12 }
0x243f   :  { %5810 = vmatpush3.msra.mxu0 %v4666_v13  ;;  %5841 = vmatprep.mubr.msk.f32.mxu0 %vm5948_vm1, %v5947_v7 }
0x2440   :  { %5811 = vmatprep.subr.mxu0 %v5947_v7 }
0x2441   :  { %5812 = vmatpush3.msra.mxu0 %v4665_v44 }
0x2442   :  { %5813 = vmatprep.subr.mxu0 %v5947_v7 }
0x2443   :  { %5814 = vmatpush3.msra.mxu0 %v4664_v3 }
0x2444   :  { %5815 = vmatprep.subr.mxu0 %v5947_v7 }
0x2445   :  { %5816 = vmatpush3.msra.mxu0 %v4663_v50 }
0x2446   :  { %5817 = vmatprep.subr.mxu0 %v5947_v7 }
0x2447   :  { %5818 = vmatpush3.msra.mxu0 %v4662_v9 }
0x2448   :  { %5819 = vmatprep.subr.mxu0 %v5947_v7 }
0x2449   :  { %5820 = vmatpush3.msra.mxu0 %v4661_v14 }
0x244a   :  { %5821 = vmatprep.subr.mxu0 %v5947_v7 }
0x244b   :  { %5822 = vmatpush3.msra.mxu0 %v4660_v17 }
0x244c   :  { %5823 = vmatprep.subr.mxu0 %v5947_v7 }
0x244d   :  { %5824 = vmatpush3.msra.mxu0 %v4659_v15 }
0x244e   :  { %5825 = vmatprep.subr.mxu0 %v5947_v7 }
0x244f   :  { %5826 = vmatpush3.msra.mxu0 %v4658_v26 }
0x2450   :  { %5827 = vmatprep.subr.mxu0 %v5947_v7 }
0x2451   :  { %5828 = vmatpush3.msra.mxu0 %v4657_v41 }
0x2452   :  { %5829 = vmatprep.subr.mxu0 %v5947_v7 }
0x2453   :  { %5830 = vmatpush3.msra.mxu0 %v4656_v46 }
0x2454   :  { %5831 = vmatprep.subr.mxu0 %v5947_v7 }
0x2455   :  { %5832 = vmatpush3.msra.mxu0 %v4655_v61 }
0x2456   :  { %5833 = vmatprep.subr.mxu0 %v5947_v7 }
0x2457   :  { %5834 = vmatpush3.msra.mxu0 %v4654_v62 }
0x2458   :  { %5835 = vmatprep.subr.mxu0 %v5947_v7 }
0x2459   :  { %5836 = vmatpush3.msra.mxu0 %v4653_v37 }
0x245a   :  { %5837 = vmatprep.subr.mxu0 %v5947_v7 }
0x245b   :  { %5838 = vmatpush3.msra.mxu0 %v4652_v45 }
0x245c   :  { %5839 = vmatprep.subr.mxu0 %v5947_v7 }
0x245d   :  { %5840 = vmatpush3.msra.mxu0 %v4651_v43 }
0x24fa   :  { %v4558_v6 = vpop.f32.mrf.mxu0 }
0x24fb   :  { %5853 = vmatmul.mubr.msk.f32.vlgmr.msra.gmra.mxu1 %vm42_vm0, %v4558_v6 }
0x24fc   :  { %v5803_v52 = vpop.f32.mrf.mxu0 }
0x24fe   :  { %v4643_v49 = vpop.f32.mrf.mxu0 }
0x24ff   :  { %v4644_v42 = vadd.f32 %v5049_v51, %v4643_v49 }
0x2500   :  { %v5808_v28 = vpop.f32.mrf.mxu0 }
0x2501   :  { %5842 = vmatmul.mubr.f32.vlgmr.msra.gmra.mxu0 %v4644_v42 }
0x25bb   :  { %v4806_v30 = vpop.f32.mrf.mxu1 }
0x25bd   :  { %v5854_v19 = vpop.f32.mrf.mxu1 }
0x25c1   :  { %v4733_v27 = vpop.f32.mrf.mxu0 }
0x25c2   :  { %v4807_v31 = vadd.f32 %v4806_v30, %v4733_v27 }
0x25c3   :  { %v5843_v32 = vpop.f32.mrf.mxu0 }
0x25c4   :  { %v4815_v33 = vadd.f32 %v5053_v29, %v4807_v31 }
0x25c6   :  { %4816 = vst [vmem:[%s6955_s3] sm:$0x3] %v4815_v33 }
0x25c7   :  { %4821 = vsyncpa [#allocation4], 1 }

</bundles_post_ra>
